<compile_context>
chip_gen: v6e
topology: v6e:2x2x1
jax: 0.10.0
libtpu: 0.0.40
codegen_flags: <defaults>
</compile_context>

<pallas_src>
import functools

import jax
import jax.numpy as jnp
from jax.experimental import pallas as pl
from jax.experimental.pallas import tpu as pltpu


def _round_up(x, m):
    return (x + m - 1) // m * m


def _pick_tm(M, align=16, cap=256):
    """Largest tile (multiple of `align`, <= cap) dividing M rounded up to `align`."""
    Mp = _round_up(M, align)
    best, t = align, align
    while t <= min(cap, Mp):
        if Mp % t == 0:
            best = t
        t += align
    return best, Mp


def _pick_tn(N):
    if N % 256 == 0:
        return 256          # match 256-wide MXU on v6e/v7x, >=2 parallel blocks
    if N % 128 == 0:
        return 128
    return N                # full-dim block (legal, no padding needed)


# ---------------- GEMM (+bias, fused epilogue) kernel ----------------
def _gemm_bias_kernel(a_ref, b_ref, bias_ref, o_ref, *, epilogue):
    acc = jnp.dot(a_ref[...], b_ref[...], preferred_element_type=jnp.float32)
    out = acc + bias_ref[...]                      # bias is (1, tn) f32, broadcasts
    if epilogue == "relu":
        out = jnp.maximum(out, 0.0)
    elif epilogue == "log_softmax":
        m = jnp.max(out, axis=-1, keepdims=True)
        s = out - m
        lse = jnp.log(jnp.sum(jnp.exp(s), axis=-1, keepdims=True))
        out = s - lse
    o_ref[...] = out.astype(o_ref.dtype)


def pallas_linear(a, w, bias2d, *, epilogue="none", out_dtype=jnp.float32,
                  tm=None, tn=None):
    """out = epilogue(a @ w + bias); a:(M,K), w:(K,N) bf16, bias2d:(1,N) f32.

    K is always a single full-dim block (fits easily in VMEM for this model);
    only M is (minimally) padded, to a multiple of 16 for bf16 sublane tiling.
    """
    M, K = a.shape
    Kw, N = w.shape
    assert K == Kw
    a = a.astype(jnp.bfloat16)
    w = w.astype(jnp.bfloat16)

    if tm is None:
        tm, Mp = _pick_tm(M)
    else:
        Mp = _round_up(M, tm)
    if tn is None:
        tn = _pick_tn(N)
    assert N % tn == 0
    if epilogue == "log_softmax":
        assert N == tn, "log-softmax fusion needs the full row in one N tile"

    if Mp != M:
        a = jnp.pad(a, ((0, Mp - M), (0, 0)))

    grid = (Mp // tm, N // tn)
    out = pl.pallas_call(
        functools.partial(_gemm_bias_kernel, epilogue=epilogue),
        out_shape=jax.ShapeDtypeStruct((Mp, N), out_dtype),
        grid=grid,
        in_specs=[
            pl.BlockSpec((tm, K), lambda i, j: (i, 0)),
            pl.BlockSpec((K, tn), lambda i, j: (0, j)),
            pl.BlockSpec((1, tn), lambda i, j: (0, j)),
        ],
        out_specs=pl.BlockSpec((tm, tn), lambda i, j: (i, j)),
        compiler_params=pltpu.CompilerParams(
            dimension_semantics=("parallel", "parallel")),
    )(a, w, bias2d)
    return out[:M] if Mp != M else out


# ---------------- 2x2 max-pool (stride 2) kernel ----------------
def _maxpool2x2_kernel(x_ref, o_ref):
    # Block is (1, H, W/2, 2C): the (w%2, c) pair was merged into the lane dim
    # by a free host-side reshape, so W-pooling is a max of the two lane halves.
    _, H, Wo, C2 = x_ref.shape
    C = C2 // 2
    x = x_ref[0]                                   # (H, Wo, 2C)
    xr = x.reshape(H // 2, 2, Wo, C2)              # split leading dim only
    r = jnp.maximum(xr[:, 0], xr[:, 1])            # pooled over H: (H/2, Wo, 2C)
    o_ref[0] = jnp.maximum(r[:, :, :C], r[:, :, C:])   # pooled over W


def pallas_maxpool2x2(x):
    B, H, W, C = x.shape
    xr = x.reshape(B, H, W // 2, 2 * C)            # row-major merge: free reshape
    return pl.pallas_call(
        _maxpool2x2_kernel,
        out_shape=jax.ShapeDtypeStruct((B, H // 2, W // 2, C), x.dtype),
        grid=(B,),
        in_specs=[pl.BlockSpec((1, H, W // 2, 2 * C), lambda b: (b, 0, 0, 0))],
        out_specs=pl.BlockSpec((1, H // 2, W // 2, C), lambda b: (b, 0, 0, 0)),
        compiler_params=pltpu.CompilerParams(dimension_semantics=("parallel",)),
    )(xr)


# ---------------- im2col glue (pure data movement, stays in JAX) ----------------
# TODO(synk): im2col could be fused into the GEMM kernel (shifted in-kernel reads)
# to avoid materializing the 25x-expanded activation in HBM; small win at batch=2.
def im2col(x, k, pad):
    """x: (B,H,W,C) -> (B*H*W, k*k*C); patch-feature order is (kh, kw, c)."""
    B, H, W, C = x.shape
    xp = jnp.pad(x, ((0, 0), (pad, pad), (pad, pad), (0, 0)))
    patches = [xp[:, i:i + H, j:j + W, :] for i in range(k) for j in range(k)]
    cols = jnp.concatenate(patches, axis=-1)       # (B, H, W, k*k*C)
    return cols.reshape(B * H * W, k * k * C)


# ---------------- LeNet parameters (deterministic synthetic init) ----------------
def init_lenet_params(key):
    ks = jax.random.split(key, 8)
    f = lambda k, shape, scale: scale * jax.random.normal(k, shape, jnp.float32)
    return {
        "w1": f(ks[0], (5, 5, 1, 32), 0.10),       # conv1 weight (kh, kw, Cin, Cout)
        "b1": f(ks[1], (32,), 0.01),
        "w2": f(ks[2], (5, 5, 32, 64), 0.05),      # conv2 weight
        "b2": f(ks[3], (64,), 0.01),
        "wfc1": f(ks[4], (64 * 7 * 7, 1024), 0.02),  # rows in PyTorch (C,H,W) order
        "bfc1": f(ks[5], (1024,), 0.01),
        "wfc2": f(ks[6], (1024, 10), 0.05),
        "bfc2": f(ks[7], (10,), 0.01),
    }


def prepare_params(params):
    """One-time reshape / permute / cast of weights into GEMM-ready layout.

    wfc1's rows are permuted from PyTorch (C,H,W) flatten order to NHWC flatten
    order so the runtime transpose of the pooled activations disappears.
    """
    wfc1 = (params["wfc1"].reshape(64, 7, 7, 1024)
            .transpose(1, 2, 0, 3).reshape(64 * 7 * 7, 1024))
    return {
        "w1": params["w1"].reshape(5 * 5 * 1, 32).astype(jnp.bfloat16),
        "b1": params["b1"].reshape(1, 32).astype(jnp.float32),
        "w2": params["w2"].reshape(5 * 5 * 32, 64).astype(jnp.bfloat16),
        "b2": params["b2"].reshape(1, 64).astype(jnp.float32),
        "wfc1": wfc1.astype(jnp.bfloat16),
        "bfc1": params["bfc1"].reshape(1, 1024).astype(jnp.float32),
        "wfc2": params["wfc2"].astype(jnp.bfloat16),
        "bfc2": params["bfc2"].reshape(1, 10).astype(jnp.float32),
    }


# ---------------- LeNet forward (eval mode: dropout is identity) ----------------
def lenet_forward(x_nchw, p):
    B = x_nchw.shape[0]
    x = jnp.transpose(x_nchw, (0, 2, 3, 1)).astype(jnp.bfloat16)  # NCHW -> NHWC

    # conv1 (1->32, 5x5, pad 2) + ReLU, then 2x2 max-pool
    cols = im2col(x, 5, 2)                                        # (B*28*28, 25)
    h = pallas_linear(cols, p["w1"], p["b1"], epilogue="relu",
                      out_dtype=jnp.bfloat16)
    h = h.reshape(B, 28, 28, 32)
    h = pallas_maxpool2x2(h)                                      # (B,14,14,32)

    # conv2 (32->64, 5x5, pad 2) + ReLU, then 2x2 max-pool
    cols = im2col(h, 5, 2)                                        # (B*14*14, 800)
    h = pallas_linear(cols, p["w2"], p["b2"], epilogue="relu",
                      out_dtype=jnp.bfloat16)
    h = h.reshape(B, 14, 14, 64)
    h = pallas_maxpool2x2(h)                                      # (B,7,7,64)

    # NHWC flatten (wfc1 rows were pre-permuted, so no runtime transpose needed)
    feat = h.reshape(B, 64 * 7 * 7)

    # fc1 + ReLU
    h = pallas_linear(feat, p["wfc1"], p["bfc1"], epilogue="relu",
                      out_dtype=jnp.bfloat16)
    # F.dropout(..., training=False) is the identity in eval mode.
    # TODO(synk): training-mode stochastic dropout not implemented (would use pltpu.prng_*).

    # fc2 with log_softmax(dim=1) fused into the GEMM epilogue
    return pallas_linear(h, p["wfc2"], p["bfc2"], epilogue="log_softmax",
                         out_dtype=jnp.float32)


if __name__ == "__main__":
    key = jax.random.PRNGKey(0)
    pkey, xkey = jax.random.split(key)
    params = prepare_params(init_lenet_params(pkey))
    # MNIST-sized input implied by fc1 = 64*7*7; small batch of 2, NCHW like PyTorch.
    x = jax.random.normal(xkey, (2, 1, 28, 28), jnp.float32)
    fwd = jax.jit(lenet_forward)
    out = jax.block_until_ready(fwd(x, params))
    assert out.shape == (2, 10), out.shape
    assert bool(jnp.all(jnp.isfinite(out)))
    print("KERNEL_OK")
</pallas_src>

<mosaic_0001>
module attributes {stable_mosaic.version = 11 : i64} {
  func.func @_gemm_bias_kernel(%arg0: i32, %arg1: i32, %arg2: memref<224x25xbf16, #tpu.memory_space<vmem>>, %arg3: memref<25x32xbf16, #tpu.memory_space<vmem>>, %arg4: memref<1x32xf32, #tpu.memory_space<vmem>>, %arg5: memref<224x32xbf16, #tpu.memory_space<vmem>>) attributes {dimension_semantics = [#tpu.dimension_semantics<parallel>, #tpu.dimension_semantics<parallel>], iteration_bounds = array<i64: 7, 1>, scalar_prefetch = 0 : i64, scratch_operands = 0 : i64, tpu.core_type = #tpu.core_type<tc>, window_params = [{transform_indices = @transform_0, window_bounds = array<i64: 224, 25>}, {transform_indices = @transform_1, window_bounds = array<i64: 25, 32>}, {transform_indices = @transform_2, window_bounds = array<i64: 1, 32>}, {transform_indices = @transform_3, window_bounds = array<i64: 224, 32>}]} {
    %c0 = arith.constant 0 : index
    %c0_0 = arith.constant 0 : index
    %0 = vector.load %arg2[%c0, %c0_0] : memref<224x25xbf16, #tpu.memory_space<vmem>>, vector<224x25xbf16>
    %c0_1 = arith.constant 0 : index
    %c0_2 = arith.constant 0 : index
    %1 = vector.load %arg3[%c0_1, %c0_2] : memref<25x32xbf16, #tpu.memory_space<vmem>>, vector<25x32xbf16>
    %cst = arith.constant dense<0.000000e+00> : vector<224x32xf32>
    %2 = tpu.matmul %0, %1, %cst {dimension_numbers = #tpu.dot_dimension_numbers<[1], [0], [0], [1], [0, 0, 1, 1], [], []>} : vector<224x25xbf16>, vector<25x32xbf16>, vector<224x32xf32> -> vector<224x32xf32>
    %c0_3 = arith.constant 0 : index
    %c0_4 = arith.constant 0 : index
    %3 = vector.load %arg4[%c0_3, %c0_4] : memref<1x32xf32, #tpu.memory_space<vmem>>, vector<1x32xf32>
    %4 = vector.broadcast %3 : vector<1x32xf32> to vector<224x32xf32>
    %5 = arith.addf %2, %4 : vector<224x32xf32>
    %cst_5 = arith.constant 0.000000e+00 : f32
    %6 = vector.broadcast %cst_5 : f32 to vector<224x32xf32>
    %7 = arith.maximumf %5, %6 : vector<224x32xf32>
    %8 = arith.truncf %7 : vector<224x32xf32> to vector<224x32xbf16>
    %c0_6 = arith.constant 0 : index
    %c0_7 = arith.constant 0 : index
    %9 = vector.load %arg5[%c0_6, %c0_7] : memref<224x32xbf16, #tpu.memory_space<vmem>>, vector<224x32xbf16>
    tpu.vector_store %arg5[%c0_6, %c0_7], %8 {strides = array<i32>} : memref<224x32xbf16, #tpu.memory_space<vmem>>, vector<224x32xbf16>,
    return
  }
  func.func @transform_0(%arg0: i32, %arg1: i32) -> (i32, i32) {
    %c0_i32 = arith.constant 0 : i32
    %c0_i32_0 = arith.constant 0 : i32
    return %arg0, %c0_i32 : i32, i32
  }
  func.func @transform_1(%arg0: i32, %arg1: i32) -> (i32, i32) {
    %c0_i32 = arith.constant 0 : i32
    %c0_i32_0 = arith.constant 0 : i32
    return %c0_i32, %arg1 : i32, i32
  }
  func.func @transform_2(%arg0: i32, %arg1: i32) -> (i32, i32) {
    %c0_i32 = arith.constant 0 : i32
    %c0_i32_0 = arith.constant 0 : i32
    return %c0_i32, %arg1 : i32, i32
  }
  func.func @transform_3(%arg0: i32, %arg1: i32) -> (i32, i32) {
    %c0_i32 = arith.constant 0 : i32
    return %arg0, %arg1 : i32, i32
  }
}

module attributes {stable_mosaic.version = 11 : i64} {
  func.func @_maxpool2x2_kernel(%arg0: i32, %arg1: memref<1x28x14x64xbf16, #tpu.memory_space<vmem>>, %arg2: memref<1x14x14x32xbf16, #tpu.memory_space<vmem>>) attributes {dimension_semantics = [#tpu.dimension_semantics<parallel>], iteration_bounds = array<i64: 2>, scalar_prefetch = 0 : i64, scratch_operands = 0 : i64, tpu.core_type = #tpu.core_type<tc>, window_params = [{transform_indices = @transform_0, window_bounds = array<i64: 1, 28, 14, 64>}, {transform_indices = @transform_1, window_bounds = array<i64: 1, 14, 14, 32>}]} {
    %c0 = arith.constant 0 : index
    %c0_0 = arith.constant 0 : index
    %c0_1 = arith.constant 0 : index
    %c0_2 = arith.constant 0 : index
    %0 = vector.load %arg1[%c0, %c0_0, %c0_1, %c0_2] : memref<1x28x14x64xbf16, #tpu.memory_space<vmem>>, vector<1x28x14x64xbf16>
    %1 = vector.shape_cast %0 : vector<1x28x14x64xbf16> to vector<28x14x64xbf16>
    %2 = vector.shape_cast %1 : vector<28x14x64xbf16> to vector<14x2x14x64xbf16>
    %3 = vector.extract_strided_slice %2 {offsets = [0, 0, 0, 0], sizes = [14, 1, 14, 64], strides = [1, 1, 1, 1]} : vector<14x2x14x64xbf16> to vector<14x1x14x64xbf16>
    %4 = vector.shape_cast %3 : vector<14x1x14x64xbf16> to vector<14x14x64xbf16>
    %5 = vector.extract_strided_slice %2 {offsets = [0, 1, 0, 0], sizes = [14, 1, 14, 64], strides = [1, 1, 1, 1]} : vector<14x2x14x64xbf16> to vector<14x1x14x64xbf16>
    %6 = vector.shape_cast %5 : vector<14x1x14x64xbf16> to vector<14x14x64xbf16>
    %7 = arith.maximumf %4, %6 : vector<14x14x64xbf16>
    %8 = vector.extract_strided_slice %7 {offsets = [0, 0, 0], sizes = [14, 14, 32], strides = [1, 1, 1]} : vector<14x14x64xbf16> to vector<14x14x32xbf16>
    %9 = vector.extract_strided_slice %7 {offsets = [0, 0, 32], sizes = [14, 14, 32], strides = [1, 1, 1]} : vector<14x14x64xbf16> to vector<14x14x32xbf16>
    %10 = arith.maximumf %8, %9 : vector<14x14x32xbf16>
    %c0_3 = arith.constant 0 : index
    %c0_4 = arith.constant 0 : index
    %c0_5 = arith.constant 0 : index
    %c0_6 = arith.constant 0 : index
    %11 = vector.load %arg2[%c0_3, %c0_4, %c0_5, %c0_6] : memref<1x14x14x32xbf16, #tpu.memory_space<vmem>>, vector<1x14x14x32xbf16>
    %12 = vector.shape_cast %11 : vector<1x14x14x32xbf16> to vector<14x14x32xbf16>
    %13 = vector.shape_cast %10 : vector<14x14x32xbf16> to vector<1x14x14x32xbf16>
    tpu.vector_store %arg2[%c0_3, %c0_4, %c0_5, %c0_6], %13 {strides = array<i32>} : memref<1x14x14x32xbf16, #tpu.memory_space<vmem>>, vector<1x14x14x32xbf16>,
    return
  }
  func.func @transform_0(%arg0: i32) -> (i32, i32, i32, i32) {
    %c0_i32 = arith.constant 0 : i32
    %c0_i32_0 = arith.constant 0 : i32
    %c0_i32_1 = arith.constant 0 : i32
    %c0_i32_2 = arith.constant 0 : i32
    return %arg0, %c0_i32, %c0_i32_0, %c0_i32_1 : i32, i32, i32, i32
  }
  func.func @transform_1(%arg0: i32) -> (i32, i32, i32, i32) {
    %c0_i32 = arith.constant 0 : i32
    %c0_i32_0 = arith.constant 0 : i32
    %c0_i32_1 = arith.constant 0 : i32
    %c0_i32_2 = arith.constant 0 : i32
    return %arg0, %c0_i32, %c0_i32_0, %c0_i32_1 : i32, i32, i32, i32
  }
}

module attributes {stable_mosaic.version = 11 : i64} {
  func.func @_gemm_bias_kernel(%arg0: i32, %arg1: i32, %arg2: memref<80x800xbf16, #tpu.memory_space<vmem>>, %arg3: memref<800x64xbf16, #tpu.memory_space<vmem>>, %arg4: memref<1x64xf32, #tpu.memory_space<vmem>>, %arg5: memref<80x64xbf16, #tpu.memory_space<vmem>>) attributes {dimension_semantics = [#tpu.dimension_semantics<parallel>, #tpu.dimension_semantics<parallel>], iteration_bounds = array<i64: 5, 1>, scalar_prefetch = 0 : i64, scratch_operands = 0 : i64, tpu.core_type = #tpu.core_type<tc>, window_params = [{transform_indices = @transform_0, window_bounds = array<i64: 80, 800>}, {transform_indices = @transform_1, window_bounds = array<i64: 800, 64>}, {transform_indices = @transform_2, window_bounds = array<i64: 1, 64>}, {transform_indices = @transform_3, window_bounds = array<i64: 80, 64>}]} {
    %c0 = arith.constant 0 : index
    %c0_0 = arith.constant 0 : index
    %0 = vector.load %arg2[%c0, %c0_0] : memref<80x800xbf16, #tpu.memory_space<vmem>>, vector<80x800xbf16>
    %c0_1 = arith.constant 0 : index
    %c0_2 = arith.constant 0 : index
    %1 = vector.load %arg3[%c0_1, %c0_2] : memref<800x64xbf16, #tpu.memory_space<vmem>>, vector<800x64xbf16>
    %cst = arith.constant dense<0.000000e+00> : vector<80x64xf32>
    %2 = tpu.matmul %0, %1, %cst {dimension_numbers = #tpu.dot_dimension_numbers<[1], [0], [0], [1], [0, 0, 1, 1], [], []>} : vector<80x800xbf16>, vector<800x64xbf16>, vector<80x64xf32> -> vector<80x64xf32>
    %c0_3 = arith.constant 0 : index
    %c0_4 = arith.constant 0 : index
    %3 = vector.load %arg4[%c0_3, %c0_4] : memref<1x64xf32, #tpu.memory_space<vmem>>, vector<1x64xf32>
    %4 = vector.broadcast %3 : vector<1x64xf32> to vector<80x64xf32>
    %5 = arith.addf %2, %4 : vector<80x64xf32>
    %cst_5 = arith.constant 0.000000e+00 : f32
    %6 = vector.broadcast %cst_5 : f32 to vector<80x64xf32>
    %7 = arith.maximumf %5, %6 : vector<80x64xf32>
    %8 = arith.truncf %7 : vector<80x64xf32> to vector<80x64xbf16>
    %c0_6 = arith.constant 0 : index
    %c0_7 = arith.constant 0 : index
    %9 = vector.load %arg5[%c0_6, %c0_7] : memref<80x64xbf16, #tpu.memory_space<vmem>>, vector<80x64xbf16>
    tpu.vector_store %arg5[%c0_6, %c0_7], %8 {strides = array<i32>} : memref<80x64xbf16, #tpu.memory_space<vmem>>, vector<80x64xbf16>,
    return
  }
  func.func @transform_0(%arg0: i32, %arg1: i32) -> (i32, i32) {
    %c0_i32 = arith.constant 0 : i32
    %c0_i32_0 = arith.constant 0 : i32
    return %arg0, %c0_i32 : i32, i32
  }
  func.func @transform_1(%arg0: i32, %arg1: i32) -> (i32, i32) {
    %c0_i32 = arith.constant 0 : i32
    %c0_i32_0 = arith.constant 0 : i32
    return %c0_i32, %arg1 : i32, i32
  }
  func.func @transform_2(%arg0: i32, %arg1: i32) -> (i32, i32) {
    %c0_i32 = arith.constant 0 : i32
    %c0_i32_0 = arith.constant 0 : i32
    return %c0_i32, %arg1 : i32, i32
  }
  func.func @transform_3(%arg0: i32, %arg1: i32) -> (i32, i32) {
    %c0_i32 = arith.constant 0 : i32
    return %arg0, %arg1 : i32, i32
  }
}

module attributes {stable_mosaic.version = 11 : i64} {
  func.func @_maxpool2x2_kernel(%arg0: i32, %arg1: memref<1x14x7x128xbf16, #tpu.memory_space<vmem>>, %arg2: memref<1x7x7x64xbf16, #tpu.memory_space<vmem>>) attributes {dimension_semantics = [#tpu.dimension_semantics<parallel>], iteration_bounds = array<i64: 2>, scalar_prefetch = 0 : i64, scratch_operands = 0 : i64, tpu.core_type = #tpu.core_type<tc>, window_params = [{transform_indices = @transform_0, window_bounds = array<i64: 1, 14, 7, 128>}, {transform_indices = @transform_1, window_bounds = array<i64: 1, 7, 7, 64>}]} {
    %c0 = arith.constant 0 : index
    %c0_0 = arith.constant 0 : index
    %c0_1 = arith.constant 0 : index
    %c0_2 = arith.constant 0 : index
    %0 = vector.load %arg1[%c0, %c0_0, %c0_1, %c0_2] : memref<1x14x7x128xbf16, #tpu.memory_space<vmem>>, vector<1x14x7x128xbf16>
    %1 = vector.shape_cast %0 : vector<1x14x7x128xbf16> to vector<14x7x128xbf16>
    %2 = vector.shape_cast %1 : vector<14x7x128xbf16> to vector<7x2x7x128xbf16>
    %3 = vector.extract_strided_slice %2 {offsets = [0, 0, 0, 0], sizes = [7, 1, 7, 128], strides = [1, 1, 1, 1]} : vector<7x2x7x128xbf16> to vector<7x1x7x128xbf16>
    %4 = vector.shape_cast %3 : vector<7x1x7x128xbf16> to vector<7x7x128xbf16>
    %5 = vector.extract_strided_slice %2 {offsets = [0, 1, 0, 0], sizes = [7, 1, 7, 128], strides = [1, 1, 1, 1]} : vector<7x2x7x128xbf16> to vector<7x1x7x128xbf16>
    %6 = vector.shape_cast %5 : vector<7x1x7x128xbf16> to vector<7x7x128xbf16>
    %7 = arith.maximumf %4, %6 : vector<7x7x128xbf16>
    %8 = vector.extract_strided_slice %7 {offsets = [0, 0, 0], sizes = [7, 7, 64], strides = [1, 1, 1]} : vector<7x7x128xbf16> to vector<7x7x64xbf16>
    %9 = vector.extract_strided_slice %7 {offsets = [0, 0, 64], sizes = [7, 7, 64], strides = [1, 1, 1]} : vector<7x7x128xbf16> to vector<7x7x64xbf16>
    %10 = arith.maximumf %8, %9 : vector<7x7x64xbf16>
    %c0_3 = arith.constant 0 : index
    %c0_4 = arith.constant 0 : index
    %c0_5 = arith.constant 0 : index
    %c0_6 = arith.constant 0 : index
    %11 = vector.load %arg2[%c0_3, %c0_4, %c0_5, %c0_6] : memref<1x7x7x64xbf16, #tpu.memory_space<vmem>>, vector<1x7x7x64xbf16>
    %12 = vector.shape_cast %11 : vector<1x7x7x64xbf16> to vector<7x7x64xbf16>
    %13 = vector.shape_cast %10 : vector<7x7x64xbf16> to vector<1x7x7x64xbf16>
    tpu.vector_store %arg2[%c0_3, %c0_4, %c0_5, %c0_6], %13 {strides = array<i32>} : memref<1x7x7x64xbf16, #tpu.memory_space<vmem>>, vector<1x7x7x64xbf16>,
    return
  }
  func.func @transform_0(%arg0: i32) -> (i32, i32, i32, i32) {
    %c0_i32 = arith.constant 0 : i32
    %c0_i32_0 = arith.constant 0 : i32
    %c0_i32_1 = arith.constant 0 : i32
    %c0_i32_2 = arith.constant 0 : i32
    return %arg0, %c0_i32, %c0_i32_0, %c0_i32_1 : i32, i32, i32, i32
  }
  func.func @transform_1(%arg0: i32) -> (i32, i32, i32, i32) {
    %c0_i32 = arith.constant 0 : i32
    %c0_i32_0 = arith.constant 0 : i32
    %c0_i32_1 = arith.constant 0 : i32
    %c0_i32_2 = arith.constant 0 : i32
    return %arg0, %c0_i32, %c0_i32_0, %c0_i32_1 : i32, i32, i32, i32
  }
}

module attributes {stable_mosaic.version = 11 : i64} {
  func.func @_gemm_bias_kernel(%arg0: i32, %arg1: i32, %arg2: memref<16x3136xbf16, #tpu.memory_space<vmem>>, %arg3: memref<3136x256xbf16, #tpu.memory_space<vmem>>, %arg4: memref<1x256xf32, #tpu.memory_space<vmem>>, %arg5: memref<16x256xbf16, #tpu.memory_space<vmem>>) attributes {dimension_semantics = [#tpu.dimension_semantics<parallel>, #tpu.dimension_semantics<parallel>], iteration_bounds = array<i64: 1, 4>, scalar_prefetch = 0 : i64, scratch_operands = 0 : i64, tpu.core_type = #tpu.core_type<tc>, window_params = [{transform_indices = @transform_0, window_bounds = array<i64: 16, 3136>}, {transform_indices = @transform_1, window_bounds = array<i64: 3136, 256>}, {transform_indices = @transform_2, window_bounds = array<i64: 1, 256>}, {transform_indices = @transform_3, window_bounds = array<i64: 16, 256>}]} {
    %c0 = arith.constant 0 : index
    %c0_0 = arith.constant 0 : index
    %0 = vector.load %arg2[%c0, %c0_0] : memref<16x3136xbf16, #tpu.memory_space<vmem>>, vector<16x3136xbf16>
    %c0_1 = arith.constant 0 : index
    %c0_2 = arith.constant 0 : index
    %1 = vector.load %arg3[%c0_1, %c0_2] : memref<3136x256xbf16, #tpu.memory_space<vmem>>, vector<3136x256xbf16>
    %cst = arith.constant dense<0.000000e+00> : vector<16x256xf32>
    %2 = tpu.matmul %0, %1, %cst {dimension_numbers = #tpu.dot_dimension_numbers<[1], [0], [0], [1], [0, 0, 1, 1], [], []>} : vector<16x3136xbf16>, vector<3136x256xbf16>, vector<16x256xf32> -> vector<16x256xf32>
    %c0_3 = arith.constant 0 : index
    %c0_4 = arith.constant 0 : index
    %3 = vector.load %arg4[%c0_3, %c0_4] : memref<1x256xf32, #tpu.memory_space<vmem>>, vector<1x256xf32>
    %4 = vector.broadcast %3 : vector<1x256xf32> to vector<16x256xf32>
    %5 = arith.addf %2, %4 : vector<16x256xf32>
    %cst_5 = arith.constant 0.000000e+00 : f32
    %6 = vector.broadcast %cst_5 : f32 to vector<16x256xf32>
    %7 = arith.maximumf %5, %6 : vector<16x256xf32>
    %8 = arith.truncf %7 : vector<16x256xf32> to vector<16x256xbf16>
    %c0_6 = arith.constant 0 : index
    %c0_7 = arith.constant 0 : index
    %9 = vector.load %arg5[%c0_6, %c0_7] : memref<16x256xbf16, #tpu.memory_space<vmem>>, vector<16x256xbf16>
    tpu.vector_store %arg5[%c0_6, %c0_7], %8 {strides = array<i32>} : memref<16x256xbf16, #tpu.memory_space<vmem>>, vector<16x256xbf16>,
    return
  }
  func.func @transform_0(%arg0: i32, %arg1: i32) -> (i32, i32) {
    %c0_i32 = arith.constant 0 : i32
    %c0_i32_0 = arith.constant 0 : i32
    return %arg0, %c0_i32 : i32, i32
  }
  func.func @transform_1(%arg0: i32, %arg1: i32) -> (i32, i32) {
    %c0_i32 = arith.constant 0 : i32
    %c0_i32_0 = arith.constant 0 : i32
    return %c0_i32, %arg1 : i32, i32
  }
  func.func @transform_2(%arg0: i32, %arg1: i32) -> (i32, i32) {
    %c0_i32 = arith.constant 0 : i32
    %c0_i32_0 = arith.constant 0 : i32
    return %c0_i32, %arg1 : i32, i32
  }
  func.func @transform_3(%arg0: i32, %arg1: i32) -> (i32, i32) {
    %c0_i32 = arith.constant 0 : i32
    return %arg0, %arg1 : i32, i32
  }
}

module attributes {stable_mosaic.version = 11 : i64} {
  func.func @_gemm_bias_kernel(%arg0: i32, %arg1: i32, %arg2: memref<16x1024xbf16, #tpu.memory_space<vmem>>, %arg3: memref<1024x10xbf16, #tpu.memory_space<vmem>>, %arg4: memref<1x10xf32, #tpu.memory_space<vmem>>, %arg5: memref<16x10xf32, #tpu.memory_space<vmem>>) attributes {dimension_semantics = [#tpu.dimension_semantics<parallel>, #tpu.dimension_semantics<parallel>], iteration_bounds = array<i64: 1, 1>, scalar_prefetch = 0 : i64, scratch_operands = 0 : i64, tpu.core_type = #tpu.core_type<tc>, window_params = [{transform_indices = @transform_0, window_bounds = array<i64: 16, 1024>}, {transform_indices = @transform_1, window_bounds = array<i64: 1024, 10>}, {transform_indices = @transform_2, window_bounds = array<i64: 1, 10>}, {transform_indices = @transform_3, window_bounds = array<i64: 16, 10>}]} {
    %c0 = arith.constant 0 : index
    %c0_0 = arith.constant 0 : index
    %0 = vector.load %arg2[%c0, %c0_0] : memref<16x1024xbf16, #tpu.memory_space<vmem>>, vector<16x1024xbf16>
    %c0_1 = arith.constant 0 : index
    %c0_2 = arith.constant 0 : index
    %1 = vector.load %arg3[%c0_1, %c0_2] : memref<1024x10xbf16, #tpu.memory_space<vmem>>, vector<1024x10xbf16>
    %cst = arith.constant dense<0.000000e+00> : vector<16x10xf32>
    %2 = tpu.matmul %0, %1, %cst {dimension_numbers = #tpu.dot_dimension_numbers<[1], [0], [0], [1], [0, 0, 1, 1], [], []>} : vector<16x1024xbf16>, vector<1024x10xbf16>, vector<16x10xf32> -> vector<16x10xf32>
    %c0_3 = arith.constant 0 : index
    %c0_4 = arith.constant 0 : index
    %3 = vector.load %arg4[%c0_3, %c0_4] : memref<1x10xf32, #tpu.memory_space<vmem>>, vector<1x10xf32>
    %4 = vector.broadcast %3 : vector<1x10xf32> to vector<16x10xf32>
    %5 = arith.addf %2, %4 : vector<16x10xf32>
    %cst_5 = arith.constant dense<0xFF800000> : vector<16xf32>
    %6 = vector.multi_reduction <maximumf>, %5, %cst_5 [1] : vector<16x10xf32> to vector<16xf32>
    %7 = vector.shape_cast %6 : vector<16xf32> to vector<16x1xf32>
    %8 = vector.broadcast %7 : vector<16x1xf32> to vector<16x10xf32>
    %9 = arith.subf %5, %8 : vector<16x10xf32>
    %10 = math.exp %9 : vector<16x10xf32>
    %cst_6 = arith.constant dense<0.000000e+00> : vector<16xf32>
    %11 = vector.multi_reduction <add>, %10, %cst_6 [1] : vector<16x10xf32> to vector<16xf32>
    %12 = vector.shape_cast %11 : vector<16xf32> to vector<16x1xf32>
    %13 = math.log %12 : vector<16x1xf32>
    %14 = vector.broadcast %13 : vector<16x1xf32> to vector<16x10xf32>
    %15 = arith.subf %9, %14 : vector<16x10xf32>
    %c0_7 = arith.constant 0 : index
    %c0_8 = arith.constant 0 : index
    %16 = vector.load %arg5[%c0_7, %c0_8] : memref<16x10xf32, #tpu.memory_space<vmem>>, vector<16x10xf32>
    tpu.vector_store %arg5[%c0_7, %c0_8], %15 {strides = array<i32>} : memref<16x10xf32, #tpu.memory_space<vmem>>, vector<16x10xf32>,
    return
  }
  func.func @transform_0(%arg0: i32, %arg1: i32) -> (i32, i32) {
    %c0_i32 = arith.constant 0 : i32
    %c0_i32_0 = arith.constant 0 : i32
    return %arg0, %c0_i32 : i32, i32
  }
  func.func @transform_1(%arg0: i32, %arg1: i32) -> (i32, i32) {
    %c0_i32 = arith.constant 0 : i32
    %c0_i32_0 = arith.constant 0 : i32
    return %c0_i32, %arg1 : i32, i32
  }
  func.func @transform_2(%arg0: i32, %arg1: i32) -> (i32, i32) {
    %c0_i32 = arith.constant 0 : i32
    %c0_i32_0 = arith.constant 0 : i32
    return %c0_i32, %arg1 : i32, i32
  }
  func.func @transform_3(%arg0: i32, %arg1: i32) -> (i32, i32) {
    %c0_i32 = arith.constant 0 : i32
    return %arg0, %arg1 : i32, i32
  }
}

</mosaic_0001>

<bundles_post_ra>
// kernel: lenet_forward.6
= control target key start
LH: loop header
LB: loop body
LE: loop exit
PB: predicated region body
PF: predicated region fallthrough
CT: control target
= control target key end

     0   :  { %8 = vsyncpa [#allocation3], 0  ;;  %s1353_s0 = inlined_call_operand.vmem [shape: bf16[1568,25], index: 0, kind: input, shape index: {}]   ;;  %s1354_s1 = inlined_call_operand.hbm [shape: bf16[25,32], index: 1, kind: input, shape index: {}]   ;;  %s1355_s2 = inlined_call_operand.hbm [shape: f32[1,32], index: 2, kind: input, shape index: {}]   ;;  %s1356_s3 = inlined_call_operand.vmem [shape: bf16[1568,32], index: 3, kind: output, shape index: {}]  }
   0x1   :  { %9 = vsyncpa [#allocation5], 0  ;;  %s1147_s12 = smov 0   ;;  %s1149_s13 = smov 0  }
   0x2   :  { %s1151_s14 = smov 0  }
   0x3 LB: > { %s822_s15 = sadd.s32 4294967295, %s1120_s14   ;;  %s27_s16 = sadd.s32 1, %s1116_s13  ;;  %s1120_s14 = sphi %s1151_s14, %s15_s14   ;;  %s1116_s13 = sphi %s1149_s13, %s1361_s13   ;;  %s1112_s12 = sphi %s1147_s12, %s1360_s12  }
   0x4   : > { %p29_p0 = scmp.ge.s32.totalorder %s27_s16, 7  ;;  %p824_p1 = scmp.ge.s32.totalorder %s1120_s14, 1 }
   0x5   : > { %p138_p2 = scmp.lt.s32.totalorder %s1120_s14, 8  ;;  %p1172_p4 = scmp.eq.s32.totalorder %s822_s15, 0 }
   0x6   : > { %s1363_s16 = smov (%p29_p0, %s27_s16), 0  ;;  %s1122_s19 = smov [#allocation2]  }
   0x7   : > { %p1168_p3 = pnand %p824_p1, %p138_p2  ;;  %s152_s20 = sshll.u32 %s1122_s19, 4  ;;  %s153_s20 = int_to_ptr.vmem [resolvable:$true] %s152_s20 }
   0x8   : > { %s1123_s22 = smov [#allocation4]   ;;  %s1049_s24 = scalar_lea.vmem %s153_s20, 256 }
   0x9   : > { %p982_p5 = pneg %p1168_p3  ;;  %s168_s23 = sshll.u32 %s1123_s22, 4  ;;  %s169_s23 = int_to_ptr.vmem [resolvable:$true] %s168_s23 }
   0xa   : > { %p1050_p8 = scmp.ne.s32.totalorder %s153_s20, %s1049_s24  ;;  %p1057_p11 = scmp.lt.s32.totalorder %s153_s20, %s153_s20 }
   0xb   : > { %p1180_p6 = pnand %p1172_p4, %p982_p5  ;;  %p1058_p12 = scmp.lt.s32.totalorder %s1049_s24, %s1049_s24 }
   0xd   : > { %p1040_p7 = pneg %p1180_p6  ;;  %p1059_p13 = por %p1058_p12, %p1057_p11 }
   0xf   : > { %p1052_p9 = pnand %p1050_p8, %p1040_p7 }
  0x11   : > { %p1053_p10 = pneg %p1052_p9 }
  0x13   : > { %p1060_p0 = pnand %p1059_p13, %p1053_p10 }
  0x15   : > { %1063 = shalt.err (!%p1060_p0)
}
  0x16   : > { %s1124_s25 = smov 64   ;;  %s1125_s26 = smov 4  }
  0x17   : > { %985 = dma.hbm_to_vmem [thread:$0]  (!%p1180_p6), %s1354_s1, 256, %s153_s20, [#allocation3], %s1124_s25, %s1124_s25, %s1125_s26  }
  0x18   : > { %s1075_s29 = scalar_lea.vmem %s169_s23, 16  ;;  %s1082_s30 = scalar_lea.vmem %s169_s23, 32 }
  0x19   : > { %p1076_p1 = scmp.ne.s32.totalorder %s169_s23, %s1075_s29  ;;  %p1083_p8 = scmp.lt.s32.totalorder %s169_s23, %s169_s23 }
  0x1a   : > { %p1084_p9 = scmp.lt.s32.totalorder %s1082_s30, %s1075_s29 }
  0x1b   : > { %p1078_p2 = pnand %p1076_p1, %p1040_p7 }
  0x1c   : > { %p1085_p10 = por %p1084_p9, %p1083_p8 }
  0x1d   : > { %p1079_p5 = pneg %p1078_p2 }
  0x1f   : > { %p1086_p11 = pnand %p1085_p10, %p1079_p5 }
  0x21   : > { %1089 = shalt.err (!%p1086_p11)
}
  0x22   : > { %988 = dma.hbm_to_vmem [thread:$0]  (!%p1180_p6), %s1355_s2, 16, %s169_s23, [#allocation5]  }
  0x23   : > { %190 = sbr.rel (%p1168_p3) target bundleno = 286 (0x11e), region = 32 }
  0x28   : > { %1103 = dma.done.wait (%p1172_p4), [#allocation3], 256  }
  0x29   : > { %1105 = vsyncadd (%p1172_p4), [#allocation3], 4294967040 }
  0x2a   : > { %1107 = dma.done.wait (%p1172_p4), [#allocation5], 16  }
  0x2b   : > { %1109 = vsyncadd (%p1172_p4), [#allocation5], 4294967280  ;;  %vm400_vm0 = vcmask 1043456   ;;  %s221_s6 = smul.u32 28, %s1112_s12  ;;  %vm401_vm1 = vcmask 1044480   ;;  %v1126_v0 = vmov 65535  }
  0x2c   : > { %v402_v1 = vsel %vm400_vm0, 4294967295, %v1126_v0  ;;  %v1022_v3 = vld [vmem:[#allocation2 + $0x8] sm:$0x1f]   ;;  %v1023_v5 = vld [vmem:[#allocation2] sm:$0xff]   ;;  %vm357_vm2 = vcmask 203776   ;;  %vm692_vm3 = vcmask 257024  }
  0x2d   : > { %p222_p7 = scmp.lt.s32.totalorder %s221_s6, 195  ;;  %v403_v2 = vsel %vm401_vm1, %v402_v1, 0  ;;  %v1251_v20 = vld [vmem:[#allocation4] ss:$0 sm:$0xff] }
  0x2e   : > { %v405_v4 = vand.u32 %v1022_v3, %v403_v2 }
  0x2f   : > { %s1365_s6 = smov (!%p222_p7, %s221_s6), 195 }
  0x30   : > { %s831_s7 = sshll.u32 %s1365_s6, 2  ;;  %938 = vmatprep.subr.bf16.mxu0 %v405_v4  ;;  %970 = vmatprep.subr.bf16.mxu1 %v405_v4 }
  0x31   : > { %s1221_s10 = scalar_lea.vmem %s1353_s0, %s831_s7  ;;  %939 = vmatpush3.bf16.msra.mxu0 %v405_v4  ;;  %972 = vmatpush3.bf16.msra.mxu1 %v405_v4  ;;  %s1262_s15 = scalar_lea.vmem %s1356_s3, %s831_s7 }
  0x32   : > { %v1024_v6 = vld [vmem:[%s1221_s10] sm:$0xff]   ;;  %940 = vmatprep.subr.bf16.mxu0 %v1023_v5  ;;  %971 = vmatprep.subr.bf16.mxu1 %v1023_v5  ;;  %v1025_v8 = vld [vmem:[%s1221_s10 + $0x8] sm:$0xff]   ;;  %v1028_v10 = vld [vmem:[%s1221_s10 + $0x10] sm:$0xff]  }
  0x33   : > { %v1026_v7 = vld [vmem:[%s1221_s10 + $0x40] sm:$0xff]   ;;  %942 = vmatprep.mubr.msk.bf16.mxu0 %vm357_vm2, %v1024_v6  ;;  %v1027_v9 = vld [vmem:[%s1221_s10 + $0x48] sm:$0xff]   ;;  %v1030_v11 = vld [vmem:[%s1221_s10 + $0x50] sm:$0xff]  }
  0x34   : > { %958 = vmatprep.mubr.msk.bf16.mxu1 %vm357_vm2, %v1026_v7  ;;  %v1029_v12 = vld [vmem:[%s1221_s10 + $0x18] sm:$0xff]   ;;  %v1032_v14 = vld [vmem:[%s1221_s10 + $0x20] sm:$0xff]   ;;  %v1033_v16 = vld [vmem:[%s1221_s10 + $0x28] sm:$0xff]  }
  0x35   : > { %941 = vmatpush3.bf16.msra.mxu0 %v1023_v5  ;;  %973 = vmatpush3.bf16.msra.mxu1 %v1023_v5  ;;  %v1031_v13 = vld [vmem:[%s1221_s10 + $0x58] sm:$0xff]   ;;  %v1034_v15 = vld [vmem:[%s1221_s10 + $0x60] sm:$0xff]   ;;  %v1035_v17 = vld [vmem:[%s1221_s10 + $0x68] sm:$0xff]  }
  0x36   : > { %v1036_v18 = vld [vmem:[%s1221_s10 + $0x30] sm:$0xff]   ;;  %v1037_v19 = vld [vmem:[%s1221_s10 + $0x38] sm:$0xff]  }
  0x38   : > { %943 = vmatmul.mubr.msk.bf16.vlgmr.msra.gmra.mxu0 %vm357_vm2, %v1025_v8  ;;  %959 = vmatmul.mubr.msk.bf16.vlgmr.msra.gmra.mxu1 %vm357_vm2, %v1027_v9 }
  0x39   : > { %946 = vmatprep.mubr.msk.bf16.mxu0 %vm357_vm2, %v1028_v10  ;;  %962 = vmatprep.mubr.msk.bf16.mxu1 %vm357_vm2, %v1030_v11 }
  0x40   : > { %947 = vmatmul.mubr.msk.bf16.gmra.mxu0 %vm357_vm2, %v1029_v12  ;;  %963 = vmatmul.mubr.msk.bf16.gmra.mxu1 %vm357_vm2, %v1031_v13 }
  0x41   : > { %950 = vmatprep.mubr.msk.bf16.mxu0 %vm357_vm2, %v1032_v14  ;;  %966 = vmatprep.mubr.msk.bf16.mxu1 %vm357_vm2, %v1034_v15 }
  0x48   : > { %951 = vmatmul.mubr.msk.bf16.gmra.mxu0 %vm357_vm2, %v1033_v16  ;;  %967 = vmatmul.mubr.msk.bf16.gmra.mxu1 %vm357_vm2, %v1035_v17 }
  0x49   : > { %954 = vmatprep.mubr.msk.bf16.mxu0 %vm357_vm2, %v1036_v18 }
  0x50   : > { %955 = vmatmul.mubr.msk.bf16.gmra.mxu0 %vm357_vm2, %v1037_v19 }
  0xf8   : > { %v944_v21 = vpop.f32.mrf.mxu0  ;;  %v960_v22 = vpop.f32.mrf.mxu1 }
  0xf9   : > { %v450_v23 = vadd.f32 %v944_v21, %v1251_v20  ;;  %v514_v24 = vadd.f32 %v960_v22, %v1251_v20 }
  0xfa   : > { %v441_v25 = vpop.f32.mrf.mxu0  ;;  %v505_v26 = vpop.f32.mrf.mxu1 }
  0xfb   : > { %v554_v27 = vmax.f32 %v450_v23, 0.0  ;;  %v442_v28 = vadd.f32 %v1251_v20, %v441_v25  ;;  %v570_v29 = vmax.f32 %v514_v24, 0.0  ;;  %v506_v30 = vadd.f32 %v1251_v20, %v505_v26 }
  0xfc   : > { %v945_v31 = vpop.f32.mrf.mxu0  ;;  %v961_v32 = vpop.f32.mrf.mxu1 }
  0xfd   : > { %v896_v33 = vpack.c.bf16 %v554_v27, %v554_v27  ;;  %v552_v34 = vmax.f32 %v442_v28, 0.0  ;;  %v912_v35 = vpack.c.bf16 %v570_v29, %v570_v29  ;;  %v453_v36 = vadd.f32 %v945_v31, %v1251_v20 }
  0xfe   : > { %v568_v37 = vmax.f32 %v506_v30, 0.0  ;;  %v444_v38 = vpop.f32.mrf.mxu0  ;;  %v517_v39 = vadd.f32 %v961_v32, %v1251_v20  ;;  %v508_v40 = vpop.f32.mrf.mxu1 }
  0xff   : > { %695 = vst.msk [vmem:[%s1262_s15 + $0x8] sm:$0xf] %vm692_vm3, %v896_v33  ;;  %v894_v41 = vpack.c.bf16 %v552_v34, %v552_v34  ;;  %711 = vst.msk [vmem:[%s1262_s15 + $0x48] sm:$0xf] %vm692_vm3, %v912_v35  ;;  %v555_v42 = vmax.f32 %v453_v36, 0.0  ;;  %v445_v43 = vadd.f32 %v1251_v20, %v444_v38  ;;  %v509_v44 = vadd.f32 %v1251_v20, %v508_v40 }
 0x100   : > { %v910_v45 = vpack.c.bf16 %v568_v37, %v568_v37  ;;  %v571_v46 = vmax.f32 %v517_v39, 0.0  ;;  %v948_v47 = vpop.f32.mrf.mxu0  ;;  %v964_v48 = vpop.f32.mrf.mxu1 }
 0x101   : > { %693 = vst.msk [vmem:[%s1262_s15] sm:$0xf] %vm692_vm3, %v894_v41  ;;  %v897_v49 = vpack.c.bf16 %v555_v42, %v555_v42  ;;  %v553_v50 = vmax.f32 %v445_v43, 0.0  ;;  %v466_v51 = vadd.f32 %v948_v47, %v1251_v20  ;;  %v569_v52 = vmax.f32 %v509_v44, 0.0 }
 0x102   : > { %709 = vst.msk [vmem:[%s1262_s15 + $0x40] sm:$0xf] %vm692_vm3, %v910_v45  ;;  %v913_v53 = vpack.c.bf16 %v571_v46, %v571_v46  ;;  %v457_v54 = vpop.f32.mrf.mxu0  ;;  %v530_v55 = vadd.f32 %v964_v48, %v1251_v20  ;;  %v521_v56 = vpop.f32.mrf.mxu1 }
 0x103   : > { %696 = vst.msk [vmem:[%s1262_s15 + $0xc] sm:$0xf] %vm692_vm3, %v897_v49  ;;  %v895_v57 = vpack.c.bf16 %v553_v50, %v553_v50  ;;  %v558_v58 = vmax.f32 %v466_v51, 0.0  ;;  %v911_v59 = vpack.c.bf16 %v569_v52, %v569_v52  ;;  %v458_v60 = vadd.f32 %v1251_v20, %v457_v54 }
 0x104   : > { %712 = vst.msk [vmem:[%s1262_s15 + $0x4c] sm:$0xf] %vm692_vm3, %v913_v53  ;;  %v574_v61 = vmax.f32 %v530_v55, 0.0  ;;  %v949_v62 = vpop.f32.mrf.mxu0  ;;  %v522_v63 = vadd.f32 %v1251_v20, %v521_v56  ;;  %v965_v0 = vpop.f32.mrf.mxu1 }
 0x105   : > { %694 = vst.msk [vmem:[%s1262_s15 + $0x4] sm:$0xf] %vm692_vm3, %v895_v57  ;;  %v900_v1 = vpack.c.bf16 %v558_v58, %v558_v58  ;;  %710 = vst.msk [vmem:[%s1262_s15 + $0x44] sm:$0xf] %vm692_vm3, %v911_v59  ;;  %v556_v2 = vmax.f32 %v458_v60, 0.0  ;;  %v469_v3 = vadd.f32 %v949_v62, %v1251_v20  ;;  %v533_v4 = vadd.f32 %v965_v0, %v1251_v20 }
 0x106   : > { %v916_v5 = vpack.c.bf16 %v574_v61, %v574_v61  ;;  %v572_v6 = vmax.f32 %v522_v63, 0.0  ;;  %v460_v7 = vpop.f32.mrf.mxu0  ;;  %v524_v8 = vpop.f32.mrf.mxu1 }
 0x107   : > { %699 = vst.msk [vmem:[%s1262_s15 + $0x18] sm:$0xf] %vm692_vm3, %v900_v1  ;;  %v898_v9 = vpack.c.bf16 %v556_v2, %v556_v2  ;;  %v559_v10 = vmax.f32 %v469_v3, 0.0  ;;  %v461_v11 = vadd.f32 %v1251_v20, %v460_v7  ;;  %v575_v12 = vmax.f32 %v533_v4, 0.0 }
 0x108   : > { %715 = vst.msk [vmem:[%s1262_s15 + $0x58] sm:$0xf] %vm692_vm3, %v916_v5  ;;  %v914_v13 = vpack.c.bf16 %v572_v6, %v572_v6  ;;  %v952_v14 = vpop.f32.mrf.mxu0  ;;  %v525_v15 = vadd.f32 %v1251_v20, %v524_v8  ;;  %v968_v16 = vpop.f32.mrf.mxu1 }
 0x109   : > { %697 = vst.msk [vmem:[%s1262_s15 + $0x10] sm:$0xf] %vm692_vm3, %v898_v9  ;;  %v901_v17 = vpack.c.bf16 %v559_v10, %v559_v10  ;;  %v557_v18 = vmax.f32 %v461_v11, 0.0  ;;  %v917_v19 = vpack.c.bf16 %v575_v12, %v575_v12  ;;  %v482_v21 = vadd.f32 %v952_v14, %v1251_v20 }
 0x10a   : > { %713 = vst.msk [vmem:[%s1262_s15 + $0x50] sm:$0xf] %vm692_vm3, %v914_v13  ;;  %v573_v22 = vmax.f32 %v525_v15, 0.0  ;;  %v473_v23 = vpop.f32.mrf.mxu0  ;;  %v546_v24 = vadd.f32 %v968_v16, %v1251_v20  ;;  %v537_v25 = vpop.f32.mrf.mxu1 }
 0x10b   : > { %700 = vst.msk [vmem:[%s1262_s15 + $0x1c] sm:$0xf] %vm692_vm3, %v901_v17  ;;  %v899_v26 = vpack.c.bf16 %v557_v18, %v557_v18  ;;  %716 = vst.msk [vmem:[%s1262_s15 + $0x5c] sm:$0xf] %vm692_vm3, %v917_v19  ;;  %v562_v27 = vmax.f32 %v482_v21, 0.0  ;;  %v474_v28 = vadd.f32 %v1251_v20, %v473_v23  ;;  %v538_v29 = vadd.f32 %v1251_v20, %v537_v25 }
 0x10c   : > { %v915_v30 = vpack.c.bf16 %v573_v22, %v573_v22  ;;  %v578_v31 = vmax.f32 %v546_v24, 0.0  ;;  %v953_v32 = vpop.f32.mrf.mxu0  ;;  %v969_v33 = vpop.f32.mrf.mxu1 }
 0x10d   : > { %698 = vst.msk [vmem:[%s1262_s15 + $0x14] sm:$0xf] %vm692_vm3, %v899_v26  ;;  %v904_v34 = vpack.c.bf16 %v562_v27, %v562_v27  ;;  %v560_v35 = vmax.f32 %v474_v28, 0.0  ;;  %v485_v36 = vadd.f32 %v953_v32, %v1251_v20  ;;  %v576_v37 = vmax.f32 %v538_v29, 0.0 }
 0x10e   : > { %714 = vst.msk [vmem:[%s1262_s15 + $0x54] sm:$0xf] %vm692_vm3, %v915_v30  ;;  %v920_v38 = vpack.c.bf16 %v578_v31, %v578_v31  ;;  %v476_v39 = vpop.f32.mrf.mxu0  ;;  %v549_v40 = vadd.f32 %v969_v33, %v1251_v20  ;;  %v540_v41 = vpop.f32.mrf.mxu1 }
 0x10f   : > { %703 = vst.msk [vmem:[%s1262_s15 + $0x28] sm:$0xf] %vm692_vm3, %v904_v34  ;;  %v902_v42 = vpack.c.bf16 %v560_v35, %v560_v35  ;;  %v563_v43 = vmax.f32 %v485_v36, 0.0  ;;  %v918_v44 = vpack.c.bf16 %v576_v37, %v576_v37  ;;  %v477_v45 = vadd.f32 %v1251_v20, %v476_v39 }
 0x110   : > { %719 = vst.msk [vmem:[%s1262_s15 + $0x68] sm:$0xf] %vm692_vm3, %v920_v38  ;;  %v579_v46 = vmax.f32 %v549_v40, 0.0  ;;  %v956_v47 = vpop.f32.mrf.mxu0  ;;  %v541_v48 = vadd.f32 %v1251_v20, %v540_v41 }
 0x111   : > { %701 = vst.msk [vmem:[%s1262_s15 + $0x20] sm:$0xf] %vm692_vm3, %v902_v42  ;;  %v905_v49 = vpack.c.bf16 %v563_v43, %v563_v43  ;;  %717 = vst.msk [vmem:[%s1262_s15 + $0x60] sm:$0xf] %vm692_vm3, %v918_v44  ;;  %v561_v50 = vmax.f32 %v477_v45, 0.0  ;;  %v498_v51 = vadd.f32 %v956_v47, %v1251_v20 }
 0x112   : > { %v921_v52 = vpack.c.bf16 %v579_v46, %v579_v46  ;;  %v577_v53 = vmax.f32 %v541_v48, 0.0  ;;  %v489_v54 = vpop.f32.mrf.mxu0 }
 0x113   : > { %704 = vst.msk [vmem:[%s1262_s15 + $0x2c] sm:$0xf] %vm692_vm3, %v905_v49  ;;  %v903_v55 = vpack.c.bf16 %v561_v50, %v561_v50  ;;  %v566_v56 = vmax.f32 %v498_v51, 0.0  ;;  %v490_v57 = vadd.f32 %v1251_v20, %v489_v54 }
 0x114   : > { %720 = vst.msk [vmem:[%s1262_s15 + $0x6c] sm:$0xf] %vm692_vm3, %v921_v52  ;;  %v919_v58 = vpack.c.bf16 %v577_v53, %v577_v53  ;;  %v957_v59 = vpop.f32.mrf.mxu0 }
 0x115   : > { %702 = vst.msk [vmem:[%s1262_s15 + $0x24] sm:$0xf] %vm692_vm3, %v903_v55  ;;  %v908_v60 = vpack.c.bf16 %v566_v56, %v566_v56  ;;  %v564_v61 = vmax.f32 %v490_v57, 0.0  ;;  %v501_v62 = vadd.f32 %v957_v59, %v1251_v20 }
 0x116   : > { %718 = vst.msk [vmem:[%s1262_s15 + $0x64] sm:$0xf] %vm692_vm3, %v919_v58  ;;  %v492_v63 = vpop.f32.mrf.mxu0 }
 0x117   : > { %707 = vst.msk [vmem:[%s1262_s15 + $0x38] sm:$0xf] %vm692_vm3, %v908_v60  ;;  %v906_v0 = vpack.c.bf16 %v564_v61, %v564_v61  ;;  %v567_v1 = vmax.f32 %v501_v62, 0.0  ;;  %v493_v2 = vadd.f32 %v1251_v20, %v492_v63 }
 0x119   : > { %705 = vst.msk [vmem:[%s1262_s15 + $0x30] sm:$0xf] %vm692_vm3, %v906_v0  ;;  %v909_v3 = vpack.c.bf16 %v567_v1, %v567_v1  ;;  %v565_v4 = vmax.f32 %v493_v2, 0.0 }
 0x11b   : > { %708 = vst.msk [vmem:[%s1262_s15 + $0x3c] sm:$0xf] %vm692_vm3, %v909_v3  ;;  %v907_v5 = vpack.c.bf16 %v565_v4, %v565_v4 }
 0x11d   : > { %706 = vst.msk [vmem:[%s1262_s15 + $0x34] sm:$0xf] %vm692_vm3, %v907_v5 }
 0x11e PF: > { %s15_s14 = sadd.s32 1, %s1120_s14   ;;  %s1360_s12 = smov %s1116_s13 }
 0x11f   : > { %p12_p3 = scmp.ge.s32.totalorder %s15_s14, 9   ;;  %s1361_s13 = smov %s1363_s16 }
 0x121   :  { %14 = sbr.rel (!%p12_p3) target bundleno = 3 (0x3), region = 73 }
 0x126   :  { %749 = vsyncpa [#allocation3], 1 }
 0x127   :  { %751 = vsyncpa [#allocation3 + $0x1], 1 }
 0x128   :  { %752 = vsyncpa [#allocation5], 1 }

// kernel: lenet_forward.7
= control target key start
LH: loop header
LB: loop body
LE: loop exit
PB: predicated region body
PF: predicated region fallthrough
CT: control target
= control target key end

     0   :  { %s465_s6 = smov 0   ;;  %s742_s0 = inlined_call_operand.vmem [shape: bf16[2,28,14,64], index: 0, kind: input, shape index: {}]   ;;  %s743_s1 = inlined_call_operand.vmem [shape: bf16[2,14,14,32], index: 1, kind: output, shape index: {}]  }
   0x1 LB: > { %s426_s7 = sadd.s32 4294967295, %s452_s6   ;;  %p430_p0 = scmp.ge.s32.totalorder %s452_s6, 1  ;;  %s452_s6 = sphi %s465_s6, %s11_s6  }
   0x2   : > { %p87_p1 = scmp.lt.s32.totalorder %s452_s6, 3 }
   0x4   : > { %p88_p2 = pnand %p430_p0, %p87_p1 }
   0x5   : > { %p107_p3 = scmp.lt.s32.totalorder (!%p88_p2), %s426_s7, 1  ;;  %s454_s12 = smov (!%p88_p2), 96  }
   0x6   : > { %91 = sbr.rel (%p88_p2) target bundleno = 189 (0xbd), region = 24 }
   0xb   : > { %s745_s7 = smov (!%p107_p3, %s426_s7), 1  ;;  %vm341_vm0 = vcmask 257024   ;;  %vm343_vm1 = vcmask 256000  }
   0xc   : > { %s435_s8 = smul.u32 224, %s745_s7 }
   0xd   : > { %s436_s13 = smul.u32 112, %s745_s7 }
   0xe   : > { %s479_s11 = scalar_lea.vmem %s742_s0, %s435_s8 }
   0xf   : > { %v121_v0 = vld [vmem:[%s479_s11 + $0x10] sm:$0xf]  ;;  %v123_v1 = vld [vmem:[%s479_s11 + $0x18] sm:$0xf]  ;;  %v117_v2 = vld [vmem:[%s479_s11] sm:$0xf]  ;;  %s653_s16 = scalar_lea.vmem %s743_s1, %s436_s13 }
  0x10   : > { %v484_v3 = vmax.bf16 %v123_v1, %v121_v0  ;;  %v119_v4 = vld [vmem:[%s479_s11 + $0x8] sm:$0xf]  ;;  %v122_v5 = vld [vmem:[%s479_s11 + $0x14] sm:$0x7]  ;;  %v124_v6 = vld [vmem:[%s479_s11 + $0x1c] sm:$0x7] }
  0x11   : > { %v489_v7 = vmax.bf16 %v119_v4, %v117_v2  ;;  %v118_v8 = vld [vmem:[%s479_s11 + $0x4] sm:$0x7]  ;;  %v120_v9 = vld [vmem:[%s479_s11 + $0xc] sm:$0x7]  ;;  %v495_v10 = vmax.bf16 %v124_v6, %v122_v5  ;;  %v125_v14 = vld [vmem:[%s479_s11 + $0x20] sm:$0xf] }
  0x12   : > { %233 = vrot.lane.b32.xlu1 %v484_v3, %s454_s12  ;;  %v499_v11 = vmax.bf16 %v120_v9, %v118_v8  ;;  %v126_v12 = vld [vmem:[%s479_s11 + $0x24] sm:$0x7]  ;;  %v128_v13 = vld [vmem:[%s479_s11 + $0x2c] sm:$0x7]  ;;  %v127_v15 = vld [vmem:[%s479_s11 + $0x28] sm:$0xf] }
  0x13   : > { %229 = vrot.lane.b32.xlu0 %v489_v7, %s454_s12  ;;  %v507_v16 = vmax.bf16 %v128_v13, %v126_v12  ;;  %v511_v17 = vmax.bf16 %v127_v15, %v125_v14  ;;  %v130_v18 = vld [vmem:[%s479_s11 + $0x34] sm:$0x7]  ;;  %v132_v19 = vld [vmem:[%s479_s11 + $0x3c] sm:$0x7]  ;;  %v129_v20 = vld [vmem:[%s479_s11 + $0x30] sm:$0xf] }
  0x14   : > { %v131_v21 = vld [vmem:[%s479_s11 + $0x38] sm:$0xf]  ;;  %v519_v22 = vmax.bf16 %v132_v19, %v130_v18  ;;  %v134_v24 = vld [vmem:[%s479_s11 + $0x44] sm:$0x7]  ;;  %v136_v25 = vld [vmem:[%s479_s11 + $0x4c] sm:$0x7] }
  0x15   : > { %v523_v23 = vmax.bf16 %v131_v21, %v129_v20  ;;  %v133_v26 = vld [vmem:[%s479_s11 + $0x40] sm:$0xf]  ;;  %v135_v27 = vld [vmem:[%s479_s11 + $0x48] sm:$0xf]  ;;  %v531_v28 = vmax.bf16 %v136_v25, %v134_v24  ;;  %v138_v30 = vld [vmem:[%s479_s11 + $0x54] sm:$0x7] }
  0x16   : > { %235 = vrot.lane.b32.xlu1 %v495_v10, %s454_s12  ;;  %v535_v29 = vmax.bf16 %v135_v27, %v133_v26  ;;  %v140_v31 = vld [vmem:[%s479_s11 + $0x5c] sm:$0x7]  ;;  %v137_v32 = vld [vmem:[%s479_s11 + $0x50] sm:$0xf]  ;;  %v139_v33 = vld [vmem:[%s479_s11 + $0x58] sm:$0xf] }
  0x17   : > { %231 = vrot.lane.b32.xlu0 %v499_v11, %s454_s12  ;;  %v543_v34 = vmax.bf16 %v140_v31, %v138_v30  ;;  %v547_v35 = vmax.bf16 %v139_v33, %v137_v32  ;;  %v142_v36 = vld [vmem:[%s479_s11 + $0x64] sm:$0x7]  ;;  %v144_v37 = vld [vmem:[%s479_s11 + $0x6c] sm:$0x7]  ;;  %v141_v38 = vld [vmem:[%s479_s11 + $0x60] sm:$0xf] }
  0x18   : > { %v143_v39 = vld [vmem:[%s479_s11 + $0x68] sm:$0xf]  ;;  %v555_v40 = vmax.bf16 %v144_v37, %v142_v36  ;;  %v146_v42 = vld [vmem:[%s479_s11 + $0x74] sm:$0x7]  ;;  %v148_v43 = vld [vmem:[%s479_s11 + $0x7c] sm:$0x7] }
  0x19   : > { %v559_v41 = vmax.bf16 %v143_v39, %v141_v38  ;;  %v145_v44 = vld [vmem:[%s479_s11 + $0x70] sm:$0xf]  ;;  %v147_v45 = vld [vmem:[%s479_s11 + $0x78] sm:$0xf]  ;;  %v567_v46 = vmax.bf16 %v148_v43, %v146_v42  ;;  %v150_v48 = vld [vmem:[%s479_s11 + $0x84] sm:$0x7] }
  0x1a   : > { %239 = vrot.lane.b32.xlu1 %v507_v16, %s454_s12  ;;  %v571_v47 = vmax.bf16 %v147_v45, %v145_v44  ;;  %v152_v49 = vld [vmem:[%s479_s11 + $0x8c] sm:$0x7]  ;;  %v149_v50 = vld [vmem:[%s479_s11 + $0x80] sm:$0xf]  ;;  %v151_v51 = vld [vmem:[%s479_s11 + $0x88] sm:$0xf] }
  0x1b   : > { %237 = vrot.lane.b32.xlu0 %v511_v17, %s454_s12  ;;  %v579_v52 = vmax.bf16 %v152_v49, %v150_v48  ;;  %v583_v53 = vmax.bf16 %v151_v51, %v149_v50  ;;  %v154_v54 = vld [vmem:[%s479_s11 + $0x94] sm:$0x7]  ;;  %v156_v55 = vld [vmem:[%s479_s11 + $0x9c] sm:$0x7]  ;;  %v153_v56 = vld [vmem:[%s479_s11 + $0x90] sm:$0xf] }
  0x1c   : > { %v155_v57 = vld [vmem:[%s479_s11 + $0x98] sm:$0xf]  ;;  %v591_v58 = vmax.bf16 %v156_v55, %v154_v54  ;;  %v158_v60 = vld [vmem:[%s479_s11 + $0xa4] sm:$0x7]  ;;  %v160_v61 = vld [vmem:[%s479_s11 + $0xac] sm:$0x7] }
  0x1d   : > { %v595_v59 = vmax.bf16 %v155_v57, %v153_v56  ;;  %v157_v62 = vld [vmem:[%s479_s11 + $0xa0] sm:$0xf]  ;;  %v159_v63 = vld [vmem:[%s479_s11 + $0xa8] sm:$0xf]  ;;  %v603_v0 = vmax.bf16 %v160_v61, %v158_v60  ;;  %v162_v2 = vld [vmem:[%s479_s11 + $0xb4] sm:$0x7] }
  0x1e   : > { %243 = vrot.lane.b32.xlu1 %v519_v22, %s454_s12  ;;  %v607_v1 = vmax.bf16 %v159_v63, %v157_v62  ;;  %v164_v4 = vld [vmem:[%s479_s11 + $0xbc] sm:$0x7]  ;;  %v161_v5 = vld [vmem:[%s479_s11 + $0xb0] sm:$0xf]  ;;  %v163_v6 = vld [vmem:[%s479_s11 + $0xb8] sm:$0xf] }
  0x1f   : > { %241 = vrot.lane.b32.xlu0 %v523_v23, %s454_s12  ;;  %v615_v8 = vmax.bf16 %v164_v4, %v162_v2  ;;  %v619_v9 = vmax.bf16 %v163_v6, %v161_v5  ;;  %v166_v12 = vld [vmem:[%s479_s11 + $0xc4] sm:$0x7]  ;;  %v168_v13 = vld [vmem:[%s479_s11 + $0xcc] sm:$0x7]  ;;  %v165_v14 = vld [vmem:[%s479_s11 + $0xc0] sm:$0xf] }
  0x20   : > { %v167_v15 = vld [vmem:[%s479_s11 + $0xc8] sm:$0xf]  ;;  %v627_v18 = vmax.bf16 %v168_v13, %v166_v12  ;;  %v170_v20 = vld [vmem:[%s479_s11 + $0xd4] sm:$0x7]  ;;  %v172_v21 = vld [vmem:[%s479_s11 + $0xdc] sm:$0x7] }
  0x21   : > { %v631_v19 = vmax.bf16 %v167_v15, %v165_v14  ;;  %v169_v24 = vld [vmem:[%s479_s11 + $0xd0] sm:$0xf]  ;;  %v171_v25 = vld [vmem:[%s479_s11 + $0xd8] sm:$0xf]  ;;  %v639_v26 = vmax.bf16 %v172_v21, %v170_v20 }
  0x22   : > { %247 = vrot.lane.b32.xlu1 %v531_v28, %s454_s12  ;;  %v643_v27 = vmax.bf16 %v171_v25, %v169_v24 }
  0x23   : > { %245 = vrot.lane.b32.xlu0 %v535_v29, %s454_s12 }
  0x26   : > { %251 = vrot.lane.b32.xlu1 %v543_v34, %s454_s12 }
  0x27   : > { %249 = vrot.lane.b32.xlu0 %v547_v35, %s454_s12 }
  0x2a   : > { %255 = vrot.lane.b32.xlu1 %v555_v40, %s454_s12 }
  0x2b   : > { %253 = vrot.lane.b32.xlu0 %v559_v41, %s454_s12 }
  0x2e   : > { %259 = vrot.lane.b32.xlu1 %v567_v46, %s454_s12 }
  0x2f   : > { %257 = vrot.lane.b32.xlu0 %v571_v47, %s454_s12 }
  0x32   : > { %263 = vrot.lane.b32.xlu1 %v579_v52, %s454_s12 }
  0x33   : > { %261 = vrot.lane.b32.xlu0 %v583_v53, %s454_s12 }
  0x36   : > { %267 = vrot.lane.b32.xlu1 %v591_v58, %s454_s12 }
  0x37   : > { %265 = vrot.lane.b32.xlu0 %v595_v59, %s454_s12 }
  0x3a   : > { %271 = vrot.lane.b32.xlu1 %v603_v0, %s454_s12 }
  0x3b   : > { %269 = vrot.lane.b32.xlu0 %v607_v1, %s454_s12 }
  0x3e   : > { %275 = vrot.lane.b32.xlu1 %v615_v8, %s454_s12 }
  0x3f   : > { %273 = vrot.lane.b32.xlu0 %v619_v9, %s454_s12 }
  0x42   : > { %279 = vrot.lane.b32.xlu1 %v627_v18, %s454_s12 }
  0x43   : > { %277 = vrot.lane.b32.xlu0 %v631_v19, %s454_s12 }
  0x46   : > { %283 = vrot.lane.b32.xlu1 %v639_v26, %s454_s12 }
  0x47   : > { %281 = vrot.lane.b32.xlu0 %v643_v27, %s454_s12 }
  0x84   : > { %v234_v30 = vpop.permute.xlu1 %233 }
  0x85   : > { %v315_v31 = vmax.bf16 %v234_v30, %v484_v3  ;;  %v230_v32 = vpop.permute.xlu0 %229 }
  0x86   : > { %v313_v33 = vmax.bf16 %v230_v32, %v489_v7 }
  0x87   : > { %345 = vst.msk [vmem:[%s653_s16 + $0x8] sm:$0xf] %vm341_vm0, %v315_v31 }
  0x88   : > { %342 = vst.msk [vmem:[%s653_s16] sm:$0xf] %vm341_vm0, %v313_v33  ;;  %v236_v36 = vpop.permute.xlu1 %235 }
  0x89   : > { %v316_v37 = vmax.bf16 %v236_v36, %v495_v10  ;;  %v232_v38 = vpop.permute.xlu0 %231 }
  0x8a   : > { %v314_v39 = vmax.bf16 %v232_v38, %v499_v11 }
  0x8b   : > { %346 = vst.msk [vmem:[%s653_s16 + $0xc] sm:$0x7] %vm343_vm1, %v316_v37 }
  0x8c   : > { %344 = vst.msk [vmem:[%s653_s16 + $0x4] sm:$0x7] %vm343_vm1, %v314_v39  ;;  %v240_v3 = vpop.permute.xlu1 %239 }
  0x8d   : > { %v318_v7 = vmax.bf16 %v240_v3, %v507_v16  ;;  %v238_v42 = vpop.permute.xlu0 %237 }
  0x8e   : > { %v317_v43 = vmax.bf16 %v238_v42, %v511_v17 }
  0x8f   : > { %348 = vst.msk [vmem:[%s653_s16 + $0x14] sm:$0x7] %vm343_vm1, %v318_v7 }
  0x90   : > { %347 = vst.msk [vmem:[%s653_s16 + $0x10] sm:$0xf] %vm341_vm0, %v317_v43  ;;  %v244_v10 = vpop.permute.xlu1 %243 }
  0x91   : > { %v320_v11 = vmax.bf16 %v244_v10, %v519_v22  ;;  %v242_v44 = vpop.permute.xlu0 %241 }
  0x92   : > { %v319_v45 = vmax.bf16 %v242_v44, %v523_v23 }
  0x93   : > { %350 = vst.msk [vmem:[%s653_s16 + $0x1c] sm:$0x7] %vm343_vm1, %v320_v11 }
  0x94   : > { %349 = vst.msk [vmem:[%s653_s16 + $0x18] sm:$0xf] %vm341_vm0, %v319_v45  ;;  %v248_v16 = vpop.permute.xlu1 %247 }
  0x95   : > { %v322_v17 = vmax.bf16 %v248_v16, %v531_v28  ;;  %v246_v48 = vpop.permute.xlu0 %245 }
  0x96   : > { %v321_v49 = vmax.bf16 %v246_v48, %v535_v29 }
  0x97   : > { %352 = vst.msk [vmem:[%s653_s16 + $0x24] sm:$0x7] %vm343_vm1, %v322_v17 }
  0x98   : > { %351 = vst.msk [vmem:[%s653_s16 + $0x20] sm:$0xf] %vm341_vm0, %v321_v49  ;;  %v252_v22 = vpop.permute.xlu1 %251 }
  0x99   : > { %v324_v23 = vmax.bf16 %v252_v22, %v543_v34  ;;  %v250_v50 = vpop.permute.xlu0 %249 }
  0x9a   : > { %v323_v51 = vmax.bf16 %v250_v50, %v547_v35 }
  0x9b   : > { %354 = vst.msk [vmem:[%s653_s16 + $0x2c] sm:$0x7] %vm343_vm1, %v324_v23 }
  0x9c   : > { %353 = vst.msk [vmem:[%s653_s16 + $0x28] sm:$0xf] %vm341_vm0, %v323_v51  ;;  %v256_v28 = vpop.permute.xlu1 %255 }
  0x9d   : > { %v326_v29 = vmax.bf16 %v256_v28, %v555_v40  ;;  %v254_v54 = vpop.permute.xlu0 %253 }
  0x9e   : > { %v325_v55 = vmax.bf16 %v254_v54, %v559_v41 }
  0x9f   : > { %356 = vst.msk [vmem:[%s653_s16 + $0x34] sm:$0x7] %vm343_vm1, %v326_v29 }
  0xa0   : > { %355 = vst.msk [vmem:[%s653_s16 + $0x30] sm:$0xf] %vm341_vm0, %v325_v55  ;;  %v260_v34 = vpop.permute.xlu1 %259 }
  0xa1   : > { %v328_v35 = vmax.bf16 %v260_v34, %v567_v46  ;;  %v258_v56 = vpop.permute.xlu0 %257 }
  0xa2   : > { %v327_v57 = vmax.bf16 %v258_v56, %v571_v47 }
  0xa3   : > { %358 = vst.msk [vmem:[%s653_s16 + $0x3c] sm:$0x7] %vm343_vm1, %v328_v35 }
  0xa4   : > { %357 = vst.msk [vmem:[%s653_s16 + $0x38] sm:$0xf] %vm341_vm0, %v327_v57  ;;  %v264_v40 = vpop.permute.xlu1 %263 }
  0xa5   : > { %v330_v41 = vmax.bf16 %v264_v40, %v579_v52  ;;  %v262_v60 = vpop.permute.xlu0 %261 }
  0xa6   : > { %v329_v61 = vmax.bf16 %v262_v60, %v583_v53 }
  0xa7   : > { %360 = vst.msk [vmem:[%s653_s16 + $0x44] sm:$0x7] %vm343_vm1, %v330_v41 }
  0xa8   : > { %359 = vst.msk [vmem:[%s653_s16 + $0x40] sm:$0xf] %vm341_vm0, %v329_v61  ;;  %v268_v46 = vpop.permute.xlu1 %267 }
  0xa9   : > { %v332_v47 = vmax.bf16 %v268_v46, %v591_v58  ;;  %v266_v62 = vpop.permute.xlu0 %265 }
  0xaa   : > { %v331_v63 = vmax.bf16 %v266_v62, %v595_v59 }
  0xab   : > { %362 = vst.msk [vmem:[%s653_s16 + $0x4c] sm:$0x7] %vm343_vm1, %v332_v47 }
  0xac   : > { %361 = vst.msk [vmem:[%s653_s16 + $0x48] sm:$0xf] %vm341_vm0, %v331_v63  ;;  %v272_v52 = vpop.permute.xlu1 %271 }
  0xad   : > { %v334_v53 = vmax.bf16 %v272_v52, %v603_v0  ;;  %v270_v2 = vpop.permute.xlu0 %269 }
  0xae   : > { %v333_v4 = vmax.bf16 %v270_v2, %v607_v1 }
  0xaf   : > { %364 = vst.msk [vmem:[%s653_s16 + $0x54] sm:$0x7] %vm343_vm1, %v334_v53 }
  0xb0   : > { %363 = vst.msk [vmem:[%s653_s16 + $0x50] sm:$0xf] %vm341_vm0, %v333_v4  ;;  %v276_v58 = vpop.permute.xlu1 %275 }
  0xb1   : > { %v336_v59 = vmax.bf16 %v276_v58, %v615_v8  ;;  %v274_v5 = vpop.permute.xlu0 %273 }
  0xb2   : > { %v335_v6 = vmax.bf16 %v274_v5, %v619_v9 }
  0xb3   : > { %366 = vst.msk [vmem:[%s653_s16 + $0x5c] sm:$0x7] %vm343_vm1, %v336_v59 }
  0xb4   : > { %365 = vst.msk [vmem:[%s653_s16 + $0x58] sm:$0xf] %vm341_vm0, %v335_v6  ;;  %v280_v0 = vpop.permute.xlu1 %279 }
  0xb5   : > { %v338_v12 = vmax.bf16 %v280_v0, %v627_v18  ;;  %v278_v1 = vpop.permute.xlu0 %277 }
  0xb6   : > { %v337_v13 = vmax.bf16 %v278_v1, %v631_v19 }
  0xb7   : > { %368 = vst.msk [vmem:[%s653_s16 + $0x64] sm:$0x7] %vm343_vm1, %v338_v12 }
  0xb8   : > { %367 = vst.msk [vmem:[%s653_s16 + $0x60] sm:$0xf] %vm341_vm0, %v337_v13  ;;  %v284_v14 = vpop.permute.xlu1 %283 }
  0xb9   : > { %v340_v8 = vmax.bf16 %v284_v14, %v639_v26  ;;  %v282_v15 = vpop.permute.xlu0 %281 }
  0xba   : > { %v339_v9 = vmax.bf16 %v282_v15, %v643_v27 }
  0xbb   : > { %370 = vst.msk [vmem:[%s653_s16 + $0x6c] sm:$0x7] %vm343_vm1, %v340_v8 }
  0xbc   : > { %369 = vst.msk [vmem:[%s653_s16 + $0x68] sm:$0xf] %vm341_vm0, %v339_v9 }
  0xbd PF: > { %s11_s6 = sadd.s32 1, %s452_s6  }
  0xbe   : > { %p8_p4 = scmp.ge.s32.totalorder %s11_s6, 4  }
  0xc0   :  { %10 = sbr.rel (!%p8_p4) target bundleno = 1 (0x1), region = 54 }

// kernel: lenet_forward.8
= control target key start
LH: loop header
LB: loop body
LE: loop exit
PB: predicated region body
PF: predicated region fallthrough
CT: control target
= control target key end

     0   :  { %s1786_s12 = smov 0   ;;  %s1788_s13 = smov 0   ;;  %s2139_s0 = inlined_call_operand.vmem [shape: bf16[400,800], index: 0, kind: input, shape index: {}]   ;;  %s2140_s1 = inlined_call_operand.vmem [shape: bf16[800,64], index: 1, kind: input, shape index: {}]   ;;  %s2141_s2 = inlined_call_operand.vmem [shape: f32[1,64], index: 2, kind: input, shape index: {}]   ;;  %s2142_s3 = inlined_call_operand.vmem [shape: bf16[400,64], index: 3, kind: output, shape index: {}]  }
   0x1   :  { %s1790_s14 = smov 0  }
   0x2 LB: > { %s25_s15 = sadd.s32 1, %s1758_s13  ;;  %p1328_p0 = scmp.ge.s32.totalorder %s1762_s14, 1  ;;  %s1762_s14 = sphi %s1790_s14, %s13_s14   ;;  %s1758_s13 = sphi %s1788_s13, %s2144_s13   ;;  %s1754_s12 = sphi %s1786_s12, %s2143_s12  }
   0x3   : > { %p27_p1 = scmp.ge.s32.totalorder %s25_s15, 5  ;;  %p170_p2 = scmp.lt.s32.totalorder %s1762_s14, 6 }
   0x5   : > { %s2146_s15 = smov (%p27_p1, %s25_s15), 0  ;;  %p171_p3 = pnand %p1328_p0, %p170_p2 }
   0x6   : > { %s205_s21 = smul.u32 (!%p171_p3), 10, %s1754_s12 }
   0x7   : > { %174 = sbr.rel (%p171_p3) target bundleno = 327 (0x147), region = 32 }
   0x8   : > { %p206_p4 = scmp.lt.s32.totalorder (!%p171_p3), %s205_s21, 49 }
   0xc   : > { %v1640_v0 = vld [vmem:[%s2140_s1 + $0x78] sm:$0xff]   ;;  %v1644_v4 = vld [vmem:[%s2140_s1 + $0x70] sm:$0xff]   ;;  %v1648_v8 = vld [vmem:[%s2140_s1 + $0x68] sm:$0xff]   ;;  %s2148_s21 = smov (!%p206_p4, %s205_s21), 49  ;;  %v1764_v36 = vmov 0.0   ;;  %vm1765_vm0 = vmmov 0  }
   0xd   : > { %v1641_v1 = vld [vmem:[%s2140_s1 + $0x38] sm:$0xff]   ;;  %1444 = vmatprep.subr.bf16.mxu0 %v1640_v0  ;;  %v1645_v5 = vld [vmem:[%s2140_s1 + $0x30] sm:$0xff]   ;;  %v1649_v9 = vld [vmem:[%s2140_s1 + $0x28] sm:$0xff]   ;;  %s1613_s23 = smul.u32 28, %s2148_s21  ;;  %vm851_vm1 = vcmask 261120   ;;  %s1330_s30 = sshll.u32 %s2148_s21, 2 }
   0xe   : > { %v1642_v2 = vld [vmem:[%s2140_s1 + $0xf8] sm:$0xff]   ;;  %1445 = vmatpush3.bf16.msra.mxu0 %v1641_v1  ;;  %v1646_v6 = vld [vmem:[%s2140_s1 + $0xf0] sm:$0xff]   ;;  %v1650_v10 = vld [vmem:[%s2140_s1 + $0xe8] sm:$0xff]   ;;  %s2077_s7 = scalar_lea.vmem %s2142_s3, %s1330_s30  ;;  %vm1209_vm2 = vcmask 519168  }
   0xf   : > { %v1643_v3 = vld [vmem:[%s2140_s1 + $0xb8] sm:$0xff]   ;;  %1490 = vmatprep.subr.bf16.mxu1 %v1642_v2  ;;  %1446 = vmatprep.subr.bf16.mxu0 %v1644_v4  ;;  %v1647_v7 = vld [vmem:[%s2140_s1 + $0xb0] sm:$0xff]   ;;  %v1651_v11 = vld [vmem:[%s2140_s1 + $0xa8] sm:$0xff]   ;;  %s1903_s6 = scalar_lea.vmem %s2139_s0, %s1613_s23 }
  0x10   : > { %1491 = vmatpush3.bf16.msra.mxu1 %v1643_v3  ;;  %v1652_v12 = vld [vmem:[%s2140_s1 + $0x60] sm:$0xff]   ;;  %v1656_v16 = vld [vmem:[%s2140_s1 + $0x58] sm:$0xff]   ;;  %v1660_v20 = vld [vmem:[%s2140_s1 + $0x50] sm:$0xff]  }
  0x11   : > { %1492 = vmatprep.subr.bf16.mxu1 %v1646_v6  ;;  %v1653_v13 = vld [vmem:[%s2140_s1 + $0x20] sm:$0xff]   ;;  %v1657_v17 = vld [vmem:[%s2140_s1 + $0x18] sm:$0xff]   ;;  %v1661_v21 = vld [vmem:[%s2140_s1 + $0x10] sm:$0xff]  }
  0x12   : > { %1447 = vmatpush3.bf16.msra.mxu0 %v1645_v5  ;;  %v1654_v14 = vld [vmem:[%s2140_s1 + $0xe0] sm:$0xff]   ;;  %v1658_v18 = vld [vmem:[%s2140_s1 + $0xd8] sm:$0xff]   ;;  %v1662_v22 = vld [vmem:[%s2140_s1 + $0xd0] sm:$0xff]  }
  0x13   : > { %1448 = vmatprep.subr.bf16.mxu0 %v1648_v8  ;;  %v1655_v15 = vld [vmem:[%s2140_s1 + $0xa0] sm:$0xff]   ;;  %v1659_v19 = vld [vmem:[%s2140_s1 + $0x98] sm:$0xff]   ;;  %v1663_v23 = vld [vmem:[%s2140_s1 + $0x90] sm:$0xff]  }
  0x14   : > { %1493 = vmatpush3.bf16.msra.mxu1 %v1647_v7  ;;  %v1664_v24 = vld [vmem:[%s2140_s1 + $0x48] sm:$0xff]   ;;  %v1668_v28 = vld [vmem:[%s2140_s1 + $0x40] sm:$0xff]   ;;  %v1678_v37 = vld [vmem:[%s2140_s1 + $0x178] sm:$0xff]  }
  0x15   : > { %1494 = vmatprep.subr.bf16.mxu1 %v1650_v10  ;;  %v1665_v25 = vld [vmem:[%s2140_s1 + $0x8] sm:$0xff]   ;;  %v1669_v29 = vld [vmem:[%s2140_s1] sm:$0xff]   ;;  %v1679_v38 = vld [vmem:[%s2140_s1 + $0x138] sm:$0xff]  }
  0x16   : > { %1449 = vmatpush3.bf16.msra.mxu0 %v1649_v9  ;;  %v1666_v26 = vld [vmem:[%s2140_s1 + $0xc8] sm:$0xff]   ;;  %v1670_v30 = vld [vmem:[%s2140_s1 + $0xc0] sm:$0xff]   ;;  %v1680_v39 = vld [vmem:[%s2140_s1 + $0x170] sm:$0xff]  }
  0x17   : > { %1450 = vmatprep.subr.bf16.mxu0 %v1652_v12  ;;  %v1667_v27 = vld [vmem:[%s2140_s1 + $0x88] sm:$0xff]   ;;  %v1671_v31 = vld [vmem:[%s2140_s1 + $0x80] sm:$0xff]   ;;  %v1681_v40 = vld [vmem:[%s2140_s1 + $0x130] sm:$0xff]  }
  0x18   : > { %1495 = vmatpush3.bf16.msra.mxu1 %v1651_v11  ;;  %v1672_v32 = vld [vmem:[%s1903_s6] ss:$28 sps:$4 sm:$0xff]   ;;  %v1675_v34 = vld [vmem:[%s1903_s6 + $0x8] ss:$28 sps:$4 sm:$0xff]   ;;  %v1685_v43 = vld [vmem:[%s1903_s6 + $0x38] ss:$28 sps:$4 sm:$0xff]  }
  0x19   : > { %1496 = vmatprep.subr.bf16.mxu1 %v1654_v14  ;;  %v1674_v33 = vld [vmem:[%s1903_s6 + $0x4] ss:$28 sps:$4 sm:$0xff]   ;;  %v1677_v35 = vld [vmem:[%s1903_s6 + $0xc] ss:$28 sps:$4 sm:$0xff]   ;;  %v1682_v41 = vld [vmem:[%s1903_s6 + $0x3c] ss:$28 sps:$4 sm:$0xff]  }
  0x1a   : > { %1451 = vmatpush3.bf16.msra.mxu0 %v1653_v13  ;;  %899 = vmatprep.mubr.bf16.mxu0 %v1674_v33  ;;  %v1684_v42 = vld [vmem:[%s2140_s1 + $0x188] sm:$0xff]   ;;  %v1686_v44 = vld [vmem:[%s1903_s6 + $0x44] ss:$28 sps:$4 sm:$0xff]   ;;  %v1691_v48 = vld [vmem:[%s1903_s6 + $0x74] ss:$28 sps:$4 sm:$0xff]  }
  0x1b   : > { %1452 = vmatprep.subr.bf16.mxu0 %v1656_v16  ;;  %972 = vmatprep.mubr.bf16.mxu1 %v1677_v35  ;;  %v1688_v45 = vld [vmem:[%s1903_s6 + $0x40] ss:$28 sps:$4 sm:$0xff]   ;;  %v1689_v46 = vld [vmem:[%s2140_s1 + $0x168] sm:$0xff]   ;;  %v1698_v53 = vld [vmem:[%s1903_s6 + $0x78] ss:$28 sps:$4 sm:$0xff]  }
  0x1c   : > { %1497 = vmatpush3.bf16.msra.mxu1 %v1655_v15  ;;  %v1690_v47 = vld [vmem:[%s2140_s1 + $0x128] sm:$0xff]   ;;  %v1693_v49 = vld [vmem:[%s2140_s1 + $0x160] sm:$0xff]   ;;  %v1695_v51 = vld [vmem:[%s1903_s6 + $0x7c] ss:$28 sps:$4 sm:$0xff]  }
  0x1d   : > { %1498 = vmatprep.subr.bf16.mxu1 %v1658_v18  ;;  %v1694_v50 = vld [vmem:[%s1903_s6 + $0x70] ss:$28 sps:$4 sm:$0xff]   ;;  %v1697_v52 = vld [vmem:[%s2140_s1 + $0x120] sm:$0xff]   ;;  %v1699_v54 = vld [vmem:[%s2140_s1 + $0x158] sm:$0xff]  }
  0x1e   : > { %1453 = vmatpush3.bf16.msra.mxu0 %v1657_v17  ;;  %v1700_v55 = vld [vmem:[%s2140_s1 + $0x118] sm:$0xff]   ;;  %v1701_v56 = vld [vmem:[%s1903_s6 + $0xac] ss:$28 sps:$4 sm:$0xff]   ;;  %v1704_v57 = vld [vmem:[%s1903_s6 + $0xb4] ss:$28 sps:$4 sm:$0xff]  }
  0x1f   : > { %1454 = vmatprep.subr.bf16.mxu0 %v1660_v20  ;;  %v1703_v58 = vld [vmem:[%s1903_s6 + $0xa8] ss:$28 sps:$4 sm:$0xff]   ;;  %v1707_v59 = vld [vmem:[%s2140_s1 + $0x150] sm:$0xff]   ;;  %v1714_v5 = vld [vmem:[%s1903_s6 + $0xe0] ss:$28 sps:$4 sm:$0xff]  }
  0x20   : > { %1499 = vmatpush3.bf16.msra.mxu1 %v1659_v19  ;;  %v1706_v60 = vld [vmem:[%s1903_s6 + $0xb0] ss:$28 sps:$4 sm:$0xff]   ;;  %v1709_v62 = vld [vmem:[%s2140_s1 + $0x180] sm:$0xff]   ;;  %v1723_v9 = vld [vmem:[%s1903_s6 + $0x18] ss:$28 sps:$4 sm:$0xff]  }
  0x21   : > { %1500 = vmatprep.subr.bf16.mxu1 %v1662_v22  ;;  %v1708_v61 = vld [vmem:[%s2140_s1 + $0x110] sm:$0xff]   ;;  %v1710_v63 = vld [vmem:[%s2140_s1 + $0x148] sm:$0xff]   ;;  %v1711_v0 = vld [vmem:[%s1903_s6 + $0xe4] ss:$28 sps:$4 sm:$0xff]  }
  0x22   : > { %1455 = vmatpush3.bf16.msra.mxu0 %v1661_v21  ;;  %v1713_v1 = vld [vmem:[%s2140_s1 + $0x108] sm:$0xff]   ;;  %v1718_v3 = vld [vmem:[%s2140_s1 + $0x140] sm:$0xff]   ;;  %v1722_v7 = vld [vmem:[%s1903_s6 + $0x14] ss:$28 sps:$4 sm:$0xff]  }
  0x23   : > { %1456 = vmatprep.subr.bf16.mxu0 %v1664_v24  ;;  %v1715_v2 = vld [vmem:[%s1903_s6 + $0xec] ss:$28 sps:$4 sm:$0xff]   ;;  %v1719_v4 = vld [vmem:[%s2140_s1 + $0x100] sm:$0xff]   ;;  %v1732_v16 = vld [vmem:[%s1903_s6 + $0xbc] ss:$28 sps:$4 sm:$0xff]  }
  0x24   : > { %1501 = vmatpush3.bf16.msra.mxu1 %v1663_v23  ;;  %v1717_v6 = vld [vmem:[%s1903_s6 + $0xe8] ss:$28 sps:$4 sm:$0xff]   ;;  %v1720_v8 = vld [vmem:[%s1903_s6 + $0x10] ss:$28 sps:$4 sm:$0xff]   ;;  %v1730_v14 = vld [vmem:[%s1903_s6 + $0x80] ss:$28 sps:$4 sm:$0xff]  }
  0x25   : > { %1502 = vmatprep.subr.bf16.mxu1 %v1666_v26  ;;  %v1724_v10 = vld [vmem:[%s1903_s6 + $0x4c] ss:$28 sps:$4 sm:$0xff]   ;;  %v1728_v13 = vld [vmem:[%s1903_s6 + $0x84] ss:$28 sps:$4 sm:$0xff]   ;;  %v1734_v17 = vld [vmem:[%s1903_s6 + $0xb8] ss:$28 sps:$4 sm:$0xff]  }
  0x26   : > { %1457 = vmatpush3.bf16.msra.mxu0 %v1665_v25  ;;  %v1726_v11 = vld [vmem:[%s1903_s6 + $0x48] ss:$28 sps:$4 sm:$0xff]   ;;  %v1727_v12 = vld [vmem:[%s1903_s6 + $0x50] ss:$28 sps:$4 sm:$0xff]   ;;  %v1735_v18 = vld [vmem:[%s1903_s6 + $0xc0] ss:$28 sps:$4 sm:$0xff]  }
  0x27   : > { %1458 = vmatprep.subr.bf16.mxu0 %v1668_v28  ;;  %v1731_v15 = vld [vmem:[%s1903_s6 + $0x88] ss:$28 sps:$4 sm:$0xff]   ;;  %v1736_v19 = vld [vmem:[%s1903_s6 + $0xf4] ss:$28 sps:$4 sm:$0xff]  }
  0x28   : > { %1503 = vmatpush3.bf16.msra.mxu1 %v1667_v27  ;;  %v1738_v20 = vld [vmem:[%s1903_s6 + $0xf0] ss:$28 sps:$4 sm:$0xff]   ;;  %v1739_v21 = vld [vmem:[%s1903_s6 + $0xf8] ss:$28 sps:$4 sm:$0xff]  }
  0x29   : > { %1504 = vmatprep.subr.bf16.mxu1 %v1670_v30 }
  0x2a   : > { %1459 = vmatpush3.bf16.msra.mxu0 %v1669_v29 }
  0x2b   : > { %1536 = vmatprep.subr.bf16.mxu0 %v1678_v37 }
  0x2c   : > { %1505 = vmatpush3.bf16.msra.mxu1 %v1671_v31 }
  0x2d   : > { %1589 = vmatprep.subr.bf16.mxu1 %v1764_v36  ;;  %900 = vmatmul.mubr.bf16.vlgmr.msra.gmra.mxu0 %v1672_v32 }
  0x2e   : > { %1537 = vmatpush3.bf16.msra.mxu0 %v1679_v38  ;;  %907 = vmatprep.mubr.bf16.mxu0 %v1682_v41 }
  0x2f   : > { %973 = vmatmul.mubr.bf16.vlgmr.msra.gmra.mxu1 %v1675_v34  ;;  %1538 = vmatprep.subr.bf16.mxu0 %v1680_v39 }
  0x30   : > { %1590 = vmatpush3.bf16.msra.mxu1 %v1684_v42  ;;  %980 = vmatprep.mubr.bf16.mxu1 %v1686_v44 }
  0x31   : > { %1591 = vmatprep.subr.bf16.mxu1 %v1764_v36 }
  0x32   : > { %1539 = vmatpush3.bf16.msra.mxu0 %v1681_v40 }
  0x33   : > { %1540 = vmatprep.subr.bf16.mxu0 %v1689_v46 }
  0x34   : > { %1592 = vmatpush3.bf16.msra.mxu1 %v1709_v62 }
  0x35   : > { %908 = vmatmul.mubr.bf16.gmra.mxu0 %v1685_v43 }
  0x36   : > { %1541 = vmatpush3.bf16.msra.mxu0 %v1690_v47  ;;  %915 = vmatprep.mubr.bf16.mxu0 %v1691_v48 }
  0x37   : > { %981 = vmatmul.mubr.bf16.gmra.mxu1 %v1688_v45  ;;  %1542 = vmatprep.subr.bf16.mxu0 %v1693_v49 }
  0x38   : > { %988 = vmatprep.mubr.bf16.mxu1 %v1695_v51 }
  0x3a   : > { %1543 = vmatpush3.bf16.msra.mxu0 %v1697_v52 }
  0x3b   : > { %1544 = vmatprep.subr.bf16.mxu0 %v1699_v54 }
  0x3d   : > { %916 = vmatmul.mubr.bf16.gmra.mxu0 %v1694_v50 }
  0x3e   : > { %923 = vmatprep.mubr.bf16.mxu0 %v1701_v56  ;;  %1545 = vmatpush3.bf16.msra.mxu0 %v1700_v55 }
  0x3f   : > { %989 = vmatmul.mubr.bf16.gmra.mxu1 %v1698_v53  ;;  %1546 = vmatprep.subr.bf16.mxu0 %v1707_v59  ;;  %v2060_v59 = vld [vmem:[%s2141_s2] ss:$0 sm:$0xff] }
  0x40   : > { %996 = vmatprep.mubr.bf16.mxu1 %v1704_v57 }
  0x42   : > { %1547 = vmatpush3.bf16.msra.mxu0 %v1708_v61 }
  0x43   : > { %1548 = vmatprep.subr.bf16.mxu0 %v1710_v63 }
  0x45   : > { %924 = vmatmul.mubr.bf16.gmra.mxu0 %v1703_v58 }
  0x46   : > { %931 = vmatprep.mubr.bf16.mxu0 %v1711_v0  ;;  %1549 = vmatpush3.bf16.msra.mxu0 %v1713_v1 }
  0x47   : > { %997 = vmatmul.mubr.bf16.gmra.mxu1 %v1706_v60  ;;  %1550 = vmatprep.subr.bf16.mxu0 %v1718_v3 }
  0x48   : > { %1004 = vmatprep.mubr.bf16.mxu1 %v1715_v2 }
  0x4a   : > { %1551 = vmatpush3.bf16.msra.mxu0 %v1719_v4 }
  0x4d   : > { %932 = vmatmul.mubr.bf16.gmra.mxu0 %v1714_v5 }
  0x4e   : > { %1045 = vmatprep.mubr.bf16.mxu0 %v1722_v7 }
  0x4f   : > { %1005 = vmatmul.mubr.bf16.gmra.mxu1 %v1717_v6 }
  0x50   : > { %1593 = vmatprep.mubr.msk.bf16.mxu1 %vm1765_vm0, %v1764_v36 }
  0x55   : > { %1046 = vmatmul.mubr.bf16.vlgmr.msra.gmra.mxu0 %v1720_v8 }
  0x56   : > { %1053 = vmatprep.mubr.bf16.mxu0 %v1724_v10 }
  0x57   : > { %1594 = vmatmul.mubr.msk.bf16.vlgmr.msra.gmra.mxu1 %vm851_vm1, %v1723_v9 }
  0x58   : > { %1597 = vmatprep.mubr.msk.bf16.mxu1 %vm1765_vm0, %v1764_v36 }
  0x5d   : > { %1054 = vmatmul.mubr.bf16.gmra.mxu0 %v1726_v11 }
  0x5e   : > { %1061 = vmatprep.mubr.bf16.mxu0 %v1728_v13 }
  0x5f   : > { %1598 = vmatmul.mubr.msk.bf16.gmra.mxu1 %vm851_vm1, %v1727_v12 }
  0x60   : > { %1601 = vmatprep.mubr.msk.bf16.mxu1 %vm1765_vm0, %v1764_v36 }
  0x65   : > { %1062 = vmatmul.mubr.bf16.gmra.mxu0 %v1730_v14 }
  0x66   : > { %1069 = vmatprep.mubr.bf16.mxu0 %v1732_v16 }
  0x67   : > { %1602 = vmatmul.mubr.msk.bf16.gmra.mxu1 %vm851_vm1, %v1731_v15 }
  0x68   : > { %1605 = vmatprep.mubr.msk.bf16.mxu1 %vm1765_vm0, %v1764_v36 }
  0x6d   : > { %1070 = vmatmul.mubr.bf16.gmra.mxu0 %v1734_v17 }
  0x6e   : > { %1077 = vmatprep.mubr.bf16.mxu0 %v1736_v19 }
  0x6f   : > { %1606 = vmatmul.mubr.msk.bf16.gmra.mxu1 %vm851_vm1, %v1735_v18 }
  0x70   : > { %1609 = vmatprep.mubr.msk.bf16.mxu1 %vm1765_vm0, %v1764_v36 }
  0x75   : > { %1078 = vmatmul.mubr.bf16.gmra.mxu0 %v1738_v20 }
  0x77   : > { %1610 = vmatmul.mubr.msk.bf16.gmra.mxu1 %vm851_vm1, %v1739_v21 }
  0xed   : > { %v1460_v22 = vpop.f32.mrf.mxu0 }
  0xef   : > { %v1506_v23 = vpop.f32.mrf.mxu1  ;;  %v1461_v24 = vpop.f32.mrf.mxu0 }
  0xf0   : > { %v1462_v57 = vadd.f32 %v1461_v24, %v1460_v22 }
  0xf1   : > { %v1507_v25 = vpop.f32.mrf.mxu1  ;;  %v1463_v26 = vpop.f32.mrf.mxu0 }
  0xf2   : > { %v902_v63 = vadd.f32 %v1462_v57, %v2060_v59  ;;  %v1508_v0 = vadd.f32 %v1507_v25, %v1506_v23 }
  0xf3   : > { %v1509_v27 = vpop.f32.mrf.mxu1  ;;  %v1464_v28 = vpop.f32.mrf.mxu0 }
  0xf4   : > { %v1465_v1 = vadd.f32 %v1464_v28, %v1463_v26  ;;  %v975_v7 = vadd.f32 %v1508_v0, %v902_v63 }
  0xf5   : > { %v1510_v29 = vpop.f32.mrf.mxu1  ;;  %v1466_v30 = vpop.f32.mrf.mxu0 }
  0xf6   : > { %v905_v8 = vadd.f32 %v1465_v1, %v2060_v59  ;;  %v1511_v12 = vadd.f32 %v1510_v29, %v1509_v27 }
  0xf7   : > { %v1512_v31 = vpop.f32.mrf.mxu1  ;;  %v1467_v32 = vpop.f32.mrf.mxu0 }
  0xf8   : > { %v1468_v5 = vadd.f32 %v1467_v32, %v1466_v30  ;;  %v978_v18 = vadd.f32 %v1511_v12, %v905_v8 }
  0xf9   : > { %v1513_v33 = vpop.f32.mrf.mxu1  ;;  %v1469_v34 = vpop.f32.mrf.mxu0 }
  0xfa   : > { %v910_v15 = vadd.f32 %v1468_v5, %v2060_v59  ;;  %v1514_v16 = vadd.f32 %v1513_v33, %v1512_v31 }
  0xfb   : > { %v2017_v35 = vpop.f32.mrf.mxu1  ;;  %v1470_v36 = vpop.f32.mrf.mxu0 }
  0xfc   : > { %v1471_v19 = vadd.f32 %v1470_v36, %v1469_v34  ;;  %v983_v28 = vadd.f32 %v1514_v16, %v910_v15 }
  0xfd   : > { %v2019_v37 = vpop.f32.mrf.mxu1  ;;  %v1472_v38 = vpop.f32.mrf.mxu0 }
  0xfe   : > { %v913_v29 = vadd.f32 %v1471_v19, %v2060_v59  ;;  %v1517_v57 = vadd.f32 %v2019_v37, %v2017_v35 }
  0xff   : > { %v2021_v39 = vpop.f32.mrf.mxu1  ;;  %v1473_v40 = vpop.f32.mrf.mxu0 }
 0x100   : > { %v1474_v30 = vadd.f32 %v1473_v40, %v1472_v38  ;;  %v986_v5 = vadd.f32 %v1517_v57, %v913_v29 }
 0x101   : > { %v2023_v41 = vpop.f32.mrf.mxu1  ;;  %v2025_v42 = vpop.f32.mrf.mxu0 }
 0x102   : > { %v918_v0 = vadd.f32 %v1474_v30, %v2060_v59  ;;  %v1520_v1 = vadd.f32 %v2023_v41, %v2021_v39 }
 0x103   : > { %v2027_v43 = vpop.f32.mrf.mxu1  ;;  %v2029_v44 = vpop.f32.mrf.mxu0 }
 0x104   : > { %v991_v12 = vadd.f32 %v1520_v1, %v918_v0 }
 0x105   : > { %v2031_v45 = vpop.f32.mrf.mxu1  ;;  %v2033_v46 = vpop.f32.mrf.mxu0 }
 0x106   : > { %v1523_v16 = vadd.f32 %v2031_v45, %v2027_v43 }
 0x107   : > { %v2035_v47 = vpop.f32.mrf.mxu1  ;;  %v2037_v48 = vpop.f32.mrf.mxu0 }
 0x108   : > { %v1480_v41 = vadd.f32 %v2037_v48, %v2033_v46 }
 0x109   : > { %v2039_v49 = vpop.f32.mrf.mxu1  ;;  %v2041_v50 = vpop.f32.mrf.mxu0 }
 0x10b   : > { %v2043_v51 = vpop.f32.mrf.mxu1  ;;  %v2045_v52 = vpop.f32.mrf.mxu0 }
 0x10c   : > { %v1483_v46 = vadd.f32 %v2045_v52, %v2041_v50 }
 0x10d   : > { %v2047_v53 = vpop.f32.mrf.mxu1  ;;  %v2049_v54 = vpop.f32.mrf.mxu0 }
 0x10e   : > { %v929_v29 = vadd.f32 %v1483_v46, %v2060_v59 }
 0x10f   : > { %v2051_v55 = vpop.f32.mrf.mxu1  ;;  %v2053_v56 = vpop.f32.mrf.mxu0 }
 0x111   : > { %v2055_v58 = vpop.f32.mrf.mxu1  ;;  %v2062_v60 = vpop.f32.mrf.mxu0 }
 0x113   : > { %v2064_v61 = vpop.f32.mrf.mxu1  ;;  %v2066_v62 = vpop.f32.mrf.mxu0 }
 0x114   : > { %v1489_v1 = vadd.f32 %v2066_v62, %v2062_v60 }
 0x115   : > { %v2069_v2 = vpop.f32.mrf.mxu1  ;;  %v1552_v3 = vpop.f32.mrf.mxu0 }
 0x117   : > { %v1120_v4 = vpop.f32.mrf.mxu1  ;;  %v1553_v6 = vpop.f32.mrf.mxu0 }
 0x118   : > { %v1554_v9 = vadd.f32 %v1553_v6, %v1552_v3  ;;  %v1477_v3 = vadd.f32 %v2029_v44, %v2025_v42 }
 0x119   : > { %v1595_v10 = vpop.f32.mrf.mxu1  ;;  %v1555_v11 = vpop.f32.mrf.mxu0 }
 0x11a   : > { %v1048_v13 = vadd.f32 %v1554_v9, %v975_v7 }
 0x11b   : > { %v1123_v14 = vpop.f32.mrf.mxu1  ;;  %v1556_v17 = vpop.f32.mrf.mxu0 }
 0x11c   : > { %v1121_v20 = vadd.f32 %v1120_v4, %v1048_v13  ;;  %v1557_v21 = vadd.f32 %v1556_v17, %v1555_v11  ;;  %v921_v13 = vadd.f32 %v1477_v3, %v2060_v59 }
 0x11d   : > { %v1596_v22 = vpop.f32.mrf.mxu1  ;;  %v1558_v23 = vpop.f32.mrf.mxu0 }
 0x11e   : > { %v1159_v24 = vmax.f32 %v1121_v20, 0.0  ;;  %v1051_v25 = vadd.f32 %v1557_v21, %v978_v18  ;;  %v994_v21 = vadd.f32 %v1523_v16, %v921_v13  ;;  %v1526_v22 = vadd.f32 %v2039_v49, %v2035_v47 }
 0x11f   : > { %v1128_v26 = vpop.f32.mrf.mxu1  ;;  %v1559_v27 = vpop.f32.mrf.mxu0  ;;  %v1486_v47 = vadd.f32 %v2053_v56, %v2049_v54  ;;  %v1532_v54 = vadd.f32 %v2055_v58, %v2051_v55 }
 0x120   : > { %v1434_v31 = vpack.c.bf16 %v1159_v24, %v1159_v24  ;;  %v1124_v32 = vadd.f32 %v1123_v14, %v1051_v25  ;;  %v1560_v33 = vadd.f32 %v1559_v27, %v1558_v23  ;;  %v926_v23 = vadd.f32 %v1480_v41, %v2060_v59 }
 0x121   : > { %v1599_v34 = vpop.f32.mrf.mxu1  ;;  %v1561_v36 = vpop.f32.mrf.mxu0  ;;  %v934_v0 = vadd.f32 %v1486_v47, %v2060_v59 }
 0x122   : > { %1210 = vst.msk [vmem:[%s2077_s7] sm:$0xf] %vm1209_vm2, %v1434_v31  ;;  %v1160_v38 = vmax.f32 %v1124_v32, 0.0  ;;  %v1056_v40 = vadd.f32 %v1560_v33, %v983_v28  ;;  %v999_v50 = vadd.f32 %v1526_v22, %v926_v23  ;;  %v1529_v34 = vadd.f32 %v2047_v53, %v2043_v51 }
 0x123   : > { %v1131_v63 = vpop.f32.mrf.mxu1  ;;  %v1562_v4 = vpop.f32.mrf.mxu0 }
 0x124   : > { %v1435_v6 = vpack.c.bf16 %v1160_v38, %v1160_v38  ;;  %v1129_v7 = vadd.f32 %v1128_v26, %v1056_v40  ;;  %v1563_v8 = vadd.f32 %v1562_v4, %v1561_v36 }
 0x125   : > { %v1600_v9 = vpop.f32.mrf.mxu1  ;;  %v1564_v35 = vpop.f32.mrf.mxu0 }
 0x126   : > { %1211 = vst.msk [vmem:[%s2077_s7 + $0x4] sm:$0xf] %vm1209_vm2, %v1435_v6  ;;  %v1161_v37 = vmax.f32 %v1129_v7, 0.0  ;;  %v1059_v10 = vadd.f32 %v1563_v8, %v986_v5  ;;  %v1007_v9 = vadd.f32 %v1532_v54, %v934_v0 }
 0x127   : > { %v1136_v11 = vpop.f32.mrf.mxu1  ;;  %v1565_v39 = vpop.f32.mrf.mxu0 }
 0x128   : > { %v1436_v42 = vpack.c.bf16 %v1161_v37, %v1161_v37  ;;  %v1132_v44 = vadd.f32 %v1131_v63, %v1059_v10  ;;  %v1566_v14 = vadd.f32 %v1565_v39, %v1564_v35  ;;  %v1002_v63 = vadd.f32 %v1529_v34, %v929_v29 }
 0x129   : > { %v1603_v15 = vpop.f32.mrf.mxu1  ;;  %v1567_v17 = vpop.f32.mrf.mxu0  ;;  %v937_v37 = vadd.f32 %v1489_v1, %v2060_v59 }
 0x12a   : > { %1212 = vst.msk [vmem:[%s2077_s7 + $0x8] sm:$0xf] %vm1209_vm2, %v1436_v42  ;;  %v1162_v18 = vmax.f32 %v1132_v44, 0.0  ;;  %v1064_v19 = vadd.f32 %v1566_v14, %v991_v12 }
 0x12b   : > { %v1139_v20 = vpop.f32.mrf.mxu1  ;;  %v1568_v48 = vpop.f32.mrf.mxu0 }
 0x12c   : > { %v1437_v24 = vpack.c.bf16 %v1162_v18, %v1162_v18  ;;  %v1137_v25 = vadd.f32 %v1136_v11, %v1064_v19  ;;  %v1569_v43 = vadd.f32 %v1568_v48, %v1567_v17  ;;  %v1535_v11 = vadd.f32 %v2069_v2, %v2064_v61 }
 0x12d   : > { %v1604_v45 = vpop.f32.mrf.mxu1  ;;  %v1570_v26 = vpop.f32.mrf.mxu0 }
 0x12e   : > { %1213 = vst.msk [vmem:[%s2077_s7 + $0xc] sm:$0xf] %vm1209_vm2, %v1437_v24  ;;  %v1163_v28 = vmax.f32 %v1137_v25, 0.0  ;;  %v1067_v30 = vadd.f32 %v1569_v43, %v994_v21  ;;  %v1010_v42 = vadd.f32 %v1535_v11, %v937_v37 }
 0x12f   : > { %v1144_v27 = vpop.f32.mrf.mxu1  ;;  %v1571_v49 = vpop.f32.mrf.mxu0 }
 0x130   : > { %v1438_v52 = vpack.c.bf16 %v1163_v28, %v1163_v28  ;;  %v1140_v31 = vadd.f32 %v1139_v20, %v1067_v30  ;;  %v1572_v32 = vadd.f32 %v1571_v49, %v1570_v26 }
 0x131   : > { %v1607_v33 = vpop.f32.mrf.mxu1  ;;  %v1573_v36 = vpop.f32.mrf.mxu0 }
 0x132   : > { %1214 = vst.msk [vmem:[%s2077_s7 + $0x10] sm:$0xf] %vm1209_vm2, %v1438_v52  ;;  %v1164_v57 = vmax.f32 %v1140_v31, 0.0  ;;  %v1072_v38 = vadd.f32 %v1572_v32, %v999_v50 }
 0x133   : > { %v1147_v40 = vpop.f32.mrf.mxu1  ;;  %v1574_v56 = vpop.f32.mrf.mxu0 }
 0x134   : > { %v1439_v3 = vpack.c.bf16 %v1164_v57, %v1164_v57  ;;  %v1145_v4 = vadd.f32 %v1144_v27, %v1072_v38  ;;  %v1575_v51 = vadd.f32 %v1574_v56, %v1573_v36 }
 0x135   : > { %v1608_v53 = vpop.f32.mrf.mxu1  ;;  %v1576_v5 = vpop.f32.mrf.mxu0 }
 0x136   : > { %1215 = vst.msk [vmem:[%s2077_s7 + $0x14] sm:$0xf] %vm1209_vm2, %v1439_v3  ;;  %v1165_v6 = vmax.f32 %v1145_v4, 0.0  ;;  %v1075_v7 = vadd.f32 %v1575_v51, %v1002_v63 }
 0x137   : > { %v1152_v8 = vpop.f32.mrf.mxu1  ;;  %v1577_v35 = vpop.f32.mrf.mxu0 }
 0x138   : > { %v1440_v55 = vpack.c.bf16 %v1165_v6, %v1165_v6  ;;  %v1148_v58 = vadd.f32 %v1147_v40, %v1075_v7  ;;  %v1578_v10 = vadd.f32 %v1577_v35, %v1576_v5 }
 0x139   : > { %v1611_v60 = vpop.f32.mrf.mxu1  ;;  %v1579_v62 = vpop.f32.mrf.mxu0 }
 0x13a   : > { %1216 = vst.msk [vmem:[%s2077_s7 + $0x18] sm:$0xf] %vm1209_vm2, %v1440_v55  ;;  %v1166_v12 = vmax.f32 %v1148_v58, 0.0  ;;  %v1080_v13 = vadd.f32 %v1578_v10, %v1007_v9 }
 0x13b   : > { %v1155_v39 = vpop.f32.mrf.mxu1  ;;  %v1580_v41 = vpop.f32.mrf.mxu0 }
 0x13c   : > { %v1441_v44 = vpack.c.bf16 %v1166_v12, %v1166_v12  ;;  %v1153_v59 = vadd.f32 %v1152_v8, %v1080_v13  ;;  %v1581_v14 = vadd.f32 %v1580_v41, %v1579_v62 }
 0x13d   : > { %v1612_v15 = vpop.f32.mrf.mxu1 }
 0x13e   : > { %1217 = vst.msk [vmem:[%s2077_s7 + $0x1c] sm:$0xf] %vm1209_vm2, %v1441_v44  ;;  %v1167_v16 = vmax.f32 %v1153_v59, 0.0  ;;  %v1083_v17 = vadd.f32 %v1581_v14, %v1010_v42 }
 0x140   : > { %v1442_v18 = vpack.c.bf16 %v1167_v16, %v1167_v16  ;;  %v1156_v19 = vadd.f32 %v1155_v39, %v1083_v17 }
 0x142   : > { %1218 = vst.msk [vmem:[%s2077_s7 + $0x20] sm:$0xf] %vm1209_vm2, %v1442_v18  ;;  %v1168_v61 = vmax.f32 %v1156_v19, 0.0 }
 0x144   : > { %v1443_v2 = vpack.c.bf16 %v1168_v61, %v1168_v61 }
 0x146   : > { %1219 = vst.msk [vmem:[%s2077_s7 + $0x24] sm:$0xf] %vm1209_vm2, %v1443_v2 }
 0x147 PF: > { %s13_s14 = sadd.s32 1, %s1762_s14   ;;  %s2143_s12 = smov %s1758_s13 }
 0x148   : > { %p10_p5 = scmp.ge.s32.totalorder %s13_s14, 7   ;;  %s2144_s13 = smov %s2146_s15 }
 0x14a   :  { %12 = sbr.rel (!%p10_p5) target bundleno = 2 (0x2), region = 68 }

// kernel: lenet_forward.9
= control target key start
LH: loop header
LB: loop body
LE: loop exit
PB: predicated region body
PF: predicated region fallthrough
CT: control target
= control target key end

     0   :  { %s291_s6 = smov 0   ;;  %s346_s0 = inlined_call_operand.vmem [shape: bf16[2,14,7,128], index: 0, kind: input, shape index: {}]   ;;  %s347_s1 = inlined_call_operand.vmem [shape: bf16[2,7,7,64], index: 1, kind: output, shape index: {}]  }
   0x1 LB: > { %s252_s7 = sadd.s32 4294967295, %s278_s6   ;;  %p256_p0 = scmp.ge.s32.totalorder %s278_s6, 1  ;;  %s278_s6 = sphi %s291_s6, %s11_s6  }
   0x2   : > { %p87_p1 = scmp.lt.s32.totalorder %s278_s6, 3 }
   0x4   : > { %p88_p2 = pnand %p256_p0, %p87_p1 }
   0x5   : > { %p107_p3 = scmp.lt.s32.totalorder (!%p88_p2), %s252_s7, 1  ;;  %s280_s12 = smov (!%p88_p2), 64  }
   0x6   : > { %91 = sbr.rel (%p88_p2) target bundleno = 149 (0x95), region = 24 }
   0xb   : > { %s351_s7 = smov (!%p107_p3, %s252_s7), 1  ;;  %vm173_vm0 = vcmask 519168   ;;  %vm174_vm1 = vsmask.f32 3328 }
   0xc   : > { %s261_s8 = smul.u32 56, %s351_s7  ;;  %vm311_vm2 = vmand %vm173_vm0, %vm174_vm1 }
   0xd   : > { %s262_s13 = smul.u32 28, %s351_s7 }
   0xe   : > { %s111_s11 = scalar_lea.vmem %s346_s0, %s261_s8 }
   0xf   : > { %v117_v0 = vld [vmem:[%s111_s11] sm:$0xf]  ;;  %v118_v1 = vld [vmem:[%s111_s11 + $0x4] sm:$0xf]  ;;  %v121_v2 = vld [vmem:[%s111_s11 + $0x10] sm:$0xf]  ;;  %s309_s16 = scalar_lea.vmem %s347_s1, %s262_s13 }
  0x10   : > { %v131_v3 = vmax.bf16 %v118_v1, %v117_v0  ;;  %v122_v4 = vld [vmem:[%s111_s11 + $0x14] sm:$0xf]  ;;  %v119_v5 = vld [vmem:[%s111_s11 + $0x8] sm:$0xf]  ;;  %v120_v6 = vld [vmem:[%s111_s11 + $0xc] sm:$0xf] }
  0x11   : > { %v133_v7 = vmax.bf16 %v122_v4, %v121_v2  ;;  %v123_v8 = vld [vmem:[%s111_s11 + $0x18] sm:$0xf]  ;;  %v124_v9 = vld [vmem:[%s111_s11 + $0x1c] sm:$0xf]  ;;  %v132_v10 = vmax.bf16 %v120_v6, %v119_v5  ;;  %v125_v12 = vld [vmem:[%s111_s11 + $0x20] sm:$0xf] }
  0x12   : > { %145 = vrot.lane.b32.xlu0 %v131_v3, %s280_s12  ;;  %v134_v11 = vmax.bf16 %v124_v9, %v123_v8  ;;  %v126_v13 = vld [vmem:[%s111_s11 + $0x24] sm:$0xf]  ;;  %v127_v14 = vld [vmem:[%s111_s11 + $0x28] sm:$0xf]  ;;  %v128_v15 = vld [vmem:[%s111_s11 + $0x2c] sm:$0xf] }
  0x13   : > { %149 = vrot.lane.b32.xlu1 %v133_v7, %s280_s12  ;;  %v135_v16 = vmax.bf16 %v126_v13, %v125_v12  ;;  %v136_v17 = vmax.bf16 %v128_v15, %v127_v14  ;;  %v129_v18 = vld [vmem:[%s111_s11 + $0x30] sm:$0xf]  ;;  %v130_v19 = vld [vmem:[%s111_s11 + $0x34] sm:$0xf]  ;;  %v176_v22 = vld [vmem:[%s309_s16] sm:$0xf] }
  0x14   : > { %v137_v20 = vmax.bf16 %v130_v19, %v129_v18  ;;  %v182_v25 = vld [vmem:[%s309_s16 + $0x8] sm:$0xf]  ;;  %v179_v30 = vld [vmem:[%s309_s16 + $0x4] sm:$0xf]  ;;  %v185_v33 = vld [vmem:[%s309_s16 + $0xc] sm:$0xf] }
  0x15   : > { %v188_v38 = vld [vmem:[%s309_s16 + $0x10] sm:$0xf]  ;;  %v191_v41 = vld [vmem:[%s309_s16 + $0x14] sm:$0xf]  ;;  %v194_v46 = vld [vmem:[%s309_s16 + $0x18] sm:$0xf] }
  0x16   : > { %147 = vrot.lane.b32.xlu0 %v132_v10, %s280_s12 }
  0x17   : > { %151 = vrot.lane.b32.xlu1 %v134_v11, %s280_s12 }
  0x1a   : > { %153 = vrot.lane.b32.xlu0 %v135_v16, %s280_s12 }
  0x1b   : > { %155 = vrot.lane.b32.xlu1 %v136_v17, %s280_s12 }
  0x1e   : > { %157 = vrot.lane.b32.xlu0 %v137_v20, %s280_s12 }
  0x84   : > { %v146_v23 = vpop.permute.xlu0 %145 }
  0x85   : > { %v166_v24 = vmax.bf16 %v146_v23, %v131_v3  ;;  %v150_v26 = vpop.permute.xlu1 %149 }
  0x86   : > { %v168_v27 = vmax.bf16 %v150_v26, %v133_v7 }
  0x87   : > { %v177_v28 = vsel %vm311_vm2, %v166_v24, %v176_v22 }
  0x88   : > { %178 = vst [vmem:[%s309_s16] sm:$0xf] %v177_v28  ;;  %v183_v29 = vsel %vm311_vm2, %v168_v27, %v182_v25  ;;  %v148_v31 = vpop.permute.xlu0 %147 }
  0x89   : > { %184 = vst [vmem:[%s309_s16 + $0x8] sm:$0xf] %v183_v29  ;;  %v167_v32 = vmax.bf16 %v148_v31, %v132_v10  ;;  %v152_v34 = vpop.permute.xlu1 %151 }
  0x8a   : > { %v169_v35 = vmax.bf16 %v152_v34, %v134_v11 }
  0x8b   : > { %v180_v36 = vsel %vm311_vm2, %v167_v32, %v179_v30 }
  0x8c   : > { %181 = vst [vmem:[%s309_s16 + $0x4] sm:$0xf] %v180_v36  ;;  %v186_v37 = vsel %vm311_vm2, %v169_v35, %v185_v33  ;;  %v154_v39 = vpop.permute.xlu0 %153 }
  0x8d   : > { %187 = vst [vmem:[%s309_s16 + $0xc] sm:$0xf] %v186_v37  ;;  %v170_v40 = vmax.bf16 %v154_v39, %v135_v16  ;;  %v156_v42 = vpop.permute.xlu1 %155 }
  0x8e   : > { %v171_v43 = vmax.bf16 %v156_v42, %v136_v17 }
  0x8f   : > { %v189_v44 = vsel %vm311_vm2, %v170_v40, %v188_v38 }
  0x90   : > { %190 = vst [vmem:[%s309_s16 + $0x10] sm:$0xf] %v189_v44  ;;  %v192_v45 = vsel %vm311_vm2, %v171_v43, %v191_v41  ;;  %v158_v47 = vpop.permute.xlu0 %157 }
  0x91   : > { %193 = vst [vmem:[%s309_s16 + $0x14] sm:$0xf] %v192_v45  ;;  %v172_v48 = vmax.bf16 %v158_v47, %v137_v20 }
  0x93   : > { %v195_v49 = vsel %vm311_vm2, %v172_v48, %v194_v46 }
  0x94   : > { %196 = vst [vmem:[%s309_s16 + $0x18] sm:$0xf] %v195_v49 }
  0x95 PF: > { %s11_s6 = sadd.s32 1, %s278_s6  }
  0x96   : > { %p8_p4 = scmp.ge.s32.totalorder %s11_s6, 4  }
  0x98   :  { %10 = sbr.rel (!%p8_p4) target bundleno = 1 (0x1), region = 54 }

// kernel: lenet_forward.11
= control target key start
LH: loop header
LB: loop body
LE: loop exit
PB: predicated region body
PF: predicated region fallthrough
CT: control target
= control target key end

     0   :  { %vm746_vm0 = vcmask 80896   ;;  %s1261_s1 = inlined_call_operand.vmem [shape: bf16[1024,10], index: 1, kind: input, shape index: {}]   ;;  %s1262_s0 = inlined_call_operand.vmem [shape: bf16[16,1024], index: 0, kind: input, shape index: {}]   ;;  %s1263_s2 = inlined_call_operand.vmem [shape: f32[1,10], index: 2, kind: input, shape index: {}]   ;;  %s1264_s3 = inlined_call_operand.vmem [shape: f32[16,10], index: 3, kind: output, shape index: {}]  }
   0x1   :  { %v938_v0 = vld [vmem:[%s1261_s1 + $0x78] sm:$0xff]   ;;  %v942_v4 = vld [vmem:[%s1261_s1 + $0x70] sm:$0xff]   ;;  %v946_v8 = vld [vmem:[%s1261_s1 + $0x68] sm:$0xff]  }
   0x2   :  { %v939_v1 = vld [vmem:[%s1261_s1 + $0xf8] sm:$0xff]   ;;  %850 = vmatprep.subr.bf16.mxu0 %v938_v0  ;;  %v943_v5 = vld [vmem:[%s1261_s1 + $0xf0] sm:$0xff]   ;;  %v947_v9 = vld [vmem:[%s1261_s1 + $0xe8] sm:$0xff]  }
   0x3   :  { %v940_v2 = vld [vmem:[%s1261_s1 + $0x38] sm:$0xff]   ;;  %872 = vmatprep.subr.bf16.mxu1 %v939_v1  ;;  %v944_v6 = vld [vmem:[%s1261_s1 + $0x30] sm:$0xff]   ;;  %v948_v10 = vld [vmem:[%s1261_s1 + $0x28] sm:$0xff]  }
   0x4   :  { %v941_v3 = vld [vmem:[%s1261_s1 + $0xb8] sm:$0xff]   ;;  %851 = vmatpush3.bf16.msra.mxu0 %v940_v2  ;;  %v945_v7 = vld [vmem:[%s1261_s1 + $0xb0] sm:$0xff]   ;;  %v949_v11 = vld [vmem:[%s1261_s1 + $0xa8] sm:$0xff]  }
   0x5   :  { %873 = vmatpush3.bf16.msra.mxu1 %v941_v3  ;;  %852 = vmatprep.subr.bf16.mxu0 %v942_v4  ;;  %v950_v12 = vld [vmem:[%s1261_s1 + $0x60] sm:$0xff]   ;;  %v954_v16 = vld [vmem:[%s1261_s1 + $0x58] sm:$0xff]   ;;  %v958_v20 = vld [vmem:[%s1261_s1 + $0x50] sm:$0xff]  }
   0x6   :  { %874 = vmatprep.subr.bf16.mxu1 %v943_v5  ;;  %v951_v13 = vld [vmem:[%s1261_s1 + $0xe0] sm:$0xff]   ;;  %v955_v17 = vld [vmem:[%s1261_s1 + $0xd8] sm:$0xff]   ;;  %v959_v21 = vld [vmem:[%s1261_s1 + $0xd0] sm:$0xff]  }
   0x7   :  { %v952_v14 = vld [vmem:[%s1261_s1 + $0x20] sm:$0xff]   ;;  %v956_v18 = vld [vmem:[%s1261_s1 + $0x18] sm:$0xff]   ;;  %v960_v22 = vld [vmem:[%s1261_s1 + $0x10] sm:$0xff]  }
   0x8   :  { %853 = vmatpush3.bf16.msra.mxu0 %v944_v6  ;;  %v953_v15 = vld [vmem:[%s1261_s1 + $0xa0] sm:$0xff]   ;;  %v957_v19 = vld [vmem:[%s1261_s1 + $0x98] sm:$0xff]   ;;  %v961_v23 = vld [vmem:[%s1261_s1 + $0x90] sm:$0xff]  }
   0x9   :  { %875 = vmatpush3.bf16.msra.mxu1 %v945_v7  ;;  %854 = vmatprep.subr.bf16.mxu0 %v946_v8  ;;  %v962_v24 = vld [vmem:[%s1261_s1 + $0x48] sm:$0xff]   ;;  %v966_v28 = vld [vmem:[%s1261_s1 + $0x40] sm:$0xff]   ;;  %v970_v40 = vld [vmem:[%s1261_s1 + $0x178] sm:$0xff]  }
   0xa   :  { %876 = vmatprep.subr.bf16.mxu1 %v947_v9  ;;  %v963_v25 = vld [vmem:[%s1261_s1 + $0xc8] sm:$0xff]   ;;  %v967_v29 = vld [vmem:[%s1261_s1 + $0xc0] sm:$0xff]   ;;  %v971_v41 = vld [vmem:[%s1261_s1 + $0x1f8] sm:$0xff]  }
   0xb   :  { %v964_v26 = vld [vmem:[%s1261_s1 + $0x8] sm:$0xff]   ;;  %v968_v30 = vld [vmem:[%s1261_s1] sm:$0xff]   ;;  %v972_v42 = vld [vmem:[%s1261_s1 + $0x138] sm:$0xff]  }
   0xc   :  { %855 = vmatpush3.bf16.msra.mxu0 %v948_v10  ;;  %v965_v27 = vld [vmem:[%s1261_s1 + $0x88] sm:$0xff]   ;;  %v969_v31 = vld [vmem:[%s1261_s1 + $0x80] sm:$0xff]   ;;  %v973_v43 = vld [vmem:[%s1261_s1 + $0x1b8] sm:$0xff]  }
   0xd   :  { %877 = vmatpush3.bf16.msra.mxu1 %v949_v11  ;;  %856 = vmatprep.subr.bf16.mxu0 %v950_v12  ;;  %v15_v32 = vld [vmem:[%s1262_s0] sm:$0xff]  ;;  %v16_v34 = vld [vmem:[%s1262_s0 + $0x8] sm:$0xff]  ;;  %v974_v44 = vld [vmem:[%s1261_s1 + $0x170] sm:$0xff]  }
   0xe   :  { %878 = vmatprep.subr.bf16.mxu1 %v951_v13  ;;  %v19_v33 = vld [vmem:[%s1262_s0 + $0x20] sm:$0xff]  ;;  %v20_v37 = vld [vmem:[%s1262_s0 + $0x28] sm:$0xff]  ;;  %v975_v45 = vld [vmem:[%s1261_s1 + $0x1f0] sm:$0xff]  }
   0xf   :  { %v778_v35 = vcombine.low %v15_v32, %v19_v33  ;;  %v779_v36 = vcombine.high %v15_v32, %v19_v33  ;;  %v780_v38 = vcombine.low %v16_v34, %v20_v37  ;;  %v781_v39 = vcombine.high %v16_v34, %v20_v37  ;;  %v976_v46 = vld [vmem:[%s1261_s1 + $0x130] sm:$0xff]   ;;  %v978_v48 = vld [vmem:[%s1261_s1 + $0x168] sm:$0xff]   ;;  %v982_v52 = vld [vmem:[%s1261_s1 + $0x160] sm:$0xff]  }
  0x10   :  { %857 = vmatpush3.bf16.msra.mxu0 %v952_v14  ;;  %v977_v47 = vld [vmem:[%s1261_s1 + $0x1b0] sm:$0xff]   ;;  %v979_v49 = vld [vmem:[%s1261_s1 + $0x1e8] sm:$0xff]   ;;  %v983_v53 = vld [vmem:[%s1261_s1 + $0x1e0] sm:$0xff]  }
  0x11   :  { %879 = vmatpush3.bf16.msra.mxu1 %v953_v15  ;;  %858 = vmatprep.subr.bf16.mxu0 %v954_v16  ;;  %v980_v50 = vld [vmem:[%s1261_s1 + $0x128] sm:$0xff]   ;;  %v984_v54 = vld [vmem:[%s1261_s1 + $0x120] sm:$0xff]   ;;  %v986_v56 = vld [vmem:[%s1261_s1 + $0x158] sm:$0xff]  }
  0x12   :  { %880 = vmatprep.subr.bf16.mxu1 %v955_v17  ;;  %614 = vmatprep.mubr.bf16.mxu0 %v779_v36  ;;  %v981_v51 = vld [vmem:[%s1261_s1 + $0x1a8] sm:$0xff]   ;;  %v985_v55 = vld [vmem:[%s1261_s1 + $0x1a0] sm:$0xff]   ;;  %v987_v57 = vld [vmem:[%s1261_s1 + $0x1d8] sm:$0xff]  }
  0x13   :  { %655 = vmatprep.mubr.bf16.mxu1 %v781_v39  ;;  %v988_v58 = vld [vmem:[%s1261_s1 + $0x118] sm:$0xff]   ;;  %v990_v60 = vld [vmem:[%s1261_s1 + $0x150] sm:$0xff]   ;;  %v994_v0 = vld [vmem:[%s1261_s1 + $0x148] sm:$0xff]  }
  0x14   :  { %859 = vmatpush3.bf16.msra.mxu0 %v956_v18  ;;  %v989_v59 = vld [vmem:[%s1261_s1 + $0x198] sm:$0xff]   ;;  %v991_v61 = vld [vmem:[%s1261_s1 + $0x1d0] sm:$0xff]   ;;  %v995_v1 = vld [vmem:[%s1261_s1 + $0x1c8] sm:$0xff]  }
  0x15   :  { %881 = vmatpush3.bf16.msra.mxu1 %v957_v19  ;;  %860 = vmatprep.subr.bf16.mxu0 %v958_v20  ;;  %v992_v62 = vld [vmem:[%s1261_s1 + $0x110] sm:$0xff]   ;;  %v996_v2 = vld [vmem:[%s1261_s1 + $0x108] sm:$0xff]   ;;  %v998_v4 = vld [vmem:[%s1261_s1 + $0x140] sm:$0xff]  }
  0x16   :  { %882 = vmatprep.subr.bf16.mxu1 %v959_v21  ;;  %v993_v63 = vld [vmem:[%s1261_s1 + $0x190] sm:$0xff]   ;;  %v997_v3 = vld [vmem:[%s1261_s1 + $0x188] sm:$0xff]   ;;  %v999_v5 = vld [vmem:[%s1261_s1 + $0x1c0] sm:$0xff]  }
  0x17   :  { %v1000_v6 = vld [vmem:[%s1261_s1 + $0x100] sm:$0xff]   ;;  %v17_v8 = vld [vmem:[%s1262_s0 + $0x10] sm:$0xff]  ;;  %v18_v12 = vld [vmem:[%s1262_s0 + $0x18] sm:$0xff] }
  0x18   :  { %861 = vmatpush3.bf16.msra.mxu0 %v960_v22  ;;  %v1001_v7 = vld [vmem:[%s1261_s1 + $0x180] sm:$0xff]   ;;  %v21_v9 = vld [vmem:[%s1262_s0 + $0x30] sm:$0xff]  ;;  %v22_v13 = vld [vmem:[%s1262_s0 + $0x38] sm:$0xff] }
  0x19   :  { %883 = vmatpush3.bf16.msra.mxu1 %v961_v23  ;;  %862 = vmatprep.subr.bf16.mxu0 %v962_v24  ;;  %v782_v10 = vcombine.low %v17_v8, %v21_v9  ;;  %v783_v11 = vcombine.high %v17_v8, %v21_v9  ;;  %v784_v14 = vcombine.low %v18_v12, %v22_v13  ;;  %v777_v23 = vld [vmem:[%s1263_s2] ss:$0 sm:$0xff] }
  0x1a   :  { %884 = vmatprep.subr.bf16.mxu1 %v963_v25  ;;  %v785_v15 = vcombine.high %v18_v12, %v22_v13 }
  0x1c   :  { %863 = vmatpush3.bf16.msra.mxu0 %v964_v26 }
  0x1d   :  { %885 = vmatpush3.bf16.msra.mxu1 %v965_v27  ;;  %864 = vmatprep.subr.bf16.mxu0 %v966_v28 }
  0x1e   :  { %886 = vmatprep.subr.bf16.mxu1 %v967_v29 }
  0x20   :  { %865 = vmatpush3.bf16.msra.mxu0 %v968_v30 }
  0x21   :  { %887 = vmatpush3.bf16.msra.mxu1 %v969_v31  ;;  %894 = vmatprep.subr.bf16.mxu0 %v970_v40 }
  0x22   :  { %916 = vmatprep.subr.bf16.mxu1 %v971_v41 }
  0x23   :  { %615 = vmatmul.mubr.bf16.vlgmr.msra.gmra.mxu0 %v778_v35 }
  0x24   :  { %656 = vmatmul.mubr.bf16.vlgmr.msra.gmra.mxu1 %v780_v38  ;;  %895 = vmatpush3.bf16.msra.mxu0 %v972_v42 }
  0x25   :  { %917 = vmatpush3.bf16.msra.mxu1 %v973_v43  ;;  %896 = vmatprep.subr.bf16.mxu0 %v974_v44 }
  0x26   :  { %918 = vmatprep.subr.bf16.mxu1 %v975_v45  ;;  %696 = vmatprep.mubr.bf16.mxu0 %v783_v11 }
  0x27   :  { %737 = vmatprep.mubr.bf16.mxu1 %v785_v15 }
  0x28   :  { %897 = vmatpush3.bf16.msra.mxu0 %v976_v46 }
  0x29   :  { %919 = vmatpush3.bf16.msra.mxu1 %v977_v47  ;;  %898 = vmatprep.subr.bf16.mxu0 %v978_v48 }
  0x2a   :  { %920 = vmatprep.subr.bf16.mxu1 %v979_v49 }
  0x2c   :  { %899 = vmatpush3.bf16.msra.mxu0 %v980_v50 }
  0x2d   :  { %921 = vmatpush3.bf16.msra.mxu1 %v981_v51  ;;  %900 = vmatprep.subr.bf16.mxu0 %v982_v52 }
  0x2e   :  { %922 = vmatprep.subr.bf16.mxu1 %v983_v53 }
  0x30   :  { %901 = vmatpush3.bf16.msra.mxu0 %v984_v54 }
  0x31   :  { %923 = vmatpush3.bf16.msra.mxu1 %v985_v55  ;;  %902 = vmatprep.subr.bf16.mxu0 %v986_v56 }
  0x32   :  { %924 = vmatprep.subr.bf16.mxu1 %v987_v57 }
  0x34   :  { %903 = vmatpush3.bf16.msra.mxu0 %v988_v58 }
  0x35   :  { %925 = vmatpush3.bf16.msra.mxu1 %v989_v59  ;;  %904 = vmatprep.subr.bf16.mxu0 %v990_v60 }
  0x36   :  { %926 = vmatprep.subr.bf16.mxu1 %v991_v61 }
  0x38   :  { %905 = vmatpush3.bf16.msra.mxu0 %v992_v62 }
  0x39   :  { %927 = vmatpush3.bf16.msra.mxu1 %v993_v63  ;;  %906 = vmatprep.subr.bf16.mxu0 %v994_v0 }
  0x3a   :  { %928 = vmatprep.subr.bf16.mxu1 %v995_v1 }
  0x3c   :  { %907 = vmatpush3.bf16.msra.mxu0 %v996_v2 }
  0x3d   :  { %929 = vmatpush3.bf16.msra.mxu1 %v997_v3  ;;  %908 = vmatprep.subr.bf16.mxu0 %v998_v4 }
  0x3e   :  { %930 = vmatprep.subr.bf16.mxu1 %v999_v5 }
  0x40   :  { %909 = vmatpush3.bf16.msra.mxu0 %v1000_v6 }
  0x41   :  { %931 = vmatpush3.bf16.msra.mxu1 %v1001_v7 }
  0x43   :  { %697 = vmatmul.mubr.bf16.vlgmr.msra.gmra.mxu0 %v782_v10 }
  0x44   :  { %738 = vmatmul.mubr.bf16.vlgmr.msra.gmra.mxu1 %v784_v14 }
  0xe3   :  { %v866_v16 = vpop.f32.mrf.mxu0 }
  0xe4   :  { %v888_v17 = vpop.f32.mrf.mxu1 }
  0xe5   :  { %v867_v18 = vpop.f32.mrf.mxu0 }
  0xe6   :  { %v889_v19 = vpop.f32.mrf.mxu1  ;;  %v868_v21 = vadd.f32 %v867_v18, %v866_v16 }
  0xe7   :  { %v869_v20 = vpop.f32.mrf.mxu0  ;;  %v890_v26 = vadd.f32 %v889_v19, %v888_v17 }
  0xe8   :  { %v891_v22 = vpop.f32.mrf.mxu1  ;;  %v617_v25 = vadd.f32 %v868_v21, %v777_v23 }
  0xe9   :  { %v870_v24 = vpop.f32.mrf.mxu0 }
  0xea   :  { %v871_v27 = vadd.f32 %v870_v24, %v869_v20  ;;  %v892_v28 = vpop.f32.mrf.mxu1  ;;  %v658_v32 = vadd.f32 %v890_v26, %v617_v25 }
  0xeb   :  { %v893_v37 = vadd.f32 %v892_v28, %v891_v22 }
  0xec   :  { %v620_v33 = vadd.f32 %v871_v27, %v777_v23 }
  0xee   :  { %v661_v42 = vadd.f32 %v893_v37, %v620_v33 }
 0x103   :  { %v910_v29 = vpop.f32.mrf.mxu0 }
 0x104   :  { %v932_v30 = vpop.f32.mrf.mxu1 }
 0x105   :  { %v911_v31 = vpop.f32.mrf.mxu0 }
 0x106   :  { %v912_v34 = vadd.f32 %v911_v31, %v910_v29  ;;  %v933_v35 = vpop.f32.mrf.mxu1 }
 0x107   :  { %v913_v36 = vpop.f32.mrf.mxu0  ;;  %v934_v39 = vadd.f32 %v933_v35, %v932_v30 }
 0x108   :  { %v699_v38 = vadd.f32 %v912_v34, %v658_v32  ;;  %v935_v40 = vpop.f32.mrf.mxu1 }
 0x109   :  { %v914_v41 = vpop.f32.mrf.mxu0 }
 0x10a   :  { %v915_v43 = vadd.f32 %v914_v41, %v913_v36  ;;  %v936_v44 = vpop.f32.mrf.mxu1  ;;  %v740_v45 = vadd.f32 %v934_v39, %v699_v38 }
 0x10b   :  { %v937_v47 = vadd.f32 %v936_v44, %v935_v40 }
 0x10c   :  { %v702_v46 = vadd.f32 %v915_v43, %v661_v42  ;;  %v747_v48 = vsel %vm746_vm0, %v740_v45, -inf }
 0x10d   :  { %748 = vmax.xlane.f32.xlu0 %v747_v48 }
 0x10e   :  { %v743_v49 = vadd.f32 %v937_v47, %v702_v46 }
 0x110   :  { %v750_v50 = vsel %vm746_vm0, %v743_v49, -inf }
 0x111   :  { %751 = vmax.xlane.f32.xlu0 %v750_v50 }
 0x196   :  { %v749_v51 = vpop.xlane.xlu0 %748 }
 0x197   :  { %v753_v52 = vsub.f32 %v740_v45, %v749_v51 }
 0x199   :  { %v755_v53 = vmul.f32 1.442695, %v753_v52 }
 0x19a   :  { %v752_v54 = vpop.xlane.xlu0 %751 }
 0x19b   :  { %1002 = vpow2.f32 %v755_v53  ;;  %v754_v55 = vsub.f32 %v743_v49, %v752_v54 }
 0x19d   :  { %v757_v56 = vmul.f32 1.442695, %v754_v55 }
 0x19f   :  { %1004 = vpow2.f32 %v757_v56 }
 0x1a8   :  { %v1003_v57 = vpop.eup %1002 }
 0x1a9   :  { %v759_v58 = vsel %vm746_vm0, %v1003_v57, 0.0 }
 0x1aa   :  { %760 = vadd.xlane.f32.xlu1 %v759_v58 }
 0x1ac   :  { %v1005_v59 = vpop.eup %1004 }
 0x1ad   :  { %v762_v60 = vsel %vm746_vm0, %v1005_v59, 0.0 }
 0x1ae   :  { %763 = vadd.xlane.f32.xlu1 %v762_v60 }
 0x233   :  { %v761_v61 = vpop.xlane.xlu1 %760 }
 0x234   :  { %1006 = vlog2.f32 %v761_v61 }
 0x237   :  { %v764_v62 = vpop.xlane.xlu1 %763 }
 0x238   :  { %1008 = vlog2.f32 %v764_v62 }
 0x241   :  { %v1007_v63 = vpop.eup %1006 }
 0x242   :  { %v766_v0 = vmul.f32 0.6931472, %v1007_v63 }
 0x244   :  { %v769_v1 = vsub.f32 %v753_v52, %v766_v0 }
 0x245   :  { %v1009_v2 = vpop.eup %1008 }
 0x246   :  { %771 = vst.msk [vmem:[%s1264_s3] sm:$0xff] %vm746_vm0, %v769_v1  ;;  %v768_v3 = vmul.f32 0.6931472, %v1009_v2 }
 0x248   :  { %v770_v4 = vsub.f32 %v754_v55, %v768_v3 }
 0x24a   :  { %772 = vst.msk [vmem:[%s1264_s3 + $0x8] sm:$0xff] %vm746_vm0, %v770_v4 }

// kernel: lenet_forward.10
= control target key start
LH: loop header
LB: loop body
LE: loop exit
PB: predicated region body
PF: predicated region fallthrough
CT: control target
= control target key end

     0   :  { %s6233_s12 = smov 0   ;;  %s6235_s13 = smov 0   ;;  %s7570_s0 = inlined_call_operand.vmem [shape: bf16[16,3136], index: 0, kind: input, shape index: {}]   ;;  %s7571_s1 = inlined_call_operand.vmem [shape: bf16[3136,1024], index: 1, kind: input, shape index: {}]   ;;  %s7572_s2 = inlined_call_operand.vmem [shape: f32[1,1024], index: 2, kind: input, shape index: {}]   ;;  %s7573_s3 = inlined_call_operand.vmem [shape: bf16[16,1024], index: 3, kind: output, shape index: {}]  }
   0x1   :  { %s6237_s14 = smov 0   ;;  %s6239_s15 = smov 0  }
   0x2   :  { %s6241_s16 = smov 0  }
   0x3 LB: > { %s22_s17 = sadd.s32 1, %s6206_s15  ;;  %s5065_s18 = sadd.s32 4294967295, %s6210_s16   ;;  %s6210_s16 = sphi %s6241_s16, %s13_s16   ;;  %s6206_s15 = sphi %s6239_s15, %s7578_s15   ;;  %s6202_s14 = sphi %s6237_s14, %s7577_s14   ;;  %s6198_s13 = sphi %s6235_s13, %s7576_s13   ;;  %s6194_s12 = sphi %s6233_s12, %s7575_s12  }
   0x4   : > { %p23_p0 = scmp.ge.s32.totalorder %s22_s17, 4  ;;  %p65_p1 = scmp.ne.s32.totalorder %s6198_s13, %s6194_s12 }
   0x5   : > { %p66_p2 = scmp.eq.s32.totalorder %s6210_s16, 0  ;;  %p123_p4 = scmp.eq.s32.totalorder %s5065_s18, 3 }
   0x6   : > { %s7580_s17 = smov (%p23_p0, %s22_s17), 0  ;;  %s58_s20 = sadd.s32 1, %s6198_s13 }
   0x7   : > { %p67_p3 = por %p66_p2, %p65_p1  ;;  %s55_s19 = ssub.s32 %s6206_s15, %s7580_s17 }
   0x8   : > { %p56_p5 = scmp.eq.s32.totalorder %s55_s19, 0  ;;  %p6268_p6 = por %p123_p4, %p65_p1 }
   0x9   : > { %p5069_p7 = scmp.ge.s32.totalorder %s6210_s16, 4 }
   0xa   : > { %s6273_s22 = scalar_select %p56_p5, %s6198_s13, %s58_s20  }
   0xb   : > { %155 = sbr.rel (%p5069_p7) target bundleno = 412 (0x19c), region = 20 }
  0x10   : > { %158 = sbr.rel (!%p67_p3) target bundleno = 412 (0x19c), region = 24  ;;  %s160_s23 = sand.u32 (%p67_p3), 1, %s6198_s13  }
  0x11   : > { %s5500_s24 = sshll.u32 (%p67_p3), %s6206_s15, 3  ;;  %s5504_s25 = smul.u32 (%p67_p3), 3136, %s160_s23 }
  0x12   : > { %s6281_s28 = scalar_lea.vmem (%p67_p3), %s7571_s1, %s5500_s24 }
  0x13   : > { %v976_v0 = vld [vmem:[%s6281_s28] sm:$0xff] (%p67_p3)  ;;  %s6289_s29 = scalar_lea.vmem (%p67_p3), [#allocation2], %s5504_s25 }
  0x14   : > { %v978_v1 = vld [vmem:[%s6281_s28 + $0x20] sm:$0xff] (%p67_p3)  ;;  %977 = vst [vmem:[%s6289_s29] sm:$0xff] (%p67_p3), %v976_v0 }
  0x15   : > { %v980_v2 = vld [vmem:[%s6281_s28 + $0x40] sm:$0xff]  ;;  %979 = vst [vmem:[%s6289_s29 + $0x8] sm:$0xff] %v978_v1 }
  0x16   : > { %v982_v3 = vld [vmem:[%s6281_s28 + $0x60] sm:$0xff]  ;;  %981 = vst [vmem:[%s6289_s29 + $0x10] sm:$0xff] %v980_v2 }
  0x17   : > { %v984_v4 = vld [vmem:[%s6281_s28 + $0x80] sm:$0xff]  ;;  %983 = vst [vmem:[%s6289_s29 + $0x18] sm:$0xff] %v982_v3 }
  0x18   : > { %v986_v5 = vld [vmem:[%s6281_s28 + $0xa0] sm:$0xff]  ;;  %985 = vst [vmem:[%s6289_s29 + $0x20] sm:$0xff] %v984_v4 }
  0x19   : > { %987 = vst [vmem:[%s6289_s29 + $0x28] sm:$0xff] %v986_v5  ;;  %v988_v6 = vld [vmem:[%s6281_s28 + $0xc0] sm:$0xff] }
  0x1a   : > { %v990_v7 = vld [vmem:[%s6281_s28 + $0xe0] sm:$0xff]  ;;  %989 = vst [vmem:[%s6289_s29 + $0x30] sm:$0xff] %v988_v6 }
  0x1b   : > { %v992_v8 = vld [vmem:[%s6281_s28 + $0x100] sm:$0xff]  ;;  %991 = vst [vmem:[%s6289_s29 + $0x38] sm:$0xff] %v990_v7 }
  0x1c   : > { %993 = vst [vmem:[%s6289_s29 + $0x40] sm:$0xff] %v992_v8  ;;  %v994_v9 = vld [vmem:[%s6281_s28 + $0x120] sm:$0xff] }
  0x1d   : > { %v996_v10 = vld [vmem:[%s6281_s28 + $0x140] sm:$0xff]  ;;  %995 = vst [vmem:[%s6289_s29 + $0x48] sm:$0xff] %v994_v9 }
  0x1e   : > { %v998_v11 = vld [vmem:[%s6281_s28 + $0x160] sm:$0xff]  ;;  %997 = vst [vmem:[%s6289_s29 + $0x50] sm:$0xff] %v996_v10 }
  0x1f   : > { %999 = vst [vmem:[%s6289_s29 + $0x58] sm:$0xff] %v998_v11  ;;  %v1000_v12 = vld [vmem:[%s6281_s28 + $0x180] sm:$0xff] }
  0x20   : > { %v1002_v13 = vld [vmem:[%s6281_s28 + $0x1a0] sm:$0xff]  ;;  %1001 = vst [vmem:[%s6289_s29 + $0x60] sm:$0xff] %v1000_v12 }
  0x21   : > { %v1004_v14 = vld [vmem:[%s6281_s28 + $0x1c0] sm:$0xff]  ;;  %1003 = vst [vmem:[%s6289_s29 + $0x68] sm:$0xff] %v1002_v13 }
  0x22   : > { %1005 = vst [vmem:[%s6289_s29 + $0x70] sm:$0xff] %v1004_v14  ;;  %v1006_v15 = vld [vmem:[%s6281_s28 + $0x1e0] sm:$0xff] }
  0x23   : > { %v1008_v16 = vld [vmem:[%s6281_s28 + $0x200] sm:$0xff]  ;;  %1007 = vst [vmem:[%s6289_s29 + $0x78] sm:$0xff] %v1006_v15 }
  0x24   : > { %v1010_v17 = vld [vmem:[%s6281_s28 + $0x220] sm:$0xff]  ;;  %1009 = vst [vmem:[%s6289_s29 + $0x80] sm:$0xff] %v1008_v16 }
  0x25   : > { %1011 = vst [vmem:[%s6289_s29 + $0x88] sm:$0xff] %v1010_v17  ;;  %v1012_v18 = vld [vmem:[%s6281_s28 + $0x240] sm:$0xff] }
  0x26   : > { %v1014_v19 = vld [vmem:[%s6281_s28 + $0x260] sm:$0xff]  ;;  %1013 = vst [vmem:[%s6289_s29 + $0x90] sm:$0xff] %v1012_v18 }
  0x27   : > { %v1016_v20 = vld [vmem:[%s6281_s28 + $0x280] sm:$0xff]  ;;  %1015 = vst [vmem:[%s6289_s29 + $0x98] sm:$0xff] %v1014_v19 }
  0x28   : > { %1017 = vst [vmem:[%s6289_s29 + $0xa0] sm:$0xff] %v1016_v20  ;;  %v1018_v21 = vld [vmem:[%s6281_s28 + $0x2a0] sm:$0xff] }
  0x29   : > { %v1020_v22 = vld [vmem:[%s6281_s28 + $0x2c0] sm:$0xff]  ;;  %1019 = vst [vmem:[%s6289_s29 + $0xa8] sm:$0xff] %v1018_v21 }
  0x2a   : > { %v1022_v23 = vld [vmem:[%s6281_s28 + $0x2e0] sm:$0xff]  ;;  %1021 = vst [vmem:[%s6289_s29 + $0xb0] sm:$0xff] %v1020_v22 }
  0x2b   : > { %1023 = vst [vmem:[%s6289_s29 + $0xb8] sm:$0xff] %v1022_v23  ;;  %v1024_v24 = vld [vmem:[%s6281_s28 + $0x300] sm:$0xff] }
  0x2c   : > { %v1026_v25 = vld [vmem:[%s6281_s28 + $0x320] sm:$0xff]  ;;  %1025 = vst [vmem:[%s6289_s29 + $0xc0] sm:$0xff] %v1024_v24 }
  0x2d   : > { %v1028_v26 = vld [vmem:[%s6281_s28 + $0x340] sm:$0xff]  ;;  %1027 = vst [vmem:[%s6289_s29 + $0xc8] sm:$0xff] %v1026_v25 }
  0x2e   : > { %1029 = vst [vmem:[%s6289_s29 + $0xd0] sm:$0xff] %v1028_v26  ;;  %v1030_v27 = vld [vmem:[%s6281_s28 + $0x360] sm:$0xff] }
  0x2f   : > { %v1032_v28 = vld [vmem:[%s6281_s28 + $0x380] sm:$0xff]  ;;  %1031 = vst [vmem:[%s6289_s29 + $0xd8] sm:$0xff] %v1030_v27 }
  0x30   : > { %v1034_v29 = vld [vmem:[%s6281_s28 + $0x3a0] sm:$0xff]  ;;  %1033 = vst [vmem:[%s6289_s29 + $0xe0] sm:$0xff] %v1032_v28 }
  0x31   : > { %1035 = vst [vmem:[%s6289_s29 + $0xe8] sm:$0xff] %v1034_v29  ;;  %v1036_v30 = vld [vmem:[%s6281_s28 + $0x3c0] sm:$0xff] }
  0x32   : > { %v1038_v31 = vld [vmem:[%s6281_s28 + $0x3e0] sm:$0xff]  ;;  %1037 = vst [vmem:[%s6289_s29 + $0xf0] sm:$0xff] %v1036_v30 }
  0x33   : > { %v1040_v32 = vld [vmem:[%s6281_s28 + $0x400] sm:$0xff]  ;;  %1039 = vst [vmem:[%s6289_s29 + $0xf8] sm:$0xff] %v1038_v31 }
  0x34   : > { %1041 = vst [vmem:[%s6289_s29 + $0x100] sm:$0xff] %v1040_v32  ;;  %v1042_v33 = vld [vmem:[%s6281_s28 + $0x420] sm:$0xff] }
  0x35   : > { %v1044_v34 = vld [vmem:[%s6281_s28 + $0x440] sm:$0xff]  ;;  %1043 = vst [vmem:[%s6289_s29 + $0x108] sm:$0xff] %v1042_v33 }
  0x36   : > { %v1046_v35 = vld [vmem:[%s6281_s28 + $0x460] sm:$0xff]  ;;  %1045 = vst [vmem:[%s6289_s29 + $0x110] sm:$0xff] %v1044_v34 }
  0x37   : > { %1047 = vst [vmem:[%s6289_s29 + $0x118] sm:$0xff] %v1046_v35  ;;  %v1048_v36 = vld [vmem:[%s6281_s28 + $0x480] sm:$0xff] }
  0x38   : > { %v1050_v37 = vld [vmem:[%s6281_s28 + $0x4a0] sm:$0xff]  ;;  %1049 = vst [vmem:[%s6289_s29 + $0x120] sm:$0xff] %v1048_v36 }
  0x39   : > { %v1052_v38 = vld [vmem:[%s6281_s28 + $0x4c0] sm:$0xff]  ;;  %1051 = vst [vmem:[%s6289_s29 + $0x128] sm:$0xff] %v1050_v37 }
  0x3a   : > { %1053 = vst [vmem:[%s6289_s29 + $0x130] sm:$0xff] %v1052_v38  ;;  %v1054_v39 = vld [vmem:[%s6281_s28 + $0x4e0] sm:$0xff] }
  0x3b   : > { %v1056_v40 = vld [vmem:[%s6281_s28 + $0x500] sm:$0xff]  ;;  %1055 = vst [vmem:[%s6289_s29 + $0x138] sm:$0xff] %v1054_v39 }
  0x3c   : > { %v1058_v41 = vld [vmem:[%s6281_s28 + $0x520] sm:$0xff]  ;;  %1057 = vst [vmem:[%s6289_s29 + $0x140] sm:$0xff] %v1056_v40 }
  0x3d   : > { %1059 = vst [vmem:[%s6289_s29 + $0x148] sm:$0xff] %v1058_v41  ;;  %v1060_v42 = vld [vmem:[%s6281_s28 + $0x540] sm:$0xff] }
  0x3e   : > { %v1062_v43 = vld [vmem:[%s6281_s28 + $0x560] sm:$0xff]  ;;  %1061 = vst [vmem:[%s6289_s29 + $0x150] sm:$0xff] %v1060_v42 }
  0x3f   : > { %v1064_v44 = vld [vmem:[%s6281_s28 + $0x580] sm:$0xff]  ;;  %1063 = vst [vmem:[%s6289_s29 + $0x158] sm:$0xff] %v1062_v43 }
  0x40   : > { %1065 = vst [vmem:[%s6289_s29 + $0x160] sm:$0xff] %v1064_v44  ;;  %v1066_v45 = vld [vmem:[%s6281_s28 + $0x5a0] sm:$0xff] }
  0x41   : > { %v1068_v46 = vld [vmem:[%s6281_s28 + $0x5c0] sm:$0xff]  ;;  %1067 = vst [vmem:[%s6289_s29 + $0x168] sm:$0xff] %v1066_v45 }
  0x42   : > { %v1070_v47 = vld [vmem:[%s6281_s28 + $0x5e0] sm:$0xff]  ;;  %1069 = vst [vmem:[%s6289_s29 + $0x170] sm:$0xff] %v1068_v46 }
  0x43   : > { %1071 = vst [vmem:[%s6289_s29 + $0x178] sm:$0xff] %v1070_v47  ;;  %v1072_v48 = vld [vmem:[%s6281_s28 + $0x600] sm:$0xff] }
  0x44   : > { %v1074_v49 = vld [vmem:[%s6281_s28 + $0x620] sm:$0xff]  ;;  %1073 = vst [vmem:[%s6289_s29 + $0x180] sm:$0xff] %v1072_v48 }
  0x45   : > { %v1076_v50 = vld [vmem:[%s6281_s28 + $0x640] sm:$0xff]  ;;  %1075 = vst [vmem:[%s6289_s29 + $0x188] sm:$0xff] %v1074_v49 }
  0x46   : > { %1077 = vst [vmem:[%s6289_s29 + $0x190] sm:$0xff] %v1076_v50  ;;  %v1078_v51 = vld [vmem:[%s6281_s28 + $0x660] sm:$0xff] }
  0x47   : > { %v1080_v52 = vld [vmem:[%s6281_s28 + $0x680] sm:$0xff]  ;;  %1079 = vst [vmem:[%s6289_s29 + $0x198] sm:$0xff] %v1078_v51 }
  0x48   : > { %v1082_v53 = vld [vmem:[%s6281_s28 + $0x6a0] sm:$0xff]  ;;  %1081 = vst [vmem:[%s6289_s29 + $0x1a0] sm:$0xff] %v1080_v52 }
  0x49   : > { %1083 = vst [vmem:[%s6289_s29 + $0x1a8] sm:$0xff] %v1082_v53  ;;  %v1084_v54 = vld [vmem:[%s6281_s28 + $0x6c0] sm:$0xff] }
  0x4a   : > { %v1086_v55 = vld [vmem:[%s6281_s28 + $0x6e0] sm:$0xff]  ;;  %1085 = vst [vmem:[%s6289_s29 + $0x1b0] sm:$0xff] %v1084_v54 }
  0x4b   : > { %v1088_v56 = vld [vmem:[%s6281_s28 + $0x700] sm:$0xff]  ;;  %1087 = vst [vmem:[%s6289_s29 + $0x1b8] sm:$0xff] %v1086_v55 }
  0x4c   : > { %1089 = vst [vmem:[%s6289_s29 + $0x1c0] sm:$0xff] %v1088_v56  ;;  %v1090_v57 = vld [vmem:[%s6281_s28 + $0x720] sm:$0xff] }
  0x4d   : > { %v1092_v58 = vld [vmem:[%s6281_s28 + $0x740] sm:$0xff]  ;;  %1091 = vst [vmem:[%s6289_s29 + $0x1c8] sm:$0xff] %v1090_v57 }
  0x4e   : > { %v1094_v59 = vld [vmem:[%s6281_s28 + $0x760] sm:$0xff]  ;;  %1093 = vst [vmem:[%s6289_s29 + $0x1d0] sm:$0xff] %v1092_v58 }
  0x4f   : > { %1095 = vst [vmem:[%s6289_s29 + $0x1d8] sm:$0xff] %v1094_v59  ;;  %v1096_v60 = vld [vmem:[%s6281_s28 + $0x780] sm:$0xff] }
  0x50   : > { %v1098_v61 = vld [vmem:[%s6281_s28 + $0x7a0] sm:$0xff]  ;;  %1097 = vst [vmem:[%s6289_s29 + $0x1e0] sm:$0xff] %v1096_v60 }
  0x51   : > { %v1100_v62 = vld [vmem:[%s6281_s28 + $0x7c0] sm:$0xff]  ;;  %1099 = vst [vmem:[%s6289_s29 + $0x1e8] sm:$0xff] %v1098_v61 }
  0x52   : > { %1101 = vst [vmem:[%s6289_s29 + $0x1f0] sm:$0xff] %v1100_v62  ;;  %v1102_v63 = vld [vmem:[%s6281_s28 + $0x7e0] sm:$0xff] }
  0x53   : > { %v1104_v0 = vld [vmem:[%s6281_s28 + $0x800] sm:$0xff]  ;;  %1103 = vst [vmem:[%s6289_s29 + $0x1f8] sm:$0xff] %v1102_v63 }
  0x54   : > { %v1106_v1 = vld [vmem:[%s6281_s28 + $0x820] sm:$0xff]  ;;  %1105 = vst [vmem:[%s6289_s29 + $0x200] sm:$0xff] %v1104_v0 }
  0x55   : > { %1107 = vst [vmem:[%s6289_s29 + $0x208] sm:$0xff] %v1106_v1  ;;  %v1108_v2 = vld [vmem:[%s6281_s28 + $0x840] sm:$0xff] }
  0x56   : > { %v1110_v3 = vld [vmem:[%s6281_s28 + $0x860] sm:$0xff]  ;;  %1109 = vst [vmem:[%s6289_s29 + $0x210] sm:$0xff] %v1108_v2 }
  0x57   : > { %v1112_v4 = vld [vmem:[%s6281_s28 + $0x880] sm:$0xff]  ;;  %1111 = vst [vmem:[%s6289_s29 + $0x218] sm:$0xff] %v1110_v3 }
  0x58   : > { %1113 = vst [vmem:[%s6289_s29 + $0x220] sm:$0xff] %v1112_v4  ;;  %v1114_v5 = vld [vmem:[%s6281_s28 + $0x8a0] sm:$0xff] }
  0x59   : > { %v1116_v6 = vld [vmem:[%s6281_s28 + $0x8c0] sm:$0xff]  ;;  %1115 = vst [vmem:[%s6289_s29 + $0x228] sm:$0xff] %v1114_v5 }
  0x5a   : > { %v1118_v7 = vld [vmem:[%s6281_s28 + $0x8e0] sm:$0xff]  ;;  %1117 = vst [vmem:[%s6289_s29 + $0x230] sm:$0xff] %v1116_v6 }
  0x5b   : > { %1119 = vst [vmem:[%s6289_s29 + $0x238] sm:$0xff] %v1118_v7  ;;  %v1120_v8 = vld [vmem:[%s6281_s28 + $0x900] sm:$0xff] }
  0x5c   : > { %v1122_v9 = vld [vmem:[%s6281_s28 + $0x920] sm:$0xff]  ;;  %1121 = vst [vmem:[%s6289_s29 + $0x240] sm:$0xff] %v1120_v8 }
  0x5d   : > { %v1124_v10 = vld [vmem:[%s6281_s28 + $0x940] sm:$0xff]  ;;  %1123 = vst [vmem:[%s6289_s29 + $0x248] sm:$0xff] %v1122_v9 }
  0x5e   : > { %1125 = vst [vmem:[%s6289_s29 + $0x250] sm:$0xff] %v1124_v10  ;;  %v1126_v11 = vld [vmem:[%s6281_s28 + $0x960] sm:$0xff] }
  0x5f   : > { %v1128_v12 = vld [vmem:[%s6281_s28 + $0x980] sm:$0xff]  ;;  %1127 = vst [vmem:[%s6289_s29 + $0x258] sm:$0xff] %v1126_v11 }
  0x60   : > { %v1130_v13 = vld [vmem:[%s6281_s28 + $0x9a0] sm:$0xff]  ;;  %1129 = vst [vmem:[%s6289_s29 + $0x260] sm:$0xff] %v1128_v12 }
  0x61   : > { %1131 = vst [vmem:[%s6289_s29 + $0x268] sm:$0xff] %v1130_v13  ;;  %v1132_v14 = vld [vmem:[%s6281_s28 + $0x9c0] sm:$0xff] }
  0x62   : > { %v1134_v15 = vld [vmem:[%s6281_s28 + $0x9e0] sm:$0xff]  ;;  %1133 = vst [vmem:[%s6289_s29 + $0x270] sm:$0xff] %v1132_v14 }
  0x63   : > { %v1136_v16 = vld [vmem:[%s6281_s28 + $0xa00] sm:$0xff]  ;;  %1135 = vst [vmem:[%s6289_s29 + $0x278] sm:$0xff] %v1134_v15 }
  0x64   : > { %1137 = vst [vmem:[%s6289_s29 + $0x280] sm:$0xff] %v1136_v16  ;;  %v1138_v17 = vld [vmem:[%s6281_s28 + $0xa20] sm:$0xff] }
  0x65   : > { %v1140_v18 = vld [vmem:[%s6281_s28 + $0xa40] sm:$0xff]  ;;  %1139 = vst [vmem:[%s6289_s29 + $0x288] sm:$0xff] %v1138_v17 }
  0x66   : > { %v1142_v19 = vld [vmem:[%s6281_s28 + $0xa60] sm:$0xff]  ;;  %1141 = vst [vmem:[%s6289_s29 + $0x290] sm:$0xff] %v1140_v18 }
  0x67   : > { %1143 = vst [vmem:[%s6289_s29 + $0x298] sm:$0xff] %v1142_v19  ;;  %v1144_v20 = vld [vmem:[%s6281_s28 + $0xa80] sm:$0xff] }
  0x68   : > { %v1146_v21 = vld [vmem:[%s6281_s28 + $0xaa0] sm:$0xff]  ;;  %1145 = vst [vmem:[%s6289_s29 + $0x2a0] sm:$0xff] %v1144_v20 }
  0x69   : > { %v1148_v22 = vld [vmem:[%s6281_s28 + $0xac0] sm:$0xff]  ;;  %1147 = vst [vmem:[%s6289_s29 + $0x2a8] sm:$0xff] %v1146_v21 }
  0x6a   : > { %1149 = vst [vmem:[%s6289_s29 + $0x2b0] sm:$0xff] %v1148_v22  ;;  %v1150_v23 = vld [vmem:[%s6281_s28 + $0xae0] sm:$0xff] }
  0x6b   : > { %v1152_v24 = vld [vmem:[%s6281_s28 + $0xb00] sm:$0xff]  ;;  %1151 = vst [vmem:[%s6289_s29 + $0x2b8] sm:$0xff] %v1150_v23 }
  0x6c   : > { %v1154_v25 = vld [vmem:[%s6281_s28 + $0xb20] sm:$0xff]  ;;  %1153 = vst [vmem:[%s6289_s29 + $0x2c0] sm:$0xff] %v1152_v24 }
  0x6d   : > { %1155 = vst [vmem:[%s6289_s29 + $0x2c8] sm:$0xff] %v1154_v25  ;;  %v1156_v26 = vld [vmem:[%s6281_s28 + $0xb40] sm:$0xff] }
  0x6e   : > { %v1158_v27 = vld [vmem:[%s6281_s28 + $0xb60] sm:$0xff]  ;;  %1157 = vst [vmem:[%s6289_s29 + $0x2d0] sm:$0xff] %v1156_v26 }
  0x6f   : > { %v1160_v28 = vld [vmem:[%s6281_s28 + $0xb80] sm:$0xff]  ;;  %1159 = vst [vmem:[%s6289_s29 + $0x2d8] sm:$0xff] %v1158_v27 }
  0x70   : > { %1161 = vst [vmem:[%s6289_s29 + $0x2e0] sm:$0xff] %v1160_v28  ;;  %v1162_v29 = vld [vmem:[%s6281_s28 + $0xba0] sm:$0xff] }
  0x71   : > { %v1164_v30 = vld [vmem:[%s6281_s28 + $0xbc0] sm:$0xff]  ;;  %1163 = vst [vmem:[%s6289_s29 + $0x2e8] sm:$0xff] %v1162_v29 }
  0x72   : > { %v1166_v31 = vld [vmem:[%s6281_s28 + $0xbe0] sm:$0xff]  ;;  %1165 = vst [vmem:[%s6289_s29 + $0x2f0] sm:$0xff] %v1164_v30 }
  0x73   : > { %1167 = vst [vmem:[%s6289_s29 + $0x2f8] sm:$0xff] %v1166_v31  ;;  %v1168_v32 = vld [vmem:[%s6281_s28 + $0xc00] sm:$0xff] }
  0x74   : > { %v1170_v33 = vld [vmem:[%s6281_s28 + $0xc20] sm:$0xff]  ;;  %1169 = vst [vmem:[%s6289_s29 + $0x300] sm:$0xff] %v1168_v32 }
  0x75   : > { %v1172_v34 = vld [vmem:[%s6281_s28 + $0xc40] sm:$0xff]  ;;  %1171 = vst [vmem:[%s6289_s29 + $0x308] sm:$0xff] %v1170_v33 }
  0x76   : > { %1173 = vst [vmem:[%s6289_s29 + $0x310] sm:$0xff] %v1172_v34  ;;  %v1174_v35 = vld [vmem:[%s6281_s28 + $0xc60] sm:$0xff] }
  0x77   : > { %v1176_v36 = vld [vmem:[%s6281_s28 + $0xc80] sm:$0xff]  ;;  %1175 = vst [vmem:[%s6289_s29 + $0x318] sm:$0xff] %v1174_v35 }
  0x78   : > { %v1178_v37 = vld [vmem:[%s6281_s28 + $0xca0] sm:$0xff]  ;;  %1177 = vst [vmem:[%s6289_s29 + $0x320] sm:$0xff] %v1176_v36 }
  0x79   : > { %1179 = vst [vmem:[%s6289_s29 + $0x328] sm:$0xff] %v1178_v37  ;;  %v1180_v38 = vld [vmem:[%s6281_s28 + $0xcc0] sm:$0xff] }
  0x7a   : > { %v1182_v39 = vld [vmem:[%s6281_s28 + $0xce0] sm:$0xff]  ;;  %1181 = vst [vmem:[%s6289_s29 + $0x330] sm:$0xff] %v1180_v38 }
  0x7b   : > { %v1184_v40 = vld [vmem:[%s6281_s28 + $0xd00] sm:$0xff]  ;;  %1183 = vst [vmem:[%s6289_s29 + $0x338] sm:$0xff] %v1182_v39 }
  0x7c   : > { %1185 = vst [vmem:[%s6289_s29 + $0x340] sm:$0xff] %v1184_v40  ;;  %v1186_v41 = vld [vmem:[%s6281_s28 + $0xd20] sm:$0xff] }
  0x7d   : > { %v1188_v42 = vld [vmem:[%s6281_s28 + $0xd40] sm:$0xff]  ;;  %1187 = vst [vmem:[%s6289_s29 + $0x348] sm:$0xff] %v1186_v41 }
  0x7e   : > { %v1190_v43 = vld [vmem:[%s6281_s28 + $0xd60] sm:$0xff]  ;;  %1189 = vst [vmem:[%s6289_s29 + $0x350] sm:$0xff] %v1188_v42 }
  0x7f   : > { %1191 = vst [vmem:[%s6289_s29 + $0x358] sm:$0xff] %v1190_v43  ;;  %v1192_v44 = vld [vmem:[%s6281_s28 + $0xd80] sm:$0xff] }
  0x80   : > { %v1194_v45 = vld [vmem:[%s6281_s28 + $0xda0] sm:$0xff]  ;;  %1193 = vst [vmem:[%s6289_s29 + $0x360] sm:$0xff] %v1192_v44 }
  0x81   : > { %v1196_v46 = vld [vmem:[%s6281_s28 + $0xdc0] sm:$0xff]  ;;  %1195 = vst [vmem:[%s6289_s29 + $0x368] sm:$0xff] %v1194_v45 }
  0x82   : > { %1197 = vst [vmem:[%s6289_s29 + $0x370] sm:$0xff] %v1196_v46  ;;  %v1198_v47 = vld [vmem:[%s6281_s28 + $0xde0] sm:$0xff] }
  0x83   : > { %v1200_v48 = vld [vmem:[%s6281_s28 + $0xe00] sm:$0xff]  ;;  %1199 = vst [vmem:[%s6289_s29 + $0x378] sm:$0xff] %v1198_v47 }
  0x84   : > { %v1202_v49 = vld [vmem:[%s6281_s28 + $0xe20] sm:$0xff]  ;;  %1201 = vst [vmem:[%s6289_s29 + $0x380] sm:$0xff] %v1200_v48 }
  0x85   : > { %1203 = vst [vmem:[%s6289_s29 + $0x388] sm:$0xff] %v1202_v49  ;;  %v1204_v50 = vld [vmem:[%s6281_s28 + $0xe40] sm:$0xff] }
  0x86   : > { %v1206_v51 = vld [vmem:[%s6281_s28 + $0xe60] sm:$0xff]  ;;  %1205 = vst [vmem:[%s6289_s29 + $0x390] sm:$0xff] %v1204_v50 }
  0x87   : > { %v1208_v52 = vld [vmem:[%s6281_s28 + $0xe80] sm:$0xff]  ;;  %1207 = vst [vmem:[%s6289_s29 + $0x398] sm:$0xff] %v1206_v51 }
  0x88   : > { %1209 = vst [vmem:[%s6289_s29 + $0x3a0] sm:$0xff] %v1208_v52  ;;  %v1210_v53 = vld [vmem:[%s6281_s28 + $0xea0] sm:$0xff] }
  0x89   : > { %v1212_v54 = vld [vmem:[%s6281_s28 + $0xec0] sm:$0xff]  ;;  %1211 = vst [vmem:[%s6289_s29 + $0x3a8] sm:$0xff] %v1210_v53 }
  0x8a   : > { %v1214_v55 = vld [vmem:[%s6281_s28 + $0xee0] sm:$0xff]  ;;  %1213 = vst [vmem:[%s6289_s29 + $0x3b0] sm:$0xff] %v1212_v54 }
  0x8b   : > { %1215 = vst [vmem:[%s6289_s29 + $0x3b8] sm:$0xff] %v1214_v55  ;;  %v1216_v56 = vld [vmem:[%s6281_s28 + $0xf00] sm:$0xff] }
  0x8c   : > { %v1218_v57 = vld [vmem:[%s6281_s28 + $0xf20] sm:$0xff]  ;;  %1217 = vst [vmem:[%s6289_s29 + $0x3c0] sm:$0xff] %v1216_v56 }
  0x8d   : > { %v1220_v58 = vld [vmem:[%s6281_s28 + $0xf40] sm:$0xff]  ;;  %1219 = vst [vmem:[%s6289_s29 + $0x3c8] sm:$0xff] %v1218_v57 }
  0x8e   : > { %1221 = vst [vmem:[%s6289_s29 + $0x3d0] sm:$0xff] %v1220_v58  ;;  %v1222_v59 = vld [vmem:[%s6281_s28 + $0xf60] sm:$0xff] }
  0x8f   : > { %v1224_v60 = vld [vmem:[%s6281_s28 + $0xf80] sm:$0xff]  ;;  %1223 = vst [vmem:[%s6289_s29 + $0x3d8] sm:$0xff] %v1222_v59 }
  0x90   : > { %v1226_v61 = vld [vmem:[%s6281_s28 + $0xfa0] sm:$0xff]  ;;  %1225 = vst [vmem:[%s6289_s29 + $0x3e0] sm:$0xff] %v1224_v60 }
  0x91   : > { %1227 = vst [vmem:[%s6289_s29 + $0x3e8] sm:$0xff] %v1226_v61  ;;  %v1228_v62 = vld [vmem:[%s6281_s28 + $0xfc0] sm:$0xff] }
  0x92   : > { %v1230_v63 = vld [vmem:[%s6281_s28 + $0xfe0] sm:$0xff]  ;;  %1229 = vst [vmem:[%s6289_s29 + $0x3f0] sm:$0xff] %v1228_v62 }
  0x93   : > { %v1232_v0 = vld [vmem:[%s6281_s28 + $0x1000] sm:$0xff]  ;;  %1231 = vst [vmem:[%s6289_s29 + $0x3f8] sm:$0xff] %v1230_v63 }
  0x94   : > { %1233 = vst [vmem:[%s6289_s29 + $0x400] sm:$0xff] %v1232_v0  ;;  %v1234_v1 = vld [vmem:[%s6281_s28 + $0x1020] sm:$0xff] }
  0x95   : > { %v1236_v2 = vld [vmem:[%s6281_s28 + $0x1040] sm:$0xff]  ;;  %1235 = vst [vmem:[%s6289_s29 + $0x408] sm:$0xff] %v1234_v1 }
  0x96   : > { %v1238_v3 = vld [vmem:[%s6281_s28 + $0x1060] sm:$0xff]  ;;  %1237 = vst [vmem:[%s6289_s29 + $0x410] sm:$0xff] %v1236_v2 }
  0x97   : > { %1239 = vst [vmem:[%s6289_s29 + $0x418] sm:$0xff] %v1238_v3  ;;  %v1240_v4 = vld [vmem:[%s6281_s28 + $0x1080] sm:$0xff] }
  0x98   : > { %v1242_v5 = vld [vmem:[%s6281_s28 + $0x10a0] sm:$0xff]  ;;  %1241 = vst [vmem:[%s6289_s29 + $0x420] sm:$0xff] %v1240_v4 }
  0x99   : > { %v1244_v6 = vld [vmem:[%s6281_s28 + $0x10c0] sm:$0xff]  ;;  %1243 = vst [vmem:[%s6289_s29 + $0x428] sm:$0xff] %v1242_v5 }
  0x9a   : > { %1245 = vst [vmem:[%s6289_s29 + $0x430] sm:$0xff] %v1244_v6  ;;  %v1246_v7 = vld [vmem:[%s6281_s28 + $0x10e0] sm:$0xff] }
  0x9b   : > { %v1248_v8 = vld [vmem:[%s6281_s28 + $0x1100] sm:$0xff]  ;;  %1247 = vst [vmem:[%s6289_s29 + $0x438] sm:$0xff] %v1246_v7 }
  0x9c   : > { %v1250_v9 = vld [vmem:[%s6281_s28 + $0x1120] sm:$0xff]  ;;  %1249 = vst [vmem:[%s6289_s29 + $0x440] sm:$0xff] %v1248_v8 }
  0x9d   : > { %1251 = vst [vmem:[%s6289_s29 + $0x448] sm:$0xff] %v1250_v9  ;;  %v1252_v10 = vld [vmem:[%s6281_s28 + $0x1140] sm:$0xff] }
  0x9e   : > { %v1254_v11 = vld [vmem:[%s6281_s28 + $0x1160] sm:$0xff]  ;;  %1253 = vst [vmem:[%s6289_s29 + $0x450] sm:$0xff] %v1252_v10 }
  0x9f   : > { %v1256_v12 = vld [vmem:[%s6281_s28 + $0x1180] sm:$0xff]  ;;  %1255 = vst [vmem:[%s6289_s29 + $0x458] sm:$0xff] %v1254_v11 }
  0xa0   : > { %1257 = vst [vmem:[%s6289_s29 + $0x460] sm:$0xff] %v1256_v12  ;;  %v1258_v13 = vld [vmem:[%s6281_s28 + $0x11a0] sm:$0xff] }
  0xa1   : > { %v1260_v14 = vld [vmem:[%s6281_s28 + $0x11c0] sm:$0xff]  ;;  %1259 = vst [vmem:[%s6289_s29 + $0x468] sm:$0xff] %v1258_v13 }
  0xa2   : > { %v1262_v15 = vld [vmem:[%s6281_s28 + $0x11e0] sm:$0xff]  ;;  %1261 = vst [vmem:[%s6289_s29 + $0x470] sm:$0xff] %v1260_v14 }
  0xa3   : > { %1263 = vst [vmem:[%s6289_s29 + $0x478] sm:$0xff] %v1262_v15  ;;  %v1264_v16 = vld [vmem:[%s6281_s28 + $0x1200] sm:$0xff] }
  0xa4   : > { %v1266_v17 = vld [vmem:[%s6281_s28 + $0x1220] sm:$0xff]  ;;  %1265 = vst [vmem:[%s6289_s29 + $0x480] sm:$0xff] %v1264_v16 }
  0xa5   : > { %v1268_v18 = vld [vmem:[%s6281_s28 + $0x1240] sm:$0xff]  ;;  %1267 = vst [vmem:[%s6289_s29 + $0x488] sm:$0xff] %v1266_v17 }
  0xa6   : > { %1269 = vst [vmem:[%s6289_s29 + $0x490] sm:$0xff] %v1268_v18  ;;  %v1270_v19 = vld [vmem:[%s6281_s28 + $0x1260] sm:$0xff] }
  0xa7   : > { %v1272_v20 = vld [vmem:[%s6281_s28 + $0x1280] sm:$0xff]  ;;  %1271 = vst [vmem:[%s6289_s29 + $0x498] sm:$0xff] %v1270_v19 }
  0xa8   : > { %v1274_v21 = vld [vmem:[%s6281_s28 + $0x12a0] sm:$0xff]  ;;  %1273 = vst [vmem:[%s6289_s29 + $0x4a0] sm:$0xff] %v1272_v20 }
  0xa9   : > { %1275 = vst [vmem:[%s6289_s29 + $0x4a8] sm:$0xff] %v1274_v21  ;;  %v1276_v22 = vld [vmem:[%s6281_s28 + $0x12c0] sm:$0xff] }
  0xaa   : > { %v1278_v23 = vld [vmem:[%s6281_s28 + $0x12e0] sm:$0xff]  ;;  %1277 = vst [vmem:[%s6289_s29 + $0x4b0] sm:$0xff] %v1276_v22 }
  0xab   : > { %v1280_v24 = vld [vmem:[%s6281_s28 + $0x1300] sm:$0xff]  ;;  %1279 = vst [vmem:[%s6289_s29 + $0x4b8] sm:$0xff] %v1278_v23 }
  0xac   : > { %1281 = vst [vmem:[%s6289_s29 + $0x4c0] sm:$0xff] %v1280_v24  ;;  %v1282_v25 = vld [vmem:[%s6281_s28 + $0x1320] sm:$0xff] }
  0xad   : > { %v1284_v26 = vld [vmem:[%s6281_s28 + $0x1340] sm:$0xff]  ;;  %1283 = vst [vmem:[%s6289_s29 + $0x4c8] sm:$0xff] %v1282_v25 }
  0xae   : > { %v1286_v27 = vld [vmem:[%s6281_s28 + $0x1360] sm:$0xff]  ;;  %1285 = vst [vmem:[%s6289_s29 + $0x4d0] sm:$0xff] %v1284_v26 }
  0xaf   : > { %1287 = vst [vmem:[%s6289_s29 + $0x4d8] sm:$0xff] %v1286_v27  ;;  %v1288_v28 = vld [vmem:[%s6281_s28 + $0x1380] sm:$0xff] }
  0xb0   : > { %v1290_v29 = vld [vmem:[%s6281_s28 + $0x13a0] sm:$0xff]  ;;  %1289 = vst [vmem:[%s6289_s29 + $0x4e0] sm:$0xff] %v1288_v28 }
  0xb1   : > { %v1292_v30 = vld [vmem:[%s6281_s28 + $0x13c0] sm:$0xff]  ;;  %1291 = vst [vmem:[%s6289_s29 + $0x4e8] sm:$0xff] %v1290_v29 }
  0xb2   : > { %1293 = vst [vmem:[%s6289_s29 + $0x4f0] sm:$0xff] %v1292_v30  ;;  %v1294_v31 = vld [vmem:[%s6281_s28 + $0x13e0] sm:$0xff] }
  0xb3   : > { %v1296_v32 = vld [vmem:[%s6281_s28 + $0x1400] sm:$0xff]  ;;  %1295 = vst [vmem:[%s6289_s29 + $0x4f8] sm:$0xff] %v1294_v31 }
  0xb4   : > { %v1298_v33 = vld [vmem:[%s6281_s28 + $0x1420] sm:$0xff]  ;;  %1297 = vst [vmem:[%s6289_s29 + $0x500] sm:$0xff] %v1296_v32 }
  0xb5   : > { %1299 = vst [vmem:[%s6289_s29 + $0x508] sm:$0xff] %v1298_v33  ;;  %v1300_v34 = vld [vmem:[%s6281_s28 + $0x1440] sm:$0xff] }
  0xb6   : > { %v1302_v35 = vld [vmem:[%s6281_s28 + $0x1460] sm:$0xff]  ;;  %1301 = vst [vmem:[%s6289_s29 + $0x510] sm:$0xff] %v1300_v34 }
  0xb7   : > { %v1304_v36 = vld [vmem:[%s6281_s28 + $0x1480] sm:$0xff]  ;;  %1303 = vst [vmem:[%s6289_s29 + $0x518] sm:$0xff] %v1302_v35 }
  0xb8   : > { %1305 = vst [vmem:[%s6289_s29 + $0x520] sm:$0xff] %v1304_v36  ;;  %v1306_v37 = vld [vmem:[%s6281_s28 + $0x14a0] sm:$0xff] }
  0xb9   : > { %v1308_v38 = vld [vmem:[%s6281_s28 + $0x14c0] sm:$0xff]  ;;  %1307 = vst [vmem:[%s6289_s29 + $0x528] sm:$0xff] %v1306_v37 }
  0xba   : > { %v1310_v39 = vld [vmem:[%s6281_s28 + $0x14e0] sm:$0xff]  ;;  %1309 = vst [vmem:[%s6289_s29 + $0x530] sm:$0xff] %v1308_v38 }
  0xbb   : > { %1311 = vst [vmem:[%s6289_s29 + $0x538] sm:$0xff] %v1310_v39  ;;  %v1312_v40 = vld [vmem:[%s6281_s28 + $0x1500] sm:$0xff] }
  0xbc   : > { %v1314_v41 = vld [vmem:[%s6281_s28 + $0x1520] sm:$0xff]  ;;  %1313 = vst [vmem:[%s6289_s29 + $0x540] sm:$0xff] %v1312_v40 }
  0xbd   : > { %v1316_v42 = vld [vmem:[%s6281_s28 + $0x1540] sm:$0xff]  ;;  %1315 = vst [vmem:[%s6289_s29 + $0x548] sm:$0xff] %v1314_v41 }
  0xbe   : > { %1317 = vst [vmem:[%s6289_s29 + $0x550] sm:$0xff] %v1316_v42  ;;  %v1318_v43 = vld [vmem:[%s6281_s28 + $0x1560] sm:$0xff] }
  0xbf   : > { %v1320_v44 = vld [vmem:[%s6281_s28 + $0x1580] sm:$0xff]  ;;  %1319 = vst [vmem:[%s6289_s29 + $0x558] sm:$0xff] %v1318_v43 }
  0xc0   : > { %v1322_v45 = vld [vmem:[%s6281_s28 + $0x15a0] sm:$0xff]  ;;  %1321 = vst [vmem:[%s6289_s29 + $0x560] sm:$0xff] %v1320_v44 }
  0xc1   : > { %1323 = vst [vmem:[%s6289_s29 + $0x568] sm:$0xff] %v1322_v45  ;;  %v1324_v46 = vld [vmem:[%s6281_s28 + $0x15c0] sm:$0xff] }
  0xc2   : > { %v1326_v47 = vld [vmem:[%s6281_s28 + $0x15e0] sm:$0xff]  ;;  %1325 = vst [vmem:[%s6289_s29 + $0x570] sm:$0xff] %v1324_v46 }
  0xc3   : > { %v1328_v48 = vld [vmem:[%s6281_s28 + $0x1600] sm:$0xff]  ;;  %1327 = vst [vmem:[%s6289_s29 + $0x578] sm:$0xff] %v1326_v47 }
  0xc4   : > { %1329 = vst [vmem:[%s6289_s29 + $0x580] sm:$0xff] %v1328_v48  ;;  %v1330_v49 = vld [vmem:[%s6281_s28 + $0x1620] sm:$0xff] }
  0xc5   : > { %v1332_v50 = vld [vmem:[%s6281_s28 + $0x1640] sm:$0xff]  ;;  %1331 = vst [vmem:[%s6289_s29 + $0x588] sm:$0xff] %v1330_v49 }
  0xc6   : > { %v1334_v51 = vld [vmem:[%s6281_s28 + $0x1660] sm:$0xff]  ;;  %1333 = vst [vmem:[%s6289_s29 + $0x590] sm:$0xff] %v1332_v50 }
  0xc7   : > { %1335 = vst [vmem:[%s6289_s29 + $0x598] sm:$0xff] %v1334_v51  ;;  %v1336_v52 = vld [vmem:[%s6281_s28 + $0x1680] sm:$0xff] }
  0xc8   : > { %v1338_v53 = vld [vmem:[%s6281_s28 + $0x16a0] sm:$0xff]  ;;  %1337 = vst [vmem:[%s6289_s29 + $0x5a0] sm:$0xff] %v1336_v52 }
  0xc9   : > { %v1340_v54 = vld [vmem:[%s6281_s28 + $0x16c0] sm:$0xff]  ;;  %1339 = vst [vmem:[%s6289_s29 + $0x5a8] sm:$0xff] %v1338_v53 }
  0xca   : > { %1341 = vst [vmem:[%s6289_s29 + $0x5b0] sm:$0xff] %v1340_v54  ;;  %v1342_v55 = vld [vmem:[%s6281_s28 + $0x16e0] sm:$0xff] }
  0xcb   : > { %v1344_v56 = vld [vmem:[%s6281_s28 + $0x1700] sm:$0xff]  ;;  %1343 = vst [vmem:[%s6289_s29 + $0x5b8] sm:$0xff] %v1342_v55 }
  0xcc   : > { %v1346_v57 = vld [vmem:[%s6281_s28 + $0x1720] sm:$0xff]  ;;  %1345 = vst [vmem:[%s6289_s29 + $0x5c0] sm:$0xff] %v1344_v56 }
  0xcd   : > { %1347 = vst [vmem:[%s6289_s29 + $0x5c8] sm:$0xff] %v1346_v57  ;;  %v1348_v58 = vld [vmem:[%s6281_s28 + $0x1740] sm:$0xff] }
  0xce   : > { %v1350_v59 = vld [vmem:[%s6281_s28 + $0x1760] sm:$0xff]  ;;  %1349 = vst [vmem:[%s6289_s29 + $0x5d0] sm:$0xff] %v1348_v58 }
  0xcf   : > { %v1352_v60 = vld [vmem:[%s6281_s28 + $0x1780] sm:$0xff]  ;;  %1351 = vst [vmem:[%s6289_s29 + $0x5d8] sm:$0xff] %v1350_v59 }
  0xd0   : > { %1353 = vst [vmem:[%s6289_s29 + $0x5e0] sm:$0xff] %v1352_v60  ;;  %v1354_v61 = vld [vmem:[%s6281_s28 + $0x17a0] sm:$0xff] }
  0xd1   : > { %v1356_v62 = vld [vmem:[%s6281_s28 + $0x17c0] sm:$0xff]  ;;  %1355 = vst [vmem:[%s6289_s29 + $0x5e8] sm:$0xff] %v1354_v61 }
  0xd2   : > { %v1358_v63 = vld [vmem:[%s6281_s28 + $0x17e0] sm:$0xff]  ;;  %1357 = vst [vmem:[%s6289_s29 + $0x5f0] sm:$0xff] %v1356_v62 }
  0xd3   : > { %1359 = vst [vmem:[%s6289_s29 + $0x5f8] sm:$0xff] %v1358_v63  ;;  %v1360_v0 = vld [vmem:[%s6281_s28 + $0x1800] sm:$0xff] }
  0xd4   : > { %v1362_v1 = vld [vmem:[%s6281_s28 + $0x1820] sm:$0xff]  ;;  %1361 = vst [vmem:[%s6289_s29 + $0x600] sm:$0xff] %v1360_v0 }
  0xd5   : > { %v1364_v2 = vld [vmem:[%s6281_s28 + $0x1840] sm:$0xff]  ;;  %1363 = vst [vmem:[%s6289_s29 + $0x608] sm:$0xff] %v1362_v1 }
  0xd6   : > { %1365 = vst [vmem:[%s6289_s29 + $0x610] sm:$0xff] %v1364_v2  ;;  %v1366_v3 = vld [vmem:[%s6281_s28 + $0x1860] sm:$0xff] }
  0xd7   : > { %v1368_v4 = vld [vmem:[%s6281_s28 + $0x1880] sm:$0xff]  ;;  %1367 = vst [vmem:[%s6289_s29 + $0x618] sm:$0xff] %v1366_v3 }
  0xd8   : > { %v1370_v5 = vld [vmem:[%s6281_s28 + $0x18a0] sm:$0xff]  ;;  %1369 = vst [vmem:[%s6289_s29 + $0x620] sm:$0xff] %v1368_v4 }
  0xd9   : > { %1371 = vst [vmem:[%s6289_s29 + $0x628] sm:$0xff] %v1370_v5  ;;  %v1372_v6 = vld [vmem:[%s6281_s28 + $0x18c0] sm:$0xff] }
  0xda   : > { %v1374_v7 = vld [vmem:[%s6281_s28 + $0x18e0] sm:$0xff]  ;;  %1373 = vst [vmem:[%s6289_s29 + $0x630] sm:$0xff] %v1372_v6 }
  0xdb   : > { %v1376_v8 = vld [vmem:[%s6281_s28 + $0x1900] sm:$0xff]  ;;  %1375 = vst [vmem:[%s6289_s29 + $0x638] sm:$0xff] %v1374_v7 }
  0xdc   : > { %1377 = vst [vmem:[%s6289_s29 + $0x640] sm:$0xff] %v1376_v8  ;;  %v1378_v9 = vld [vmem:[%s6281_s28 + $0x1920] sm:$0xff] }
  0xdd   : > { %v1380_v10 = vld [vmem:[%s6281_s28 + $0x1940] sm:$0xff]  ;;  %1379 = vst [vmem:[%s6289_s29 + $0x648] sm:$0xff] %v1378_v9 }
  0xde   : > { %v1382_v11 = vld [vmem:[%s6281_s28 + $0x1960] sm:$0xff]  ;;  %1381 = vst [vmem:[%s6289_s29 + $0x650] sm:$0xff] %v1380_v10 }
  0xdf   : > { %1383 = vst [vmem:[%s6289_s29 + $0x658] sm:$0xff] %v1382_v11  ;;  %v1384_v12 = vld [vmem:[%s6281_s28 + $0x1980] sm:$0xff] }
  0xe0   : > { %v1386_v13 = vld [vmem:[%s6281_s28 + $0x19a0] sm:$0xff]  ;;  %1385 = vst [vmem:[%s6289_s29 + $0x660] sm:$0xff] %v1384_v12 }
  0xe1   : > { %v1388_v14 = vld [vmem:[%s6281_s28 + $0x19c0] sm:$0xff]  ;;  %1387 = vst [vmem:[%s6289_s29 + $0x668] sm:$0xff] %v1386_v13 }
  0xe2   : > { %1389 = vst [vmem:[%s6289_s29 + $0x670] sm:$0xff] %v1388_v14  ;;  %v1390_v15 = vld [vmem:[%s6281_s28 + $0x19e0] sm:$0xff] }
  0xe3   : > { %v1392_v16 = vld [vmem:[%s6281_s28 + $0x1a00] sm:$0xff]  ;;  %1391 = vst [vmem:[%s6289_s29 + $0x678] sm:$0xff] %v1390_v15 }
  0xe4   : > { %v1394_v17 = vld [vmem:[%s6281_s28 + $0x1a20] sm:$0xff]  ;;  %1393 = vst [vmem:[%s6289_s29 + $0x680] sm:$0xff] %v1392_v16 }
  0xe5   : > { %1395 = vst [vmem:[%s6289_s29 + $0x688] sm:$0xff] %v1394_v17  ;;  %v1396_v18 = vld [vmem:[%s6281_s28 + $0x1a40] sm:$0xff] }
  0xe6   : > { %v1398_v19 = vld [vmem:[%s6281_s28 + $0x1a60] sm:$0xff]  ;;  %1397 = vst [vmem:[%s6289_s29 + $0x690] sm:$0xff] %v1396_v18 }
  0xe7   : > { %v1400_v20 = vld [vmem:[%s6281_s28 + $0x1a80] sm:$0xff]  ;;  %1399 = vst [vmem:[%s6289_s29 + $0x698] sm:$0xff] %v1398_v19 }
  0xe8   : > { %1401 = vst [vmem:[%s6289_s29 + $0x6a0] sm:$0xff] %v1400_v20  ;;  %v1402_v21 = vld [vmem:[%s6281_s28 + $0x1aa0] sm:$0xff] }
  0xe9   : > { %v1404_v22 = vld [vmem:[%s6281_s28 + $0x1ac0] sm:$0xff]  ;;  %1403 = vst [vmem:[%s6289_s29 + $0x6a8] sm:$0xff] %v1402_v21 }
  0xea   : > { %v1406_v23 = vld [vmem:[%s6281_s28 + $0x1ae0] sm:$0xff]  ;;  %1405 = vst [vmem:[%s6289_s29 + $0x6b0] sm:$0xff] %v1404_v22 }
  0xeb   : > { %1407 = vst [vmem:[%s6289_s29 + $0x6b8] sm:$0xff] %v1406_v23  ;;  %v1408_v24 = vld [vmem:[%s6281_s28 + $0x1b00] sm:$0xff] }
  0xec   : > { %v1410_v25 = vld [vmem:[%s6281_s28 + $0x1b20] sm:$0xff]  ;;  %1409 = vst [vmem:[%s6289_s29 + $0x6c0] sm:$0xff] %v1408_v24 }
  0xed   : > { %v1412_v26 = vld [vmem:[%s6281_s28 + $0x1b40] sm:$0xff]  ;;  %1411 = vst [vmem:[%s6289_s29 + $0x6c8] sm:$0xff] %v1410_v25 }
  0xee   : > { %1413 = vst [vmem:[%s6289_s29 + $0x6d0] sm:$0xff] %v1412_v26  ;;  %v1414_v27 = vld [vmem:[%s6281_s28 + $0x1b60] sm:$0xff] }
  0xef   : > { %v1416_v28 = vld [vmem:[%s6281_s28 + $0x1b80] sm:$0xff]  ;;  %1415 = vst [vmem:[%s6289_s29 + $0x6d8] sm:$0xff] %v1414_v27 }
  0xf0   : > { %v1418_v29 = vld [vmem:[%s6281_s28 + $0x1ba0] sm:$0xff]  ;;  %1417 = vst [vmem:[%s6289_s29 + $0x6e0] sm:$0xff] %v1416_v28 }
  0xf1   : > { %1419 = vst [vmem:[%s6289_s29 + $0x6e8] sm:$0xff] %v1418_v29  ;;  %v1420_v30 = vld [vmem:[%s6281_s28 + $0x1bc0] sm:$0xff] }
  0xf2   : > { %v1422_v31 = vld [vmem:[%s6281_s28 + $0x1be0] sm:$0xff]  ;;  %1421 = vst [vmem:[%s6289_s29 + $0x6f0] sm:$0xff] %v1420_v30 }
  0xf3   : > { %v1424_v32 = vld [vmem:[%s6281_s28 + $0x1c00] sm:$0xff]  ;;  %1423 = vst [vmem:[%s6289_s29 + $0x6f8] sm:$0xff] %v1422_v31 }
  0xf4   : > { %1425 = vst [vmem:[%s6289_s29 + $0x700] sm:$0xff] %v1424_v32  ;;  %v1426_v33 = vld [vmem:[%s6281_s28 + $0x1c20] sm:$0xff] }
  0xf5   : > { %v1428_v34 = vld [vmem:[%s6281_s28 + $0x1c40] sm:$0xff]  ;;  %1427 = vst [vmem:[%s6289_s29 + $0x708] sm:$0xff] %v1426_v33 }
  0xf6   : > { %v1430_v35 = vld [vmem:[%s6281_s28 + $0x1c60] sm:$0xff]  ;;  %1429 = vst [vmem:[%s6289_s29 + $0x710] sm:$0xff] %v1428_v34 }
  0xf7   : > { %1431 = vst [vmem:[%s6289_s29 + $0x718] sm:$0xff] %v1430_v35  ;;  %v1432_v36 = vld [vmem:[%s6281_s28 + $0x1c80] sm:$0xff] }
  0xf8   : > { %v1434_v37 = vld [vmem:[%s6281_s28 + $0x1ca0] sm:$0xff]  ;;  %1433 = vst [vmem:[%s6289_s29 + $0x720] sm:$0xff] %v1432_v36 }
  0xf9   : > { %v1436_v38 = vld [vmem:[%s6281_s28 + $0x1cc0] sm:$0xff]  ;;  %1435 = vst [vmem:[%s6289_s29 + $0x728] sm:$0xff] %v1434_v37 }
  0xfa   : > { %1437 = vst [vmem:[%s6289_s29 + $0x730] sm:$0xff] %v1436_v38  ;;  %v1438_v39 = vld [vmem:[%s6281_s28 + $0x1ce0] sm:$0xff] }
  0xfb   : > { %v1440_v40 = vld [vmem:[%s6281_s28 + $0x1d00] sm:$0xff]  ;;  %1439 = vst [vmem:[%s6289_s29 + $0x738] sm:$0xff] %v1438_v39 }
  0xfc   : > { %v1442_v41 = vld [vmem:[%s6281_s28 + $0x1d20] sm:$0xff]  ;;  %1441 = vst [vmem:[%s6289_s29 + $0x740] sm:$0xff] %v1440_v40 }
  0xfd   : > { %1443 = vst [vmem:[%s6289_s29 + $0x748] sm:$0xff] %v1442_v41  ;;  %v1444_v42 = vld [vmem:[%s6281_s28 + $0x1d40] sm:$0xff] }
  0xfe   : > { %v1446_v43 = vld [vmem:[%s6281_s28 + $0x1d60] sm:$0xff]  ;;  %1445 = vst [vmem:[%s6289_s29 + $0x750] sm:$0xff] %v1444_v42 }
  0xff   : > { %v1448_v44 = vld [vmem:[%s6281_s28 + $0x1d80] sm:$0xff]  ;;  %1447 = vst [vmem:[%s6289_s29 + $0x758] sm:$0xff] %v1446_v43 }
 0x100   : > { %1449 = vst [vmem:[%s6289_s29 + $0x760] sm:$0xff] %v1448_v44  ;;  %v1450_v45 = vld [vmem:[%s6281_s28 + $0x1da0] sm:$0xff] }
 0x101   : > { %v1452_v46 = vld [vmem:[%s6281_s28 + $0x1dc0] sm:$0xff]  ;;  %1451 = vst [vmem:[%s6289_s29 + $0x768] sm:$0xff] %v1450_v45 }
 0x102   : > { %v1454_v47 = vld [vmem:[%s6281_s28 + $0x1de0] sm:$0xff]  ;;  %1453 = vst [vmem:[%s6289_s29 + $0x770] sm:$0xff] %v1452_v46 }
 0x103   : > { %1455 = vst [vmem:[%s6289_s29 + $0x778] sm:$0xff] %v1454_v47  ;;  %v1456_v48 = vld [vmem:[%s6281_s28 + $0x1e00] sm:$0xff] }
 0x104   : > { %v1458_v49 = vld [vmem:[%s6281_s28 + $0x1e20] sm:$0xff]  ;;  %1457 = vst [vmem:[%s6289_s29 + $0x780] sm:$0xff] %v1456_v48 }
 0x105   : > { %v1460_v50 = vld [vmem:[%s6281_s28 + $0x1e40] sm:$0xff]  ;;  %1459 = vst [vmem:[%s6289_s29 + $0x788] sm:$0xff] %v1458_v49 }
 0x106   : > { %1461 = vst [vmem:[%s6289_s29 + $0x790] sm:$0xff] %v1460_v50  ;;  %v1462_v51 = vld [vmem:[%s6281_s28 + $0x1e60] sm:$0xff] }
 0x107   : > { %v1464_v52 = vld [vmem:[%s6281_s28 + $0x1e80] sm:$0xff]  ;;  %1463 = vst [vmem:[%s6289_s29 + $0x798] sm:$0xff] %v1462_v51 }
 0x108   : > { %v1466_v53 = vld [vmem:[%s6281_s28 + $0x1ea0] sm:$0xff]  ;;  %1465 = vst [vmem:[%s6289_s29 + $0x7a0] sm:$0xff] %v1464_v52 }
 0x109   : > { %1467 = vst [vmem:[%s6289_s29 + $0x7a8] sm:$0xff] %v1466_v53  ;;  %v1468_v54 = vld [vmem:[%s6281_s28 + $0x1ec0] sm:$0xff] }
 0x10a   : > { %v1470_v55 = vld [vmem:[%s6281_s28 + $0x1ee0] sm:$0xff]  ;;  %1469 = vst [vmem:[%s6289_s29 + $0x7b0] sm:$0xff] %v1468_v54 }
 0x10b   : > { %v1472_v56 = vld [vmem:[%s6281_s28 + $0x1f00] sm:$0xff]  ;;  %1471 = vst [vmem:[%s6289_s29 + $0x7b8] sm:$0xff] %v1470_v55 }
 0x10c   : > { %1473 = vst [vmem:[%s6289_s29 + $0x7c0] sm:$0xff] %v1472_v56  ;;  %v1474_v57 = vld [vmem:[%s6281_s28 + $0x1f20] sm:$0xff] }
 0x10d   : > { %v1476_v58 = vld [vmem:[%s6281_s28 + $0x1f40] sm:$0xff]  ;;  %1475 = vst [vmem:[%s6289_s29 + $0x7c8] sm:$0xff] %v1474_v57 }
 0x10e   : > { %v1478_v59 = vld [vmem:[%s6281_s28 + $0x1f60] sm:$0xff]  ;;  %1477 = vst [vmem:[%s6289_s29 + $0x7d0] sm:$0xff] %v1476_v58 }
 0x10f   : > { %1479 = vst [vmem:[%s6289_s29 + $0x7d8] sm:$0xff] %v1478_v59  ;;  %v1480_v60 = vld [vmem:[%s6281_s28 + $0x1f80] sm:$0xff] }
 0x110   : > { %v1482_v61 = vld [vmem:[%s6281_s28 + $0x1fa0] sm:$0xff]  ;;  %1481 = vst [vmem:[%s6289_s29 + $0x7e0] sm:$0xff] %v1480_v60 }
 0x111   : > { %v1484_v62 = vld [vmem:[%s6281_s28 + $0x1fc0] sm:$0xff]  ;;  %1483 = vst [vmem:[%s6289_s29 + $0x7e8] sm:$0xff] %v1482_v61 }
 0x112   : > { %1485 = vst [vmem:[%s6289_s29 + $0x7f0] sm:$0xff] %v1484_v62  ;;  %v1486_v63 = vld [vmem:[%s6281_s28 + $0x1fe0] sm:$0xff] }
 0x113   : > { %v1488_v0 = vld [vmem:[%s6281_s28 + $0x2000] sm:$0xff]  ;;  %1487 = vst [vmem:[%s6289_s29 + $0x7f8] sm:$0xff] %v1486_v63 }
 0x114   : > { %v1490_v1 = vld [vmem:[%s6281_s28 + $0x2020] sm:$0xff]  ;;  %1489 = vst [vmem:[%s6289_s29 + $0x800] sm:$0xff] %v1488_v0 }
 0x115   : > { %1491 = vst [vmem:[%s6289_s29 + $0x808] sm:$0xff] %v1490_v1  ;;  %v1492_v2 = vld [vmem:[%s6281_s28 + $0x2040] sm:$0xff] }
 0x116   : > { %v1494_v3 = vld [vmem:[%s6281_s28 + $0x2060] sm:$0xff]  ;;  %1493 = vst [vmem:[%s6289_s29 + $0x810] sm:$0xff] %v1492_v2 }
 0x117   : > { %v1496_v4 = vld [vmem:[%s6281_s28 + $0x2080] sm:$0xff]  ;;  %1495 = vst [vmem:[%s6289_s29 + $0x818] sm:$0xff] %v1494_v3 }
 0x118   : > { %1497 = vst [vmem:[%s6289_s29 + $0x820] sm:$0xff] %v1496_v4  ;;  %v1498_v5 = vld [vmem:[%s6281_s28 + $0x20a0] sm:$0xff] }
 0x119   : > { %v1500_v6 = vld [vmem:[%s6281_s28 + $0x20c0] sm:$0xff]  ;;  %1499 = vst [vmem:[%s6289_s29 + $0x828] sm:$0xff] %v1498_v5 }
 0x11a   : > { %v1502_v7 = vld [vmem:[%s6281_s28 + $0x20e0] sm:$0xff]  ;;  %1501 = vst [vmem:[%s6289_s29 + $0x830] sm:$0xff] %v1500_v6 }
 0x11b   : > { %1503 = vst [vmem:[%s6289_s29 + $0x838] sm:$0xff] %v1502_v7  ;;  %v1504_v8 = vld [vmem:[%s6281_s28 + $0x2100] sm:$0xff] }
 0x11c   : > { %v1506_v9 = vld [vmem:[%s6281_s28 + $0x2120] sm:$0xff]  ;;  %1505 = vst [vmem:[%s6289_s29 + $0x840] sm:$0xff] %v1504_v8 }
 0x11d   : > { %v1508_v10 = vld [vmem:[%s6281_s28 + $0x2140] sm:$0xff]  ;;  %1507 = vst [vmem:[%s6289_s29 + $0x848] sm:$0xff] %v1506_v9 }
 0x11e   : > { %1509 = vst [vmem:[%s6289_s29 + $0x850] sm:$0xff] %v1508_v10  ;;  %v1510_v11 = vld [vmem:[%s6281_s28 + $0x2160] sm:$0xff] }
 0x11f   : > { %v1512_v12 = vld [vmem:[%s6281_s28 + $0x2180] sm:$0xff]  ;;  %1511 = vst [vmem:[%s6289_s29 + $0x858] sm:$0xff] %v1510_v11 }
 0x120   : > { %v1514_v13 = vld [vmem:[%s6281_s28 + $0x21a0] sm:$0xff]  ;;  %1513 = vst [vmem:[%s6289_s29 + $0x860] sm:$0xff] %v1512_v12 }
 0x121   : > { %1515 = vst [vmem:[%s6289_s29 + $0x868] sm:$0xff] %v1514_v13  ;;  %v1516_v14 = vld [vmem:[%s6281_s28 + $0x21c0] sm:$0xff] }
 0x122   : > { %v1518_v15 = vld [vmem:[%s6281_s28 + $0x21e0] sm:$0xff]  ;;  %1517 = vst [vmem:[%s6289_s29 + $0x870] sm:$0xff] %v1516_v14 }
 0x123   : > { %v1520_v16 = vld [vmem:[%s6281_s28 + $0x2200] sm:$0xff]  ;;  %1519 = vst [vmem:[%s6289_s29 + $0x878] sm:$0xff] %v1518_v15 }
 0x124   : > { %1521 = vst [vmem:[%s6289_s29 + $0x880] sm:$0xff] %v1520_v16  ;;  %v1522_v17 = vld [vmem:[%s6281_s28 + $0x2220] sm:$0xff] }
 0x125   : > { %v1524_v18 = vld [vmem:[%s6281_s28 + $0x2240] sm:$0xff]  ;;  %1523 = vst [vmem:[%s6289_s29 + $0x888] sm:$0xff] %v1522_v17 }
 0x126   : > { %v1526_v19 = vld [vmem:[%s6281_s28 + $0x2260] sm:$0xff]  ;;  %1525 = vst [vmem:[%s6289_s29 + $0x890] sm:$0xff] %v1524_v18 }
 0x127   : > { %1527 = vst [vmem:[%s6289_s29 + $0x898] sm:$0xff] %v1526_v19  ;;  %v1528_v20 = vld [vmem:[%s6281_s28 + $0x2280] sm:$0xff] }
 0x128   : > { %v1530_v21 = vld [vmem:[%s6281_s28 + $0x22a0] sm:$0xff]  ;;  %1529 = vst [vmem:[%s6289_s29 + $0x8a0] sm:$0xff] %v1528_v20 }
 0x129   : > { %v1532_v22 = vld [vmem:[%s6281_s28 + $0x22c0] sm:$0xff]  ;;  %1531 = vst [vmem:[%s6289_s29 + $0x8a8] sm:$0xff] %v1530_v21 }
 0x12a   : > { %1533 = vst [vmem:[%s6289_s29 + $0x8b0] sm:$0xff] %v1532_v22  ;;  %v1534_v23 = vld [vmem:[%s6281_s28 + $0x22e0] sm:$0xff] }
 0x12b   : > { %v1536_v24 = vld [vmem:[%s6281_s28 + $0x2300] sm:$0xff]  ;;  %1535 = vst [vmem:[%s6289_s29 + $0x8b8] sm:$0xff] %v1534_v23 }
 0x12c   : > { %v1538_v25 = vld [vmem:[%s6281_s28 + $0x2320] sm:$0xff]  ;;  %1537 = vst [vmem:[%s6289_s29 + $0x8c0] sm:$0xff] %v1536_v24 }
 0x12d   : > { %1539 = vst [vmem:[%s6289_s29 + $0x8c8] sm:$0xff] %v1538_v25  ;;  %v1540_v26 = vld [vmem:[%s6281_s28 + $0x2340] sm:$0xff] }
 0x12e   : > { %v1542_v27 = vld [vmem:[%s6281_s28 + $0x2360] sm:$0xff]  ;;  %1541 = vst [vmem:[%s6289_s29 + $0x8d0] sm:$0xff] %v1540_v26 }
 0x12f   : > { %v1544_v28 = vld [vmem:[%s6281_s28 + $0x2380] sm:$0xff]  ;;  %1543 = vst [vmem:[%s6289_s29 + $0x8d8] sm:$0xff] %v1542_v27 }
 0x130   : > { %1545 = vst [vmem:[%s6289_s29 + $0x8e0] sm:$0xff] %v1544_v28  ;;  %v1546_v29 = vld [vmem:[%s6281_s28 + $0x23a0] sm:$0xff] }
 0x131   : > { %v1548_v30 = vld [vmem:[%s6281_s28 + $0x23c0] sm:$0xff]  ;;  %1547 = vst [vmem:[%s6289_s29 + $0x8e8] sm:$0xff] %v1546_v29 }
 0x132   : > { %v1550_v31 = vld [vmem:[%s6281_s28 + $0x23e0] sm:$0xff]  ;;  %1549 = vst [vmem:[%s6289_s29 + $0x8f0] sm:$0xff] %v1548_v30 }
 0x133   : > { %1551 = vst [vmem:[%s6289_s29 + $0x8f8] sm:$0xff] %v1550_v31  ;;  %v1552_v32 = vld [vmem:[%s6281_s28 + $0x2400] sm:$0xff] }
 0x134   : > { %v1554_v33 = vld [vmem:[%s6281_s28 + $0x2420] sm:$0xff]  ;;  %1553 = vst [vmem:[%s6289_s29 + $0x900] sm:$0xff] %v1552_v32 }
 0x135   : > { %v1556_v34 = vld [vmem:[%s6281_s28 + $0x2440] sm:$0xff]  ;;  %1555 = vst [vmem:[%s6289_s29 + $0x908] sm:$0xff] %v1554_v33 }
 0x136   : > { %1557 = vst [vmem:[%s6289_s29 + $0x910] sm:$0xff] %v1556_v34  ;;  %v1558_v35 = vld [vmem:[%s6281_s28 + $0x2460] sm:$0xff] }
 0x137   : > { %v1560_v36 = vld [vmem:[%s6281_s28 + $0x2480] sm:$0xff]  ;;  %1559 = vst [vmem:[%s6289_s29 + $0x918] sm:$0xff] %v1558_v35 }
 0x138   : > { %v1562_v37 = vld [vmem:[%s6281_s28 + $0x24a0] sm:$0xff]  ;;  %1561 = vst [vmem:[%s6289_s29 + $0x920] sm:$0xff] %v1560_v36 }
 0x139   : > { %1563 = vst [vmem:[%s6289_s29 + $0x928] sm:$0xff] %v1562_v37  ;;  %v1564_v38 = vld [vmem:[%s6281_s28 + $0x24c0] sm:$0xff] }
 0x13a   : > { %v1566_v39 = vld [vmem:[%s6281_s28 + $0x24e0] sm:$0xff]  ;;  %1565 = vst [vmem:[%s6289_s29 + $0x930] sm:$0xff] %v1564_v38 }
 0x13b   : > { %v1568_v40 = vld [vmem:[%s6281_s28 + $0x2500] sm:$0xff]  ;;  %1567 = vst [vmem:[%s6289_s29 + $0x938] sm:$0xff] %v1566_v39 }
 0x13c   : > { %1569 = vst [vmem:[%s6289_s29 + $0x940] sm:$0xff] %v1568_v40  ;;  %v1570_v41 = vld [vmem:[%s6281_s28 + $0x2520] sm:$0xff] }
 0x13d   : > { %v1572_v42 = vld [vmem:[%s6281_s28 + $0x2540] sm:$0xff]  ;;  %1571 = vst [vmem:[%s6289_s29 + $0x948] sm:$0xff] %v1570_v41 }
 0x13e   : > { %v1574_v43 = vld [vmem:[%s6281_s28 + $0x2560] sm:$0xff]  ;;  %1573 = vst [vmem:[%s6289_s29 + $0x950] sm:$0xff] %v1572_v42 }
 0x13f   : > { %1575 = vst [vmem:[%s6289_s29 + $0x958] sm:$0xff] %v1574_v43  ;;  %v1576_v44 = vld [vmem:[%s6281_s28 + $0x2580] sm:$0xff] }
 0x140   : > { %v1578_v45 = vld [vmem:[%s6281_s28 + $0x25a0] sm:$0xff]  ;;  %1577 = vst [vmem:[%s6289_s29 + $0x960] sm:$0xff] %v1576_v44 }
 0x141   : > { %v1580_v46 = vld [vmem:[%s6281_s28 + $0x25c0] sm:$0xff]  ;;  %1579 = vst [vmem:[%s6289_s29 + $0x968] sm:$0xff] %v1578_v45 }
 0x142   : > { %1581 = vst [vmem:[%s6289_s29 + $0x970] sm:$0xff] %v1580_v46  ;;  %v1582_v47 = vld [vmem:[%s6281_s28 + $0x25e0] sm:$0xff] }
 0x143   : > { %v1584_v48 = vld [vmem:[%s6281_s28 + $0x2600] sm:$0xff]  ;;  %1583 = vst [vmem:[%s6289_s29 + $0x978] sm:$0xff] %v1582_v47 }
 0x144   : > { %v1586_v49 = vld [vmem:[%s6281_s28 + $0x2620] sm:$0xff]  ;;  %1585 = vst [vmem:[%s6289_s29 + $0x980] sm:$0xff] %v1584_v48 }
 0x145   : > { %1587 = vst [vmem:[%s6289_s29 + $0x988] sm:$0xff] %v1586_v49  ;;  %v1588_v50 = vld [vmem:[%s6281_s28 + $0x2640] sm:$0xff] }
 0x146   : > { %v1590_v51 = vld [vmem:[%s6281_s28 + $0x2660] sm:$0xff]  ;;  %1589 = vst [vmem:[%s6289_s29 + $0x990] sm:$0xff] %v1588_v50 }
 0x147   : > { %v1592_v52 = vld [vmem:[%s6281_s28 + $0x2680] sm:$0xff]  ;;  %1591 = vst [vmem:[%s6289_s29 + $0x998] sm:$0xff] %v1590_v51 }
 0x148   : > { %1593 = vst [vmem:[%s6289_s29 + $0x9a0] sm:$0xff] %v1592_v52  ;;  %v1594_v53 = vld [vmem:[%s6281_s28 + $0x26a0] sm:$0xff] }
 0x149   : > { %v1596_v54 = vld [vmem:[%s6281_s28 + $0x26c0] sm:$0xff]  ;;  %1595 = vst [vmem:[%s6289_s29 + $0x9a8] sm:$0xff] %v1594_v53 }
 0x14a   : > { %v1598_v55 = vld [vmem:[%s6281_s28 + $0x26e0] sm:$0xff]  ;;  %1597 = vst [vmem:[%s6289_s29 + $0x9b0] sm:$0xff] %v1596_v54 }
 0x14b   : > { %1599 = vst [vmem:[%s6289_s29 + $0x9b8] sm:$0xff] %v1598_v55  ;;  %v1600_v56 = vld [vmem:[%s6281_s28 + $0x2700] sm:$0xff] }
 0x14c   : > { %v1602_v57 = vld [vmem:[%s6281_s28 + $0x2720] sm:$0xff]  ;;  %1601 = vst [vmem:[%s6289_s29 + $0x9c0] sm:$0xff] %v1600_v56 }
 0x14d   : > { %v1604_v58 = vld [vmem:[%s6281_s28 + $0x2740] sm:$0xff]  ;;  %1603 = vst [vmem:[%s6289_s29 + $0x9c8] sm:$0xff] %v1602_v57 }
 0x14e   : > { %1605 = vst [vmem:[%s6289_s29 + $0x9d0] sm:$0xff] %v1604_v58  ;;  %v1606_v59 = vld [vmem:[%s6281_s28 + $0x2760] sm:$0xff] }
 0x14f   : > { %v1608_v60 = vld [vmem:[%s6281_s28 + $0x2780] sm:$0xff]  ;;  %1607 = vst [vmem:[%s6289_s29 + $0x9d8] sm:$0xff] %v1606_v59 }
 0x150   : > { %v1610_v61 = vld [vmem:[%s6281_s28 + $0x27a0] sm:$0xff]  ;;  %1609 = vst [vmem:[%s6289_s29 + $0x9e0] sm:$0xff] %v1608_v60 }
 0x151   : > { %1611 = vst [vmem:[%s6289_s29 + $0x9e8] sm:$0xff] %v1610_v61  ;;  %v1612_v62 = vld [vmem:[%s6281_s28 + $0x27c0] sm:$0xff] }
 0x152   : > { %v1614_v63 = vld [vmem:[%s6281_s28 + $0x27e0] sm:$0xff]  ;;  %1613 = vst [vmem:[%s6289_s29 + $0x9f0] sm:$0xff] %v1612_v62 }
 0x153   : > { %v1616_v0 = vld [vmem:[%s6281_s28 + $0x2800] sm:$0xff]  ;;  %1615 = vst [vmem:[%s6289_s29 + $0x9f8] sm:$0xff] %v1614_v63 }
 0x154   : > { %1617 = vst [vmem:[%s6289_s29 + $0xa00] sm:$0xff] %v1616_v0  ;;  %v1618_v1 = vld [vmem:[%s6281_s28 + $0x2820] sm:$0xff] }
 0x155   : > { %v1620_v2 = vld [vmem:[%s6281_s28 + $0x2840] sm:$0xff]  ;;  %1619 = vst [vmem:[%s6289_s29 + $0xa08] sm:$0xff] %v1618_v1 }
 0x156   : > { %v1622_v3 = vld [vmem:[%s6281_s28 + $0x2860] sm:$0xff]  ;;  %1621 = vst [vmem:[%s6289_s29 + $0xa10] sm:$0xff] %v1620_v2 }
 0x157   : > { %1623 = vst [vmem:[%s6289_s29 + $0xa18] sm:$0xff] %v1622_v3  ;;  %v1624_v4 = vld [vmem:[%s6281_s28 + $0x2880] sm:$0xff] }
 0x158   : > { %v1626_v5 = vld [vmem:[%s6281_s28 + $0x28a0] sm:$0xff]  ;;  %1625 = vst [vmem:[%s6289_s29 + $0xa20] sm:$0xff] %v1624_v4 }
 0x159   : > { %v1628_v6 = vld [vmem:[%s6281_s28 + $0x28c0] sm:$0xff]  ;;  %1627 = vst [vmem:[%s6289_s29 + $0xa28] sm:$0xff] %v1626_v5 }
 0x15a   : > { %1629 = vst [vmem:[%s6289_s29 + $0xa30] sm:$0xff] %v1628_v6  ;;  %v1630_v7 = vld [vmem:[%s6281_s28 + $0x28e0] sm:$0xff] }
 0x15b   : > { %v1632_v8 = vld [vmem:[%s6281_s28 + $0x2900] sm:$0xff]  ;;  %1631 = vst [vmem:[%s6289_s29 + $0xa38] sm:$0xff] %v1630_v7 }
 0x15c   : > { %v1634_v9 = vld [vmem:[%s6281_s28 + $0x2920] sm:$0xff]  ;;  %1633 = vst [vmem:[%s6289_s29 + $0xa40] sm:$0xff] %v1632_v8 }
 0x15d   : > { %1635 = vst [vmem:[%s6289_s29 + $0xa48] sm:$0xff] %v1634_v9  ;;  %v1636_v10 = vld [vmem:[%s6281_s28 + $0x2940] sm:$0xff] }
 0x15e   : > { %v1638_v11 = vld [vmem:[%s6281_s28 + $0x2960] sm:$0xff]  ;;  %1637 = vst [vmem:[%s6289_s29 + $0xa50] sm:$0xff] %v1636_v10 }
 0x15f   : > { %v1640_v12 = vld [vmem:[%s6281_s28 + $0x2980] sm:$0xff]  ;;  %1639 = vst [vmem:[%s6289_s29 + $0xa58] sm:$0xff] %v1638_v11 }
 0x160   : > { %1641 = vst [vmem:[%s6289_s29 + $0xa60] sm:$0xff] %v1640_v12  ;;  %v1642_v13 = vld [vmem:[%s6281_s28 + $0x29a0] sm:$0xff] }
 0x161   : > { %v1644_v14 = vld [vmem:[%s6281_s28 + $0x29c0] sm:$0xff]  ;;  %1643 = vst [vmem:[%s6289_s29 + $0xa68] sm:$0xff] %v1642_v13 }
 0x162   : > { %v1646_v15 = vld [vmem:[%s6281_s28 + $0x29e0] sm:$0xff]  ;;  %1645 = vst [vmem:[%s6289_s29 + $0xa70] sm:$0xff] %v1644_v14 }
 0x163   : > { %1647 = vst [vmem:[%s6289_s29 + $0xa78] sm:$0xff] %v1646_v15  ;;  %v1648_v16 = vld [vmem:[%s6281_s28 + $0x2a00] sm:$0xff] }
 0x164   : > { %v1650_v17 = vld [vmem:[%s6281_s28 + $0x2a20] sm:$0xff]  ;;  %1649 = vst [vmem:[%s6289_s29 + $0xa80] sm:$0xff] %v1648_v16 }
 0x165   : > { %v1652_v18 = vld [vmem:[%s6281_s28 + $0x2a40] sm:$0xff]  ;;  %1651 = vst [vmem:[%s6289_s29 + $0xa88] sm:$0xff] %v1650_v17 }
 0x166   : > { %1653 = vst [vmem:[%s6289_s29 + $0xa90] sm:$0xff] %v1652_v18  ;;  %v1654_v19 = vld [vmem:[%s6281_s28 + $0x2a60] sm:$0xff] }
 0x167   : > { %v1656_v20 = vld [vmem:[%s6281_s28 + $0x2a80] sm:$0xff]  ;;  %1655 = vst [vmem:[%s6289_s29 + $0xa98] sm:$0xff] %v1654_v19 }
 0x168   : > { %v1658_v21 = vld [vmem:[%s6281_s28 + $0x2aa0] sm:$0xff]  ;;  %1657 = vst [vmem:[%s6289_s29 + $0xaa0] sm:$0xff] %v1656_v20 }
 0x169   : > { %1659 = vst [vmem:[%s6289_s29 + $0xaa8] sm:$0xff] %v1658_v21  ;;  %v1660_v22 = vld [vmem:[%s6281_s28 + $0x2ac0] sm:$0xff] }
 0x16a   : > { %v1662_v23 = vld [vmem:[%s6281_s28 + $0x2ae0] sm:$0xff]  ;;  %1661 = vst [vmem:[%s6289_s29 + $0xab0] sm:$0xff] %v1660_v22 }
 0x16b   : > { %v1664_v24 = vld [vmem:[%s6281_s28 + $0x2b00] sm:$0xff]  ;;  %1663 = vst [vmem:[%s6289_s29 + $0xab8] sm:$0xff] %v1662_v23 }
 0x16c   : > { %1665 = vst [vmem:[%s6289_s29 + $0xac0] sm:$0xff] %v1664_v24  ;;  %v1666_v25 = vld [vmem:[%s6281_s28 + $0x2b20] sm:$0xff] }
 0x16d   : > { %v1668_v26 = vld [vmem:[%s6281_s28 + $0x2b40] sm:$0xff]  ;;  %1667 = vst [vmem:[%s6289_s29 + $0xac8] sm:$0xff] %v1666_v25 }
 0x16e   : > { %v1670_v27 = vld [vmem:[%s6281_s28 + $0x2b60] sm:$0xff]  ;;  %1669 = vst [vmem:[%s6289_s29 + $0xad0] sm:$0xff] %v1668_v26 }
 0x16f   : > { %1671 = vst [vmem:[%s6289_s29 + $0xad8] sm:$0xff] %v1670_v27  ;;  %v1672_v28 = vld [vmem:[%s6281_s28 + $0x2b80] sm:$0xff] }
 0x170   : > { %v1674_v29 = vld [vmem:[%s6281_s28 + $0x2ba0] sm:$0xff]  ;;  %1673 = vst [vmem:[%s6289_s29 + $0xae0] sm:$0xff] %v1672_v28 }
 0x171   : > { %v1676_v30 = vld [vmem:[%s6281_s28 + $0x2bc0] sm:$0xff]  ;;  %1675 = vst [vmem:[%s6289_s29 + $0xae8] sm:$0xff] %v1674_v29 }
 0x172   : > { %1677 = vst [vmem:[%s6289_s29 + $0xaf0] sm:$0xff] %v1676_v30  ;;  %v1678_v31 = vld [vmem:[%s6281_s28 + $0x2be0] sm:$0xff] }
 0x173   : > { %v1680_v32 = vld [vmem:[%s6281_s28 + $0x2c00] sm:$0xff]  ;;  %1679 = vst [vmem:[%s6289_s29 + $0xaf8] sm:$0xff] %v1678_v31 }
 0x174   : > { %v1682_v33 = vld [vmem:[%s6281_s28 + $0x2c20] sm:$0xff]  ;;  %1681 = vst [vmem:[%s6289_s29 + $0xb00] sm:$0xff] %v1680_v32 }
 0x175   : > { %1683 = vst [vmem:[%s6289_s29 + $0xb08] sm:$0xff] %v1682_v33  ;;  %v1684_v34 = vld [vmem:[%s6281_s28 + $0x2c40] sm:$0xff] }
 0x176   : > { %v1686_v35 = vld [vmem:[%s6281_s28 + $0x2c60] sm:$0xff]  ;;  %1685 = vst [vmem:[%s6289_s29 + $0xb10] sm:$0xff] %v1684_v34 }
 0x177   : > { %v1688_v36 = vld [vmem:[%s6281_s28 + $0x2c80] sm:$0xff]  ;;  %1687 = vst [vmem:[%s6289_s29 + $0xb18] sm:$0xff] %v1686_v35 }
 0x178   : > { %1689 = vst [vmem:[%s6289_s29 + $0xb20] sm:$0xff] %v1688_v36  ;;  %v1690_v37 = vld [vmem:[%s6281_s28 + $0x2ca0] sm:$0xff] }
 0x179   : > { %v1692_v38 = vld [vmem:[%s6281_s28 + $0x2cc0] sm:$0xff]  ;;  %1691 = vst [vmem:[%s6289_s29 + $0xb28] sm:$0xff] %v1690_v37 }
 0x17a   : > { %v1694_v39 = vld [vmem:[%s6281_s28 + $0x2ce0] sm:$0xff]  ;;  %1693 = vst [vmem:[%s6289_s29 + $0xb30] sm:$0xff] %v1692_v38 }
 0x17b   : > { %1695 = vst [vmem:[%s6289_s29 + $0xb38] sm:$0xff] %v1694_v39  ;;  %v1696_v40 = vld [vmem:[%s6281_s28 + $0x2d00] sm:$0xff] }
 0x17c   : > { %v1698_v41 = vld [vmem:[%s6281_s28 + $0x2d20] sm:$0xff]  ;;  %1697 = vst [vmem:[%s6289_s29 + $0xb40] sm:$0xff] %v1696_v40 }
 0x17d   : > { %v1700_v42 = vld [vmem:[%s6281_s28 + $0x2d40] sm:$0xff]  ;;  %1699 = vst [vmem:[%s6289_s29 + $0xb48] sm:$0xff] %v1698_v41 }
 0x17e   : > { %1701 = vst [vmem:[%s6289_s29 + $0xb50] sm:$0xff] %v1700_v42  ;;  %v1702_v43 = vld [vmem:[%s6281_s28 + $0x2d60] sm:$0xff] }
 0x17f   : > { %v1704_v44 = vld [vmem:[%s6281_s28 + $0x2d80] sm:$0xff]  ;;  %1703 = vst [vmem:[%s6289_s29 + $0xb58] sm:$0xff] %v1702_v43 }
 0x180   : > { %v1706_v45 = vld [vmem:[%s6281_s28 + $0x2da0] sm:$0xff]  ;;  %1705 = vst [vmem:[%s6289_s29 + $0xb60] sm:$0xff] %v1704_v44 }
 0x181   : > { %1707 = vst [vmem:[%s6289_s29 + $0xb68] sm:$0xff] %v1706_v45  ;;  %v1708_v46 = vld [vmem:[%s6281_s28 + $0x2dc0] sm:$0xff] }
 0x182   : > { %v1710_v47 = vld [vmem:[%s6281_s28 + $0x2de0] sm:$0xff]  ;;  %1709 = vst [vmem:[%s6289_s29 + $0xb70] sm:$0xff] %v1708_v46 }
 0x183   : > { %v1712_v48 = vld [vmem:[%s6281_s28 + $0x2e00] sm:$0xff]  ;;  %1711 = vst [vmem:[%s6289_s29 + $0xb78] sm:$0xff] %v1710_v47 }
 0x184   : > { %1713 = vst [vmem:[%s6289_s29 + $0xb80] sm:$0xff] %v1712_v48  ;;  %v1714_v49 = vld [vmem:[%s6281_s28 + $0x2e20] sm:$0xff] }
 0x185   : > { %v1716_v50 = vld [vmem:[%s6281_s28 + $0x2e40] sm:$0xff]  ;;  %1715 = vst [vmem:[%s6289_s29 + $0xb88] sm:$0xff] %v1714_v49 }
 0x186   : > { %v1718_v51 = vld [vmem:[%s6281_s28 + $0x2e60] sm:$0xff]  ;;  %1717 = vst [vmem:[%s6289_s29 + $0xb90] sm:$0xff] %v1716_v50 }
 0x187   : > { %1719 = vst [vmem:[%s6289_s29 + $0xb98] sm:$0xff] %v1718_v51  ;;  %v1720_v52 = vld [vmem:[%s6281_s28 + $0x2e80] sm:$0xff] }
 0x188   : > { %v1722_v53 = vld [vmem:[%s6281_s28 + $0x2ea0] sm:$0xff]  ;;  %1721 = vst [vmem:[%s6289_s29 + $0xba0] sm:$0xff] %v1720_v52 }
 0x189   : > { %v1724_v54 = vld [vmem:[%s6281_s28 + $0x2ec0] sm:$0xff]  ;;  %1723 = vst [vmem:[%s6289_s29 + $0xba8] sm:$0xff] %v1722_v53 }
 0x18a   : > { %1725 = vst [vmem:[%s6289_s29 + $0xbb0] sm:$0xff] %v1724_v54  ;;  %v1726_v55 = vld [vmem:[%s6281_s28 + $0x2ee0] sm:$0xff] }
 0x18b   : > { %v1728_v56 = vld [vmem:[%s6281_s28 + $0x2f00] sm:$0xff]  ;;  %1727 = vst [vmem:[%s6289_s29 + $0xbb8] sm:$0xff] %v1726_v55 }
 0x18c   : > { %v1730_v57 = vld [vmem:[%s6281_s28 + $0x2f20] sm:$0xff]  ;;  %1729 = vst [vmem:[%s6289_s29 + $0xbc0] sm:$0xff] %v1728_v56 }
 0x18d   : > { %1731 = vst [vmem:[%s6289_s29 + $0xbc8] sm:$0xff] %v1730_v57  ;;  %v1732_v58 = vld [vmem:[%s6281_s28 + $0x2f40] sm:$0xff] }
 0x18e   : > { %v1734_v59 = vld [vmem:[%s6281_s28 + $0x2f60] sm:$0xff]  ;;  %1733 = vst [vmem:[%s6289_s29 + $0xbd0] sm:$0xff] %v1732_v58 }
 0x18f   : > { %v1736_v60 = vld [vmem:[%s6281_s28 + $0x2f80] sm:$0xff]  ;;  %1735 = vst [vmem:[%s6289_s29 + $0xbd8] sm:$0xff] %v1734_v59 }
 0x190   : > { %1737 = vst [vmem:[%s6289_s29 + $0xbe0] sm:$0xff] %v1736_v60  ;;  %v1738_v61 = vld [vmem:[%s6281_s28 + $0x2fa0] sm:$0xff] }
 0x191   : > { %v1740_v62 = vld [vmem:[%s6281_s28 + $0x2fc0] sm:$0xff]  ;;  %1739 = vst [vmem:[%s6289_s29 + $0xbe8] sm:$0xff] %v1738_v61 }
 0x192   : > { %v1742_v63 = vld [vmem:[%s6281_s28 + $0x2fe0] sm:$0xff]  ;;  %1741 = vst [vmem:[%s6289_s29 + $0xbf0] sm:$0xff] %v1740_v62 }
 0x193   : > { %1743 = vst [vmem:[%s6289_s29 + $0xbf8] sm:$0xff] %v1742_v63  ;;  %v1744_v0 = vld [vmem:[%s6281_s28 + $0x3000] sm:$0xff] }
 0x194   : > { %v1746_v1 = vld [vmem:[%s6281_s28 + $0x3020] sm:$0xff]  ;;  %1745 = vst [vmem:[%s6289_s29 + $0xc00] sm:$0xff] %v1744_v0 }
 0x195   : > { %v1748_v2 = vld [vmem:[%s6281_s28 + $0x3040] sm:$0xff]  ;;  %1747 = vst [vmem:[%s6289_s29 + $0xc08] sm:$0xff] %v1746_v1 }
 0x196   : > { %1749 = vst [vmem:[%s6289_s29 + $0xc10] sm:$0xff] %v1748_v2  ;;  %v1750_v3 = vld [vmem:[%s6281_s28 + $0x3060] sm:$0xff] }
 0x197   : > { %v1752_v4 = vld [vmem:[%s6281_s28 + $0x3080] sm:$0xff]  ;;  %1751 = vst [vmem:[%s6289_s29 + $0xc18] sm:$0xff] %v1750_v3 }
 0x198   : > { %v1754_v5 = vld [vmem:[%s6281_s28 + $0x30a0] sm:$0xff]  ;;  %1753 = vst [vmem:[%s6289_s29 + $0xc20] sm:$0xff] %v1752_v4 }
 0x199   : > { %1755 = vst [vmem:[%s6289_s29 + $0xc28] sm:$0xff] %v1754_v5  ;;  %v1756_v6 = vld [vmem:[%s6281_s28 + $0x30c0] sm:$0xff] }
 0x19a   : > { %v1758_v7 = vld [vmem:[%s6281_s28 + $0x30e0] sm:$0xff]  ;;  %1757 = vst [vmem:[%s6289_s29 + $0xc30] sm:$0xff] %v1756_v6 }
 0x19b   : > { %1759 = vst [vmem:[%s6289_s29 + $0xc38] sm:$0xff] %v1758_v7 }
 0x19c PF: > { %p5072_p8 = scmp.ge.s32.totalorder %s6210_s16, 1  ;;  %p1772_p9 = scmp.lt.s32.totalorder %s6210_s16, 5 }
 0x19e   : > { %p1773_p10 = pnand %p5072_p8, %p1772_p9 }
 0x19f   : > { %s1779_s30 = sand.u32 (!%p1773_p10), 1, %s6194_s12  }
 0x1a0   : > { %1776 = sbr.rel (%p1773_p10) target bundleno = 1037 (0x40d), region = 66  ;;  %s5073_s7 = sshll.u32 (!%p1773_p10), %s1779_s30, 4 }
 0x1a1   : > { %s5505_s4 = smul.u32 (!%p1773_p10), 3136, %s1779_s30  ;;  %s1810_s8 = scalar_lea.vmem (!%p1773_p10), [#allocation3], %s5073_s7 }
 0x1a3   : > { %s7080_s9 = scalar_lea.vmem (!%p1773_p10), [#allocation2], %s5505_s4 }
 0x1a5   : > { %v5644_v8 = vld [vmem:[%s7570_s0 + $0x4] ss:$100 sps:$4 sm:$0xff]   ;;  %v5651_v9 = vld [vmem:[%s7570_s0 + $0xc] ss:$100 sps:$4 sm:$0xff]   ;;  %v5547_v10 = vld [vmem:[%s7080_s9 + $0x74] ss:$8 sps:$4 sm:$0xff]  }
 0x1a6   : > { %4378 = vmatprep.mubr.bf16.mxu0 %v5644_v8  ;;  %4421 = vmatprep.mubr.bf16.mxu1 %v5651_v9  ;;  %v5549_v11 = vld [vmem:[%s7080_s9 + $0x70] ss:$8 sps:$4 sm:$0xff]   ;;  %v5550_v12 = vld [vmem:[%s7080_s9 + $0x174] ss:$8 sps:$4 sm:$0xff]   ;;  %v5553_v14 = vld [vmem:[%s7080_s9 + $0x64] ss:$8 sps:$4 sm:$0xff]  }
 0x1a7   : > { %4346 = vmatprep.subr.bf16.mxu0 %v5547_v10  ;;  %v5552_v13 = vld [vmem:[%s7080_s9 + $0x170] ss:$8 sps:$4 sm:$0xff]   ;;  %v5555_v15 = vld [vmem:[%s7080_s9 + $0x60] ss:$8 sps:$4 sm:$0xff]   ;;  %4389 = vmatprep.subr.bf16.mxu1 %v5550_v12  ;;  %v5556_v16 = vld [vmem:[%s7080_s9 + $0x164] ss:$8 sps:$4 sm:$0xff]  }
 0x1a8   : > { %4347 = vmatpush1.bf16.msra.mxu0 %v5549_v11  ;;  %4390 = vmatpush1.bf16.msra.mxu1 %v5552_v13  ;;  %v5558_v17 = vld [vmem:[%s7080_s9 + $0x160] ss:$8 sps:$4 sm:$0xff]   ;;  %v5559_v18 = vld [vmem:[%s7080_s9 + $0x54] ss:$8 sps:$4 sm:$0xff]   ;;  %v5561_v19 = vld [vmem:[%s7080_s9 + $0x50] ss:$8 sps:$4 sm:$0xff]  }
 0x1a9   : > { %4348 = vmatprep.subr.bf16.mxu0 %v5553_v14  ;;  %4391 = vmatprep.subr.bf16.mxu1 %v5556_v16  ;;  %v5562_v20 = vld [vmem:[%s7080_s9 + $0x154] ss:$8 sps:$4 sm:$0xff]   ;;  %v5565_v21 = vld [vmem:[%s7080_s9 + $0x44] ss:$8 sps:$4 sm:$0xff]   ;;  %v5564_v22 = vld [vmem:[%s7080_s9 + $0x150] ss:$8 sps:$4 sm:$0xff]  }
 0x1aa   : > { %v5568_v23 = vld [vmem:[%s7080_s9 + $0x144] ss:$8 sps:$4 sm:$0xff]   ;;  %v5567_v24 = vld [vmem:[%s7080_s9 + $0x40] ss:$8 sps:$4 sm:$0xff]   ;;  %v5571_v25 = vld [vmem:[%s7080_s9 + $0x34] ss:$8 sps:$4 sm:$0xff]  }
 0x1ab   : > { %v5570_v26 = vld [vmem:[%s7080_s9 + $0x140] ss:$8 sps:$4 sm:$0xff]   ;;  %v5574_v27 = vld [vmem:[%s7080_s9 + $0x134] ss:$8 sps:$4 sm:$0xff]   ;;  %v5573_v28 = vld [vmem:[%s7080_s9 + $0x30] ss:$8 sps:$4 sm:$0xff]  }
 0x1ac   : > { %4349 = vmatpush1.bf16.msra.mxu0 %v5555_v15  ;;  %4392 = vmatpush1.bf16.msra.mxu1 %v5558_v17  ;;  %v5577_v29 = vld [vmem:[%s7080_s9 + $0x24] ss:$8 sps:$4 sm:$0xff]   ;;  %v5576_v30 = vld [vmem:[%s7080_s9 + $0x130] ss:$8 sps:$4 sm:$0xff]   ;;  %v5579_v32 = vld [vmem:[%s7080_s9 + $0x20] ss:$8 sps:$4 sm:$0xff]  }
 0x1ad   : > { %4350 = vmatprep.subr.bf16.mxu0 %v5559_v18  ;;  %4393 = vmatprep.subr.bf16.mxu1 %v5562_v20  ;;  %v5580_v31 = vld [vmem:[%s7080_s9 + $0x124] ss:$8 sps:$4 sm:$0xff]   ;;  %v5583_v33 = vld [vmem:[%s7080_s9 + $0x14] ss:$8 sps:$4 sm:$0xff]   ;;  %v5582_v34 = vld [vmem:[%s7080_s9 + $0x120] ss:$8 sps:$4 sm:$0xff]  }
 0x1ae   : > { %v5586_v35 = vld [vmem:[%s7080_s9 + $0x114] ss:$8 sps:$4 sm:$0xff]   ;;  %v5585_v36 = vld [vmem:[%s7080_s9 + $0x10] ss:$8 sps:$4 sm:$0xff]   ;;  %v5589_v37 = vld [vmem:[%s7080_s9 + $0x4] ss:$8 sps:$4 sm:$0xff]  }
 0x1af   : > { %v5588_v38 = vld [vmem:[%s7080_s9 + $0x110] ss:$8 sps:$4 sm:$0xff]   ;;  %v5592_v39 = vld [vmem:[%s7080_s9 + $0x104] ss:$8 sps:$4 sm:$0xff]   ;;  %v5591_v40 = vld [vmem:[%s7080_s9] ss:$8 sps:$4 sm:$0xff]  }
 0x1b0   : > { %4351 = vmatpush1.bf16.msra.mxu0 %v5561_v19  ;;  %4394 = vmatpush1.bf16.msra.mxu1 %v5564_v22  ;;  %v5595_v41 = vld [vmem:[%s7080_s9 + $0xf4] ss:$8 sps:$4 sm:$0xff]   ;;  %v5594_v42 = vld [vmem:[%s7080_s9 + $0x100] ss:$8 sps:$4 sm:$0xff]   ;;  %v5597_v44 = vld [vmem:[%s7080_s9 + $0xf0] ss:$8 sps:$4 sm:$0xff]  }
 0x1b1   : > { %4352 = vmatprep.subr.bf16.mxu0 %v5565_v21  ;;  %4395 = vmatprep.subr.bf16.mxu1 %v5568_v23  ;;  %v5598_v43 = vld [vmem:[%s7080_s9 + $0x1f4] ss:$8 sps:$4 sm:$0xff]   ;;  %v5601_v45 = vld [vmem:[%s7080_s9 + $0xe4] ss:$8 sps:$4 sm:$0xff]   ;;  %v5600_v46 = vld [vmem:[%s7080_s9 + $0x1f0] ss:$8 sps:$4 sm:$0xff]  }
 0x1b2   : > { %v5604_v47 = vld [vmem:[%s7080_s9 + $0x1e4] ss:$8 sps:$4 sm:$0xff]   ;;  %v5603_v48 = vld [vmem:[%s7080_s9 + $0xe0] ss:$8 sps:$4 sm:$0xff]   ;;  %v5607_v49 = vld [vmem:[%s7080_s9 + $0xd4] ss:$8 sps:$4 sm:$0xff]  }
 0x1b3   : > { %v5606_v50 = vld [vmem:[%s7080_s9 + $0x1e0] ss:$8 sps:$4 sm:$0xff]   ;;  %v5610_v51 = vld [vmem:[%s7080_s9 + $0x1d4] ss:$8 sps:$4 sm:$0xff]   ;;  %v5609_v52 = vld [vmem:[%s7080_s9 + $0xd0] ss:$8 sps:$4 sm:$0xff]  }
 0x1b4   : > { %4353 = vmatpush1.bf16.msra.mxu0 %v5567_v24  ;;  %4396 = vmatpush1.bf16.msra.mxu1 %v5570_v26  ;;  %v5613_v53 = vld [vmem:[%s7080_s9 + $0xc4] ss:$8 sps:$4 sm:$0xff]   ;;  %v5612_v54 = vld [vmem:[%s7080_s9 + $0x1d0] ss:$8 sps:$4 sm:$0xff]   ;;  %v5615_v56 = vld [vmem:[%s7080_s9 + $0xc0] ss:$8 sps:$4 sm:$0xff]  }
 0x1b5   : > { %4354 = vmatprep.subr.bf16.mxu0 %v5571_v25  ;;  %4397 = vmatprep.subr.bf16.mxu1 %v5574_v27  ;;  %v5616_v55 = vld [vmem:[%s7080_s9 + $0x1c4] ss:$8 sps:$4 sm:$0xff]   ;;  %v5619_v57 = vld [vmem:[%s7080_s9 + $0xb4] ss:$8 sps:$4 sm:$0xff]   ;;  %v5618_v58 = vld [vmem:[%s7080_s9 + $0x1c0] ss:$8 sps:$4 sm:$0xff]  }
 0x1b6   : > { %v5622_v59 = vld [vmem:[%s7080_s9 + $0x1b4] ss:$8 sps:$4 sm:$0xff]   ;;  %v5621_v60 = vld [vmem:[%s7080_s9 + $0xb0] ss:$8 sps:$4 sm:$0xff]   ;;  %v5625_v61 = vld [vmem:[%s7080_s9 + $0xa4] ss:$8 sps:$4 sm:$0xff]  }
 0x1b7   : > { %v5624_v62 = vld [vmem:[%s7080_s9 + $0x1b0] ss:$8 sps:$4 sm:$0xff]   ;;  %v5628_v63 = vld [vmem:[%s7080_s9 + $0x1a4] ss:$8 sps:$4 sm:$0xff]   ;;  %v5627_v0 = vld [vmem:[%s7080_s9 + $0xa0] ss:$8 sps:$4 sm:$0xff]  }
 0x1b8   : > { %4355 = vmatpush1.bf16.msra.mxu0 %v5573_v28  ;;  %4398 = vmatpush1.bf16.msra.mxu1 %v5576_v30  ;;  %v5631_v1 = vld [vmem:[%s7080_s9 + $0x94] ss:$8 sps:$4 sm:$0xff]   ;;  %v5630_v2 = vld [vmem:[%s7080_s9 + $0x1a0] ss:$8 sps:$4 sm:$0xff]   ;;  %v5633_v4 = vld [vmem:[%s7080_s9 + $0x90] ss:$8 sps:$4 sm:$0xff]  }
 0x1b9   : > { %4356 = vmatprep.subr.bf16.mxu0 %v5577_v29  ;;  %4399 = vmatprep.subr.bf16.mxu1 %v5580_v31  ;;  %v5634_v3 = vld [vmem:[%s7080_s9 + $0x194] ss:$8 sps:$4 sm:$0xff]   ;;  %v5637_v5 = vld [vmem:[%s7080_s9 + $0x84] ss:$8 sps:$4 sm:$0xff]   ;;  %v5636_v6 = vld [vmem:[%s7080_s9 + $0x190] ss:$8 sps:$4 sm:$0xff]  }
 0x1ba   : > { %v5640_v7 = vld [vmem:[%s7080_s9 + $0x184] ss:$8 sps:$4 sm:$0xff]   ;;  %v5639_v8 = vld [vmem:[%s7080_s9 + $0x80] ss:$8 sps:$4 sm:$0xff]   ;;  %v5648_v10 = vld [vmem:[%s7080_s9 + $0x274] ss:$8 sps:$4 sm:$0xff]  }
 0x1bb   : > { %v5642_v9 = vld [vmem:[%s7570_s0] ss:$100 sps:$4 sm:$0xff]   ;;  %v5649_v12 = vld [vmem:[%s7570_s0 + $0x8] ss:$100 sps:$4 sm:$0xff]   ;;  %v5654_v13 = vld [vmem:[%s7080_s9 + $0x374] ss:$8 sps:$4 sm:$0xff]  }
 0x1bc   : > { %4357 = vmatpush1.bf16.msra.mxu0 %v5579_v32  ;;  %4400 = vmatpush1.bf16.msra.mxu1 %v5582_v34  ;;  %v5645_v11 = vld [vmem:[%s7080_s9 + $0x180] ss:$8 sps:$4 sm:$0xff]   ;;  %v5646_v14 = vld [vmem:[%s7080_s9 + $0x270] ss:$8 sps:$4 sm:$0xff]   ;;  %v5657_v16 = vld [vmem:[%s7080_s9 + $0x264] ss:$8 sps:$4 sm:$0xff]  }
 0x1bd   : > { %4358 = vmatprep.subr.bf16.mxu0 %v5583_v33  ;;  %4401 = vmatprep.subr.bf16.mxu1 %v5586_v35  ;;  %v5747_v15 = vld [vmem:[%s7570_s0 + $0x14] ss:$100 sps:$4 sm:$0xff]   ;;  %v5660_v18 = vld [vmem:[%s7080_s9 + $0x364] ss:$8 sps:$4 sm:$0xff]   ;;  %v5655_v19 = vld [vmem:[%s7080_s9 + $0x260] ss:$8 sps:$4 sm:$0xff]  }
 0x1be   : > { %v5652_v17 = vld [vmem:[%s7080_s9 + $0x370] ss:$8 sps:$4 sm:$0xff]   ;;  %v5663_v20 = vld [vmem:[%s7080_s9 + $0x254] ss:$8 sps:$4 sm:$0xff]   ;;  %v5658_v21 = vld [vmem:[%s7080_s9 + $0x360] ss:$8 sps:$4 sm:$0xff]  }
 0x1bf   : > { %v5666_v22 = vld [vmem:[%s7080_s9 + $0x354] ss:$8 sps:$4 sm:$0xff]   ;;  %v5661_v23 = vld [vmem:[%s7080_s9 + $0x250] ss:$8 sps:$4 sm:$0xff]   ;;  %v5669_v24 = vld [vmem:[%s7080_s9 + $0x244] ss:$8 sps:$4 sm:$0xff]  }
 0x1c0   : > { %4359 = vmatpush1.bf16.msra.mxu0 %v5585_v36  ;;  %4402 = vmatpush1.bf16.msra.mxu1 %v5588_v38  ;;  %v5664_v25 = vld [vmem:[%s7080_s9 + $0x350] ss:$8 sps:$4 sm:$0xff]   ;;  %v5672_v26 = vld [vmem:[%s7080_s9 + $0x344] ss:$8 sps:$4 sm:$0xff]   ;;  %v5667_v27 = vld [vmem:[%s7080_s9 + $0x240] ss:$8 sps:$4 sm:$0xff]  }
 0x1c1   : > { %4360 = vmatprep.subr.bf16.mxu0 %v5589_v37  ;;  %4403 = vmatprep.subr.bf16.mxu1 %v5592_v39  ;;  %v5675_v28 = vld [vmem:[%s7080_s9 + $0x234] ss:$8 sps:$4 sm:$0xff]   ;;  %v5670_v29 = vld [vmem:[%s7080_s9 + $0x340] ss:$8 sps:$4 sm:$0xff]   ;;  %v5673_v31 = vld [vmem:[%s7080_s9 + $0x230] ss:$8 sps:$4 sm:$0xff]  }
 0x1c2   : > { %v5678_v30 = vld [vmem:[%s7080_s9 + $0x334] ss:$8 sps:$4 sm:$0xff]   ;;  %v5681_v32 = vld [vmem:[%s7080_s9 + $0x224] ss:$8 sps:$4 sm:$0xff]   ;;  %v5676_v33 = vld [vmem:[%s7080_s9 + $0x330] ss:$8 sps:$4 sm:$0xff]  }
 0x1c3   : > { %v5684_v34 = vld [vmem:[%s7080_s9 + $0x324] ss:$8 sps:$4 sm:$0xff]   ;;  %v5679_v35 = vld [vmem:[%s7080_s9 + $0x220] ss:$8 sps:$4 sm:$0xff]   ;;  %v5687_v36 = vld [vmem:[%s7080_s9 + $0x214] ss:$8 sps:$4 sm:$0xff]  }
 0x1c4   : > { %4361 = vmatpush1.bf16.msra.mxu0 %v5591_v40  ;;  %4404 = vmatpush1.bf16.msra.mxu1 %v5594_v42  ;;  %v5682_v37 = vld [vmem:[%s7080_s9 + $0x320] ss:$8 sps:$4 sm:$0xff]   ;;  %v5690_v38 = vld [vmem:[%s7080_s9 + $0x314] ss:$8 sps:$4 sm:$0xff]   ;;  %v5685_v39 = vld [vmem:[%s7080_s9 + $0x210] ss:$8 sps:$4 sm:$0xff]  }
 0x1c5   : > { %4362 = vmatprep.subr.bf16.mxu0 %v5595_v41  ;;  %4405 = vmatprep.subr.bf16.mxu1 %v5598_v43  ;;  %v5753_v40 = vld [vmem:[%s7570_s0 + $0x1c] ss:$100 sps:$4 sm:$0xff]   ;;  %v5693_v41 = vld [vmem:[%s7080_s9 + $0x204] ss:$8 sps:$4 sm:$0xff]   ;;  %v5688_v42 = vld [vmem:[%s7080_s9 + $0x310] ss:$8 sps:$4 sm:$0xff]  }
 0x1c6   : > { %v5696_v43 = vld [vmem:[%s7080_s9 + $0x304] ss:$8 sps:$4 sm:$0xff]   ;;  %vm4342_vm0 = vcmask 523264   ;;  %s5503_s12 = sshll.u32 (%p6268_p6), %s6202_s14, 3 }
 0x1c7   : > { %s4935_s11 = scalar_lea.vmem (%p6268_p6), %s7573_s3, %s5503_s12 }
 0x1c8   : > { %4363 = vmatpush2.bf16.msra.mxu0 %v5597_v44  ;;  %4406 = vmatpush2.bf16.msra.mxu1 %v5600_v46  ;;  %v5691_v44 = vld [vmem:[%s7080_s9 + $0x200] ss:$8 sps:$4 sm:$0xff]  }
 0x1c9   : > { %4364 = vmatprep.subr.bf16.mxu0 %v5601_v45  ;;  %4407 = vmatprep.subr.bf16.mxu1 %v5604_v47  ;;  %v5699_v45 = vld [vmem:[%s7080_s9 + $0x2f4] ss:$8 sps:$4 sm:$0xff]   ;;  %v5694_v46 = vld [vmem:[%s7080_s9 + $0x300] ss:$8 sps:$4 sm:$0xff]  }
 0x1ca   : > { %v5702_v47 = vld [vmem:[%s7080_s9 + $0x3f4] ss:$8 sps:$4 sm:$0xff]  }
 0x1cc   : > { %4365 = vmatpush2.bf16.msra.mxu0 %v5603_v48  ;;  %4408 = vmatpush2.bf16.msra.mxu1 %v5606_v50  ;;  %v5697_v48 = vld [vmem:[%s7080_s9 + $0x2f0] ss:$8 sps:$4 sm:$0xff]  }
 0x1cd   : > { %4366 = vmatprep.subr.bf16.mxu0 %v5607_v49  ;;  %4409 = vmatprep.subr.bf16.mxu1 %v5610_v51  ;;  %v5705_v49 = vld [vmem:[%s7080_s9 + $0x2e4] ss:$8 sps:$4 sm:$0xff]   ;;  %v5700_v50 = vld [vmem:[%s7080_s9 + $0x3f0] ss:$8 sps:$4 sm:$0xff]  }
 0x1ce   : > { %v5708_v51 = vld [vmem:[%s7080_s9 + $0x3e4] ss:$8 sps:$4 sm:$0xff]  }
 0x1d0   : > { %4367 = vmatpush2.bf16.msra.mxu0 %v5609_v52  ;;  %4410 = vmatpush2.bf16.msra.mxu1 %v5612_v54  ;;  %v5703_v52 = vld [vmem:[%s7080_s9 + $0x2e0] ss:$8 sps:$4 sm:$0xff]  }
 0x1d1   : > { %4368 = vmatprep.subr.bf16.mxu0 %v5613_v53  ;;  %4411 = vmatprep.subr.bf16.mxu1 %v5616_v55  ;;  %v5711_v53 = vld [vmem:[%s7080_s9 + $0x2d4] ss:$8 sps:$4 sm:$0xff]   ;;  %v5706_v54 = vld [vmem:[%s7080_s9 + $0x3e0] ss:$8 sps:$4 sm:$0xff]  }
 0x1d2   : > { %v5714_v55 = vld [vmem:[%s7080_s9 + $0x3d4] ss:$8 sps:$4 sm:$0xff]  }
 0x1d4   : > { %4369 = vmatpush2.bf16.msra.mxu0 %v5615_v56  ;;  %4412 = vmatpush2.bf16.msra.mxu1 %v5618_v58  ;;  %v5709_v56 = vld [vmem:[%s7080_s9 + $0x2d0] ss:$8 sps:$4 sm:$0xff]  }
 0x1d5   : > { %4370 = vmatprep.subr.bf16.mxu0 %v5619_v57  ;;  %4413 = vmatprep.subr.bf16.mxu1 %v5622_v59  ;;  %v5717_v57 = vld [vmem:[%s7080_s9 + $0x2c4] ss:$8 sps:$4 sm:$0xff]   ;;  %v5712_v58 = vld [vmem:[%s7080_s9 + $0x3d0] ss:$8 sps:$4 sm:$0xff]  }
 0x1d6   : > { %v5720_v59 = vld [vmem:[%s7080_s9 + $0x3c4] ss:$8 sps:$4 sm:$0xff]  }
 0x1d8   : > { %4371 = vmatpush2.bf16.msra.mxu0 %v5621_v60  ;;  %4414 = vmatpush2.bf16.msra.mxu1 %v5624_v62  ;;  %v5715_v60 = vld [vmem:[%s7080_s9 + $0x2c0] ss:$8 sps:$4 sm:$0xff]  }
 0x1d9   : > { %4372 = vmatprep.subr.bf16.mxu0 %v5625_v61  ;;  %4415 = vmatprep.subr.bf16.mxu1 %v5628_v63  ;;  %v5723_v61 = vld [vmem:[%s7080_s9 + $0x2b4] ss:$8 sps:$4 sm:$0xff]   ;;  %v5718_v62 = vld [vmem:[%s7080_s9 + $0x3c0] ss:$8 sps:$4 sm:$0xff]  }
 0x1da   : > { %v5726_v63 = vld [vmem:[%s7080_s9 + $0x3b4] ss:$8 sps:$4 sm:$0xff]  }
 0x1dc   : > { %4373 = vmatpush2.bf16.msra.mxu0 %v5627_v0  ;;  %4416 = vmatpush2.bf16.msra.mxu1 %v5630_v2  ;;  %v5721_v0 = vld [vmem:[%s7080_s9 + $0x2b0] ss:$8 sps:$4 sm:$0xff]  }
 0x1dd   : > { %4374 = vmatprep.subr.bf16.mxu0 %v5631_v1  ;;  %4417 = vmatprep.subr.bf16.mxu1 %v5634_v3  ;;  %v5729_v1 = vld [vmem:[%s7080_s9 + $0x2a4] ss:$8 sps:$4 sm:$0xff]   ;;  %v5724_v2 = vld [vmem:[%s7080_s9 + $0x3b0] ss:$8 sps:$4 sm:$0xff]  }
 0x1de   : > { %v5732_v3 = vld [vmem:[%s7080_s9 + $0x3a4] ss:$8 sps:$4 sm:$0xff]  }
 0x1e0   : > { %4375 = vmatpush2.bf16.msra.mxu0 %v5633_v4  ;;  %4418 = vmatpush2.bf16.msra.mxu1 %v5636_v6  ;;  %v5727_v4 = vld [vmem:[%s7080_s9 + $0x2a0] ss:$8 sps:$4 sm:$0xff]  }
 0x1e1   : > { %4376 = vmatprep.subr.bf16.mxu0 %v5637_v5  ;;  %4419 = vmatprep.subr.bf16.mxu1 %v5640_v7  ;;  %v5735_v5 = vld [vmem:[%s7080_s9 + $0x294] ss:$8 sps:$4 sm:$0xff]   ;;  %v5730_v6 = vld [vmem:[%s7080_s9 + $0x3a0] ss:$8 sps:$4 sm:$0xff]  }
 0x1e2   : > { %v5738_v7 = vld [vmem:[%s7080_s9 + $0x394] ss:$8 sps:$4 sm:$0xff]  }
 0x1e4   : > { %4377 = vmatpush2.bf16.msra.mxu0 %v5639_v8  ;;  %4420 = vmatpush2.bf16.msra.mxu1 %v5645_v11  ;;  %v5733_v8 = vld [vmem:[%s7080_s9 + $0x290] ss:$8 sps:$4 sm:$0xff]   ;;  %v5744_v11 = vld [vmem:[%s7080_s9 + $0x384] ss:$8 sps:$4 sm:$0xff]  }
 0x1e5   : > { %4432 = vmatprep.subr.bf16.mxu0 %v5648_v10  ;;  %4475 = vmatprep.subr.bf16.mxu1 %v5654_v13  ;;  %v5736_v10 = vld [vmem:[%s7080_s9 + $0x390] ss:$8 sps:$4 sm:$0xff]   ;;  %v5750_v13 = vld [vmem:[%s7080_s9 + $0x474] ss:$8 sps:$4 sm:$0xff]  }
 0x1e7   : > { %4379 = vmatmul.mubr.bf16.vlgmr.msra.gmra.mxu0 %v5642_v9  ;;  %4422 = vmatmul.mubr.bf16.vlgmr.msra.gmra.mxu1 %v5649_v12  ;;  %v5741_v9 = vld [vmem:[%s7080_s9 + $0x284] ss:$8 sps:$4 sm:$0xff]   ;;  %v5739_v12 = vld [vmem:[%s7080_s9 + $0x280] ss:$8 sps:$4 sm:$0xff]  }
 0x1e8   : > { %4433 = vmatpush1.bf16.msra.mxu0 %v5646_v14  ;;  %4464 = vmatprep.mubr.bf16.mxu0 %v5747_v15  ;;  %v5742_v14 = vld [vmem:[%s7080_s9 + $0x380] ss:$8 sps:$4 sm:$0xff]   ;;  %v5745_v15 = vld [vmem:[%s7570_s0 + $0x10] ss:$100 sps:$4 sm:$0xff]  }
 0x1e9   : > { %4434 = vmatprep.subr.bf16.mxu0 %v5657_v16  ;;  %4476 = vmatpush1.bf16.msra.mxu1 %v5652_v17  ;;  %v5756_v16 = vld [vmem:[%s7080_s9 + $0x574] ss:$8 sps:$4 sm:$0xff]   ;;  %v5748_v17 = vld [vmem:[%s7080_s9 + $0x470] ss:$8 sps:$4 sm:$0xff]  }
 0x1ea   : > { %4477 = vmatprep.subr.bf16.mxu1 %v5660_v18  ;;  %4507 = vmatprep.mubr.bf16.mxu1 %v5753_v40  ;;  %v5751_v18 = vld [vmem:[%s7570_s0 + $0x18] ss:$100 sps:$4 sm:$0xff]   ;;  %v5781_v40 = vld [vmem:[%s7080_s9 + $0x420] ss:$8 sps:$4 sm:$0xff]  }
 0x1ec   : > { %4435 = vmatpush1.bf16.msra.mxu0 %v5655_v19  ;;  %v5759_v19 = vld [vmem:[%s7080_s9 + $0x464] ss:$8 sps:$4 sm:$0xff]  }
 0x1ed   : > { %4436 = vmatprep.subr.bf16.mxu0 %v5663_v20  ;;  %4478 = vmatpush1.bf16.msra.mxu1 %v5658_v21  ;;  %v5754_v20 = vld [vmem:[%s7080_s9 + $0x570] ss:$8 sps:$4 sm:$0xff]   ;;  %v5762_v21 = vld [vmem:[%s7080_s9 + $0x564] ss:$8 sps:$4 sm:$0xff]  }
 0x1ee   : > { %4479 = vmatprep.subr.bf16.mxu1 %v5666_v22  ;;  %v5849_v22 = vld [vmem:[%s7570_s0 + $0x24] ss:$100 sps:$4 sm:$0xff]  }
 0x1f0   : > { %4437 = vmatpush1.bf16.msra.mxu0 %v5661_v23  ;;  %v5757_v23 = vld [vmem:[%s7080_s9 + $0x460] ss:$8 sps:$4 sm:$0xff]  }
 0x1f1   : > { %4438 = vmatprep.subr.bf16.mxu0 %v5669_v24  ;;  %4480 = vmatpush1.bf16.msra.mxu1 %v5664_v25  ;;  %v5760_v24 = vld [vmem:[%s7080_s9 + $0x560] ss:$8 sps:$4 sm:$0xff]   ;;  %v5765_v25 = vld [vmem:[%s7080_s9 + $0x454] ss:$8 sps:$4 sm:$0xff]  }
 0x1f2   : > { %4481 = vmatprep.subr.bf16.mxu1 %v5672_v26  ;;  %v5855_v26 = vld [vmem:[%s7570_s0 + $0x2c] ss:$100 sps:$4 sm:$0xff]  }
 0x1f4   : > { %4439 = vmatpush1.bf16.msra.mxu0 %v5667_v27  ;;  %v5768_v27 = vld [vmem:[%s7080_s9 + $0x554] ss:$8 sps:$4 sm:$0xff]  }
 0x1f5   : > { %4440 = vmatprep.subr.bf16.mxu0 %v5675_v28  ;;  %4482 = vmatpush1.bf16.msra.mxu1 %v5670_v29  ;;  %v5763_v28 = vld [vmem:[%s7080_s9 + $0x450] ss:$8 sps:$4 sm:$0xff]   ;;  %v5771_v29 = vld [vmem:[%s7080_s9 + $0x444] ss:$8 sps:$4 sm:$0xff]  }
 0x1f6   : > { %4483 = vmatprep.subr.bf16.mxu1 %v5678_v30  ;;  %v5766_v30 = vld [vmem:[%s7080_s9 + $0x550] ss:$8 sps:$4 sm:$0xff]  }
 0x1f8   : > { %4441 = vmatpush1.bf16.msra.mxu0 %v5673_v31  ;;  %v5774_v31 = vld [vmem:[%s7080_s9 + $0x544] ss:$8 sps:$4 sm:$0xff]  }
 0x1f9   : > { %4442 = vmatprep.subr.bf16.mxu0 %v5681_v32  ;;  %4484 = vmatpush1.bf16.msra.mxu1 %v5676_v33  ;;  %v5769_v32 = vld [vmem:[%s7080_s9 + $0x440] ss:$8 sps:$4 sm:$0xff]   ;;  %v5777_v33 = vld [vmem:[%s7080_s9 + $0x434] ss:$8 sps:$4 sm:$0xff]  }
 0x1fa   : > { %4485 = vmatprep.subr.bf16.mxu1 %v5684_v34  ;;  %v5772_v34 = vld [vmem:[%s7080_s9 + $0x540] ss:$8 sps:$4 sm:$0xff]  }
 0x1fc   : > { %4443 = vmatpush1.bf16.msra.mxu0 %v5679_v35  ;;  %v5780_v35 = vld [vmem:[%s7080_s9 + $0x534] ss:$8 sps:$4 sm:$0xff]  }
 0x1fd   : > { %4444 = vmatprep.subr.bf16.mxu0 %v5687_v36  ;;  %4486 = vmatpush1.bf16.msra.mxu1 %v5682_v37  ;;  %v5775_v36 = vld [vmem:[%s7080_s9 + $0x430] ss:$8 sps:$4 sm:$0xff]   ;;  %v5783_v37 = vld [vmem:[%s7080_s9 + $0x424] ss:$8 sps:$4 sm:$0xff]  }
 0x1fe   : > { %4487 = vmatprep.subr.bf16.mxu1 %v5690_v38  ;;  %v5778_v38 = vld [vmem:[%s7080_s9 + $0x530] ss:$8 sps:$4 sm:$0xff]  }
 0x200   : > { %4445 = vmatpush1.bf16.msra.mxu0 %v5685_v39  ;;  %v5786_v39 = vld [vmem:[%s7080_s9 + $0x524] ss:$8 sps:$4 sm:$0xff]  }
 0x201   : > { %4446 = vmatprep.subr.bf16.mxu0 %v5693_v41  ;;  %4488 = vmatpush1.bf16.msra.mxu1 %v5688_v42  ;;  %v5789_v41 = vld [vmem:[%s7080_s9 + $0x414] ss:$8 sps:$4 sm:$0xff]   ;;  %v5784_v42 = vld [vmem:[%s7080_s9 + $0x520] ss:$8 sps:$4 sm:$0xff]  }
 0x202   : > { %4489 = vmatprep.subr.bf16.mxu1 %v5696_v43  ;;  %v5792_v43 = vld [vmem:[%s7080_s9 + $0x514] ss:$8 sps:$4 sm:$0xff]  }
 0x204   : > { %4447 = vmatpush1.bf16.msra.mxu0 %v5691_v44  ;;  %v5787_v44 = vld [vmem:[%s7080_s9 + $0x410] ss:$8 sps:$4 sm:$0xff]  }
 0x205   : > { %4448 = vmatprep.subr.bf16.mxu0 %v5699_v45  ;;  %4490 = vmatpush1.bf16.msra.mxu1 %v5694_v46  ;;  %v5795_v45 = vld [vmem:[%s7080_s9 + $0x404] ss:$8 sps:$4 sm:$0xff]   ;;  %v5790_v46 = vld [vmem:[%s7080_s9 + $0x510] ss:$8 sps:$4 sm:$0xff]  }
 0x206   : > { %4491 = vmatprep.subr.bf16.mxu1 %v5702_v47  ;;  %v5798_v47 = vld [vmem:[%s7080_s9 + $0x504] ss:$8 sps:$4 sm:$0xff]  }
 0x208   : > { %4449 = vmatpush2.bf16.msra.mxu0 %v5697_v48  ;;  %v5793_v48 = vld [vmem:[%s7080_s9 + $0x400] ss:$8 sps:$4 sm:$0xff]  }
 0x209   : > { %4450 = vmatprep.subr.bf16.mxu0 %v5705_v49  ;;  %4492 = vmatpush2.bf16.msra.mxu1 %v5700_v50  ;;  %v5801_v49 = vld [vmem:[%s7080_s9 + $0x4f4] ss:$8 sps:$4 sm:$0xff]   ;;  %v5796_v50 = vld [vmem:[%s7080_s9 + $0x500] ss:$8 sps:$4 sm:$0xff]  }
 0x20a   : > { %4493 = vmatprep.subr.bf16.mxu1 %v5708_v51  ;;  %v5804_v51 = vld [vmem:[%s7080_s9 + $0x5f4] ss:$8 sps:$4 sm:$0xff]  }
 0x20c   : > { %4451 = vmatpush2.bf16.msra.mxu0 %v5703_v52  ;;  %v5799_v52 = vld [vmem:[%s7080_s9 + $0x4f0] ss:$8 sps:$4 sm:$0xff]  }
 0x20d   : > { %4452 = vmatprep.subr.bf16.mxu0 %v5711_v53  ;;  %4494 = vmatpush2.bf16.msra.mxu1 %v5706_v54  ;;  %v5807_v53 = vld [vmem:[%s7080_s9 + $0x4e4] ss:$8 sps:$4 sm:$0xff]   ;;  %v5802_v54 = vld [vmem:[%s7080_s9 + $0x5f0] ss:$8 sps:$4 sm:$0xff]  }
 0x20e   : > { %4495 = vmatprep.subr.bf16.mxu1 %v5714_v55  ;;  %v5810_v55 = vld [vmem:[%s7080_s9 + $0x5e4] ss:$8 sps:$4 sm:$0xff]  }
 0x210   : > { %4453 = vmatpush2.bf16.msra.mxu0 %v5709_v56  ;;  %v5805_v56 = vld [vmem:[%s7080_s9 + $0x4e0] ss:$8 sps:$4 sm:$0xff]  }
 0x211   : > { %4454 = vmatprep.subr.bf16.mxu0 %v5717_v57  ;;  %4496 = vmatpush2.bf16.msra.mxu1 %v5712_v58  ;;  %v5813_v57 = vld [vmem:[%s7080_s9 + $0x4d4] ss:$8 sps:$4 sm:$0xff]   ;;  %v5808_v58 = vld [vmem:[%s7080_s9 + $0x5e0] ss:$8 sps:$4 sm:$0xff]  }
 0x212   : > { %4497 = vmatprep.subr.bf16.mxu1 %v5720_v59  ;;  %v5816_v59 = vld [vmem:[%s7080_s9 + $0x5d4] ss:$8 sps:$4 sm:$0xff]  }
 0x214   : > { %4455 = vmatpush2.bf16.msra.mxu0 %v5715_v60  ;;  %v5811_v60 = vld [vmem:[%s7080_s9 + $0x4d0] ss:$8 sps:$4 sm:$0xff]  }
 0x215   : > { %4456 = vmatprep.subr.bf16.mxu0 %v5723_v61  ;;  %4498 = vmatpush2.bf16.msra.mxu1 %v5718_v62  ;;  %v5819_v61 = vld [vmem:[%s7080_s9 + $0x4c4] ss:$8 sps:$4 sm:$0xff]   ;;  %v5814_v62 = vld [vmem:[%s7080_s9 + $0x5d0] ss:$8 sps:$4 sm:$0xff]  }
 0x216   : > { %4499 = vmatprep.subr.bf16.mxu1 %v5726_v63  ;;  %v5822_v63 = vld [vmem:[%s7080_s9 + $0x5c4] ss:$8 sps:$4 sm:$0xff]  }
 0x218   : > { %4457 = vmatpush2.bf16.msra.mxu0 %v5721_v0  ;;  %v5817_v0 = vld [vmem:[%s7080_s9 + $0x4c0] ss:$8 sps:$4 sm:$0xff]  }
 0x219   : > { %4458 = vmatprep.subr.bf16.mxu0 %v5729_v1  ;;  %4500 = vmatpush2.bf16.msra.mxu1 %v5724_v2  ;;  %v5825_v1 = vld [vmem:[%s7080_s9 + $0x4b4] ss:$8 sps:$4 sm:$0xff]   ;;  %v5820_v2 = vld [vmem:[%s7080_s9 + $0x5c0] ss:$8 sps:$4 sm:$0xff]  }
 0x21a   : > { %4501 = vmatprep.subr.bf16.mxu1 %v5732_v3  ;;  %v5828_v3 = vld [vmem:[%s7080_s9 + $0x5b4] ss:$8 sps:$4 sm:$0xff]  }
 0x21c   : > { %4459 = vmatpush2.bf16.msra.mxu0 %v5727_v4  ;;  %v5823_v4 = vld [vmem:[%s7080_s9 + $0x4b0] ss:$8 sps:$4 sm:$0xff]  }
 0x21d   : > { %4460 = vmatprep.subr.bf16.mxu0 %v5735_v5  ;;  %4502 = vmatpush2.bf16.msra.mxu1 %v5730_v6  ;;  %v5831_v5 = vld [vmem:[%s7080_s9 + $0x4a4] ss:$8 sps:$4 sm:$0xff]   ;;  %v5826_v6 = vld [vmem:[%s7080_s9 + $0x5b0] ss:$8 sps:$4 sm:$0xff]  }
 0x21e   : > { %4503 = vmatprep.subr.bf16.mxu1 %v5738_v7  ;;  %v5834_v7 = vld [vmem:[%s7080_s9 + $0x5a4] ss:$8 sps:$4 sm:$0xff]  }
 0x220   : > { %4461 = vmatpush2.bf16.msra.mxu0 %v5733_v8  ;;  %v5829_v8 = vld [vmem:[%s7080_s9 + $0x4a0] ss:$8 sps:$4 sm:$0xff]  }
 0x221   : > { %4462 = vmatprep.subr.bf16.mxu0 %v5741_v9  ;;  %4504 = vmatpush2.bf16.msra.mxu1 %v5736_v10  ;;  %v5837_v9 = vld [vmem:[%s7080_s9 + $0x494] ss:$8 sps:$4 sm:$0xff]   ;;  %v5832_v10 = vld [vmem:[%s7080_s9 + $0x5a0] ss:$8 sps:$4 sm:$0xff]  }
 0x222   : > { %4505 = vmatprep.subr.bf16.mxu1 %v5744_v11  ;;  %v5840_v11 = vld [vmem:[%s7080_s9 + $0x594] ss:$8 sps:$4 sm:$0xff]  }
 0x224   : > { %4463 = vmatpush2.bf16.msra.mxu0 %v5739_v12  ;;  %v5835_v12 = vld [vmem:[%s7080_s9 + $0x490] ss:$8 sps:$4 sm:$0xff]  }
 0x225   : > { %4518 = vmatprep.subr.bf16.mxu0 %v5750_v13  ;;  %4506 = vmatpush2.bf16.msra.mxu1 %v5742_v14  ;;  %v5843_v13 = vld [vmem:[%s7080_s9 + $0x484] ss:$8 sps:$4 sm:$0xff]   ;;  %v5838_v14 = vld [vmem:[%s7080_s9 + $0x590] ss:$8 sps:$4 sm:$0xff]  }
 0x226   : > { %4561 = vmatprep.subr.bf16.mxu1 %v5756_v16  ;;  %v5846_v16 = vld [vmem:[%s7080_s9 + $0x584] ss:$8 sps:$4 sm:$0xff]  }
 0x227   : > { %4465 = vmatmul.mubr.bf16.vlgmr.msra.gmra.mxu0 %v5745_v15  ;;  %v5841_v15 = vld [vmem:[%s7080_s9 + $0x480] ss:$8 sps:$4 sm:$0xff]  }
 0x228   : > { %4519 = vmatpush1.bf16.msra.mxu0 %v5748_v17  ;;  %4508 = vmatmul.mubr.bf16.vlgmr.msra.gmra.mxu1 %v5751_v18  ;;  %v5844_v17 = vld [vmem:[%s7080_s9 + $0x580] ss:$8 sps:$4 sm:$0xff]   ;;  %v5852_v18 = vld [vmem:[%s7080_s9 + $0x674] ss:$8 sps:$4 sm:$0xff]  }
 0x229   : > { %4520 = vmatprep.subr.bf16.mxu0 %v5759_v19  ;;  %4562 = vmatpush1.bf16.msra.mxu1 %v5754_v20  ;;  %v5847_v19 = vld [vmem:[%s7570_s0 + $0x20] ss:$100 sps:$4 sm:$0xff]   ;;  %v5850_v20 = vld [vmem:[%s7080_s9 + $0x670] ss:$8 sps:$4 sm:$0xff]  }
 0x22a   : > { %4550 = vmatprep.mubr.bf16.mxu0 %v5849_v22  ;;  %4563 = vmatprep.subr.bf16.mxu1 %v5762_v21  ;;  %v5853_v21 = vld [vmem:[%s7570_s0 + $0x28] ss:$100 sps:$4 sm:$0xff]   ;;  %v5858_v22 = vld [vmem:[%s7080_s9 + $0x774] ss:$8 sps:$4 sm:$0xff]  }
 0x22b   : > { %4593 = vmatprep.mubr.bf16.mxu1 %v5855_v26  ;;  %v5957_v26 = vld [vmem:[%s7570_s0 + $0x3c] ss:$100 sps:$4 sm:$0xff]  }
 0x22c   : > { %4521 = vmatpush1.bf16.msra.mxu0 %v5757_v23  ;;  %v5951_v23 = vld [vmem:[%s7570_s0 + $0x34] ss:$100 sps:$4 sm:$0xff]  }
 0x22d   : > { %4522 = vmatprep.subr.bf16.mxu0 %v5765_v25  ;;  %4564 = vmatpush1.bf16.msra.mxu1 %v5760_v24  ;;  %v5861_v24 = vld [vmem:[%s7080_s9 + $0x664] ss:$8 sps:$4 sm:$0xff]   ;;  %v5856_v25 = vld [vmem:[%s7080_s9 + $0x770] ss:$8 sps:$4 sm:$0xff]  }
 0x22e   : > { %4565 = vmatprep.subr.bf16.mxu1 %v5768_v27  ;;  %v5864_v27 = vld [vmem:[%s7080_s9 + $0x764] ss:$8 sps:$4 sm:$0xff]  }
 0x230   : > { %4523 = vmatpush1.bf16.msra.mxu0 %v5763_v28  ;;  %v5859_v28 = vld [vmem:[%s7080_s9 + $0x660] ss:$8 sps:$4 sm:$0xff]  }
 0x231   : > { %4524 = vmatprep.subr.bf16.mxu0 %v5771_v29  ;;  %4566 = vmatpush1.bf16.msra.mxu1 %v5766_v30  ;;  %v5867_v29 = vld [vmem:[%s7080_s9 + $0x654] ss:$8 sps:$4 sm:$0xff]   ;;  %v5862_v30 = vld [vmem:[%s7080_s9 + $0x760] ss:$8 sps:$4 sm:$0xff]  }
 0x232   : > { %4567 = vmatprep.subr.bf16.mxu1 %v5774_v31  ;;  %v5870_v31 = vld [vmem:[%s7080_s9 + $0x754] ss:$8 sps:$4 sm:$0xff]  }
 0x234   : > { %4525 = vmatpush1.bf16.msra.mxu0 %v5769_v32  ;;  %v5865_v32 = vld [vmem:[%s7080_s9 + $0x650] ss:$8 sps:$4 sm:$0xff]  }
 0x235   : > { %4526 = vmatprep.subr.bf16.mxu0 %v5777_v33  ;;  %4568 = vmatpush1.bf16.msra.mxu1 %v5772_v34  ;;  %v5873_v33 = vld [vmem:[%s7080_s9 + $0x644] ss:$8 sps:$4 sm:$0xff]   ;;  %v5868_v34 = vld [vmem:[%s7080_s9 + $0x750] ss:$8 sps:$4 sm:$0xff]  }
 0x236   : > { %4569 = vmatprep.subr.bf16.mxu1 %v5780_v35  ;;  %v5876_v35 = vld [vmem:[%s7080_s9 + $0x744] ss:$8 sps:$4 sm:$0xff]  }
 0x238   : > { %4527 = vmatpush1.bf16.msra.mxu0 %v5775_v36  ;;  %v5871_v36 = vld [vmem:[%s7080_s9 + $0x640] ss:$8 sps:$4 sm:$0xff]  }
 0x239   : > { %4528 = vmatprep.subr.bf16.mxu0 %v5783_v37  ;;  %4570 = vmatpush1.bf16.msra.mxu1 %v5778_v38  ;;  %v5879_v37 = vld [vmem:[%s7080_s9 + $0x634] ss:$8 sps:$4 sm:$0xff]   ;;  %v5874_v38 = vld [vmem:[%s7080_s9 + $0x740] ss:$8 sps:$4 sm:$0xff]  }
 0x23a   : > { %4571 = vmatprep.subr.bf16.mxu1 %v5786_v39  ;;  %v5882_v39 = vld [vmem:[%s7080_s9 + $0x734] ss:$8 sps:$4 sm:$0xff]  }
 0x23c   : > { %4529 = vmatpush1.bf16.msra.mxu0 %v5781_v40  ;;  %v5877_v40 = vld [vmem:[%s7080_s9 + $0x630] ss:$8 sps:$4 sm:$0xff]  }
 0x23d   : > { %4530 = vmatprep.subr.bf16.mxu0 %v5789_v41  ;;  %4572 = vmatpush1.bf16.msra.mxu1 %v5784_v42  ;;  %v5885_v41 = vld [vmem:[%s7080_s9 + $0x624] ss:$8 sps:$4 sm:$0xff]   ;;  %v5880_v42 = vld [vmem:[%s7080_s9 + $0x730] ss:$8 sps:$4 sm:$0xff]  }
 0x23e   : > { %4573 = vmatprep.subr.bf16.mxu1 %v5792_v43  ;;  %v5888_v43 = vld [vmem:[%s7080_s9 + $0x724] ss:$8 sps:$4 sm:$0xff]  }
 0x240   : > { %4531 = vmatpush1.bf16.msra.mxu0 %v5787_v44  ;;  %v5883_v44 = vld [vmem:[%s7080_s9 + $0x620] ss:$8 sps:$4 sm:$0xff]  }
 0x241   : > { %4532 = vmatprep.subr.bf16.mxu0 %v5795_v45  ;;  %4574 = vmatpush1.bf16.msra.mxu1 %v5790_v46  ;;  %v5891_v45 = vld [vmem:[%s7080_s9 + $0x614] ss:$8 sps:$4 sm:$0xff]   ;;  %v5886_v46 = vld [vmem:[%s7080_s9 + $0x720] ss:$8 sps:$4 sm:$0xff]  }
 0x242   : > { %4575 = vmatprep.subr.bf16.mxu1 %v5798_v47  ;;  %v5894_v47 = vld [vmem:[%s7080_s9 + $0x714] ss:$8 sps:$4 sm:$0xff]  }
 0x244   : > { %4533 = vmatpush1.bf16.msra.mxu0 %v5793_v48  ;;  %v5889_v48 = vld [vmem:[%s7080_s9 + $0x610] ss:$8 sps:$4 sm:$0xff]  }
 0x245   : > { %4534 = vmatprep.subr.bf16.mxu0 %v5801_v49  ;;  %4576 = vmatpush1.bf16.msra.mxu1 %v5796_v50  ;;  %v5897_v49 = vld [vmem:[%s7080_s9 + $0x604] ss:$8 sps:$4 sm:$0xff]   ;;  %v5892_v50 = vld [vmem:[%s7080_s9 + $0x710] ss:$8 sps:$4 sm:$0xff]  }
 0x246   : > { %4577 = vmatprep.subr.bf16.mxu1 %v5804_v51  ;;  %v5900_v51 = vld [vmem:[%s7080_s9 + $0x704] ss:$8 sps:$4 sm:$0xff]  }
 0x248   : > { %4535 = vmatpush2.bf16.msra.mxu0 %v5799_v52  ;;  %v5895_v52 = vld [vmem:[%s7080_s9 + $0x600] ss:$8 sps:$4 sm:$0xff]  }
 0x249   : > { %4536 = vmatprep.subr.bf16.mxu0 %v5807_v53  ;;  %4578 = vmatpush2.bf16.msra.mxu1 %v5802_v54  ;;  %v5903_v53 = vld [vmem:[%s7080_s9 + $0x6f4] ss:$8 sps:$4 sm:$0xff]   ;;  %v5898_v54 = vld [vmem:[%s7080_s9 + $0x700] ss:$8 sps:$4 sm:$0xff]  }
 0x24a   : > { %4579 = vmatprep.subr.bf16.mxu1 %v5810_v55  ;;  %v5906_v55 = vld [vmem:[%s7080_s9 + $0x7f4] ss:$8 sps:$4 sm:$0xff]  }
 0x24c   : > { %4537 = vmatpush2.bf16.msra.mxu0 %v5805_v56  ;;  %v5901_v56 = vld [vmem:[%s7080_s9 + $0x6f0] ss:$8 sps:$4 sm:$0xff]  }
 0x24d   : > { %4538 = vmatprep.subr.bf16.mxu0 %v5813_v57  ;;  %4580 = vmatpush2.bf16.msra.mxu1 %v5808_v58  ;;  %v5909_v57 = vld [vmem:[%s7080_s9 + $0x6e4] ss:$8 sps:$4 sm:$0xff]   ;;  %v5904_v58 = vld [vmem:[%s7080_s9 + $0x7f0] ss:$8 sps:$4 sm:$0xff]  }
 0x24e   : > { %4581 = vmatprep.subr.bf16.mxu1 %v5816_v59  ;;  %v5912_v59 = vld [vmem:[%s7080_s9 + $0x7e4] ss:$8 sps:$4 sm:$0xff]  }
 0x250   : > { %4539 = vmatpush2.bf16.msra.mxu0 %v5811_v60  ;;  %v5907_v60 = vld [vmem:[%s7080_s9 + $0x6e0] ss:$8 sps:$4 sm:$0xff]  }
 0x251   : > { %4540 = vmatprep.subr.bf16.mxu0 %v5819_v61  ;;  %4582 = vmatpush2.bf16.msra.mxu1 %v5814_v62  ;;  %v5915_v61 = vld [vmem:[%s7080_s9 + $0x6d4] ss:$8 sps:$4 sm:$0xff]   ;;  %v5910_v62 = vld [vmem:[%s7080_s9 + $0x7e0] ss:$8 sps:$4 sm:$0xff]  }
 0x252   : > { %4583 = vmatprep.subr.bf16.mxu1 %v5822_v63  ;;  %v5918_v63 = vld [vmem:[%s7080_s9 + $0x7d4] ss:$8 sps:$4 sm:$0xff]  }
 0x254   : > { %4541 = vmatpush2.bf16.msra.mxu0 %v5817_v0  ;;  %v5913_v0 = vld [vmem:[%s7080_s9 + $0x6d0] ss:$8 sps:$4 sm:$0xff]  }
 0x255   : > { %4542 = vmatprep.subr.bf16.mxu0 %v5825_v1  ;;  %4584 = vmatpush2.bf16.msra.mxu1 %v5820_v2  ;;  %v5921_v1 = vld [vmem:[%s7080_s9 + $0x6c4] ss:$8 sps:$4 sm:$0xff]   ;;  %v5916_v2 = vld [vmem:[%s7080_s9 + $0x7d0] ss:$8 sps:$4 sm:$0xff]  }
 0x256   : > { %4585 = vmatprep.subr.bf16.mxu1 %v5828_v3  ;;  %v5924_v3 = vld [vmem:[%s7080_s9 + $0x7c4] ss:$8 sps:$4 sm:$0xff]  }
 0x258   : > { %4543 = vmatpush2.bf16.msra.mxu0 %v5823_v4  ;;  %v5919_v4 = vld [vmem:[%s7080_s9 + $0x6c0] ss:$8 sps:$4 sm:$0xff]  }
 0x259   : > { %4544 = vmatprep.subr.bf16.mxu0 %v5831_v5  ;;  %4586 = vmatpush2.bf16.msra.mxu1 %v5826_v6  ;;  %v5927_v5 = vld [vmem:[%s7080_s9 + $0x6b4] ss:$8 sps:$4 sm:$0xff]   ;;  %v5922_v6 = vld [vmem:[%s7080_s9 + $0x7c0] ss:$8 sps:$4 sm:$0xff]  }
 0x25a   : > { %4587 = vmatprep.subr.bf16.mxu1 %v5834_v7  ;;  %v5930_v7 = vld [vmem:[%s7080_s9 + $0x7b4] ss:$8 sps:$4 sm:$0xff]  }
 0x25c   : > { %4545 = vmatpush2.bf16.msra.mxu0 %v5829_v8  ;;  %v5925_v8 = vld [vmem:[%s7080_s9 + $0x6b0] ss:$8 sps:$4 sm:$0xff]  }
 0x25d   : > { %4546 = vmatprep.subr.bf16.mxu0 %v5837_v9  ;;  %4588 = vmatpush2.bf16.msra.mxu1 %v5832_v10  ;;  %v5933_v9 = vld [vmem:[%s7080_s9 + $0x6a4] ss:$8 sps:$4 sm:$0xff]   ;;  %v5928_v10 = vld [vmem:[%s7080_s9 + $0x7b0] ss:$8 sps:$4 sm:$0xff]  }
 0x25e   : > { %4589 = vmatprep.subr.bf16.mxu1 %v5840_v11  ;;  %v5936_v11 = vld [vmem:[%s7080_s9 + $0x7a4] ss:$8 sps:$4 sm:$0xff]  }
 0x260   : > { %4547 = vmatpush2.bf16.msra.mxu0 %v5835_v12  ;;  %v5931_v12 = vld [vmem:[%s7080_s9 + $0x6a0] ss:$8 sps:$4 sm:$0xff]  }
 0x261   : > { %4548 = vmatprep.subr.bf16.mxu0 %v5843_v13  ;;  %4590 = vmatpush2.bf16.msra.mxu1 %v5838_v14  ;;  %v5939_v13 = vld [vmem:[%s7080_s9 + $0x694] ss:$8 sps:$4 sm:$0xff]   ;;  %v5934_v14 = vld [vmem:[%s7080_s9 + $0x7a0] ss:$8 sps:$4 sm:$0xff]  }
 0x262   : > { %4591 = vmatprep.subr.bf16.mxu1 %v5846_v16  ;;  %v5937_v16 = vld [vmem:[%s7080_s9 + $0x690] ss:$8 sps:$4 sm:$0xff]  }
 0x264   : > { %4549 = vmatpush2.bf16.msra.mxu0 %v5841_v15  ;;  %v5942_v15 = vld [vmem:[%s7080_s9 + $0x794] ss:$8 sps:$4 sm:$0xff]  }
 0x265   : > { %4604 = vmatprep.subr.bf16.mxu0 %v5852_v18  ;;  %4592 = vmatpush2.bf16.msra.mxu1 %v5844_v17  ;;  %v5945_v17 = vld [vmem:[%s7080_s9 + $0x684] ss:$8 sps:$4 sm:$0xff]   ;;  %v5940_v18 = vld [vmem:[%s7080_s9 + $0x790] ss:$8 sps:$4 sm:$0xff]  }
 0x266   : > { %4647 = vmatprep.subr.bf16.mxu1 %v5858_v22  ;;  %v5954_v22 = vld [vmem:[%s7080_s9 + $0x874] ss:$8 sps:$4 sm:$0xff]  }
 0x267   : > { %4551 = vmatmul.mubr.bf16.vlgmr.msra.gmra.mxu0 %v5847_v19  ;;  %v5943_v19 = vld [vmem:[%s7080_s9 + $0x680] ss:$8 sps:$4 sm:$0xff]  }
 0x268   : > { %4605 = vmatpush1.bf16.msra.mxu0 %v5850_v20  ;;  %4636 = vmatprep.mubr.bf16.mxu0 %v5951_v23  ;;  %v5948_v20 = vld [vmem:[%s7080_s9 + $0x784] ss:$8 sps:$4 sm:$0xff]   ;;  %v5949_v23 = vld [vmem:[%s7570_s0 + $0x30] ss:$100 sps:$4 sm:$0xff]  }
 0x269   : > { %4594 = vmatmul.mubr.bf16.vlgmr.msra.gmra.mxu1 %v5853_v21  ;;  %4606 = vmatprep.subr.bf16.mxu0 %v5861_v24  ;;  %v5946_v21 = vld [vmem:[%s7080_s9 + $0x780] ss:$8 sps:$4 sm:$0xff]   ;;  %v5952_v24 = vld [vmem:[%s7080_s9 + $0x870] ss:$8 sps:$4 sm:$0xff]  }
 0x26a   : > { %4648 = vmatpush1.bf16.msra.mxu1 %v5856_v25  ;;  %4679 = vmatprep.mubr.bf16.mxu1 %v5957_v26  ;;  %v5955_v25 = vld [vmem:[%s7570_s0 + $0x38] ss:$100 sps:$4 sm:$0xff]  }
 0x26b   : > { %4649 = vmatprep.subr.bf16.mxu1 %v5864_v27  ;;  %v5960_v26 = vld [vmem:[%s7080_s9 + $0x974] ss:$8 sps:$4 sm:$0xff]   ;;  %v6053_v27 = vld [vmem:[%s7570_s0 + $0x44] ss:$100 sps:$4 sm:$0xff]  }
 0x26c   : > { %4607 = vmatpush1.bf16.msra.mxu0 %v5859_v28  ;;  %v5963_v28 = vld [vmem:[%s7080_s9 + $0x864] ss:$8 sps:$4 sm:$0xff]  }
 0x26d   : > { %4608 = vmatprep.subr.bf16.mxu0 %v5867_v29  ;;  %v5958_v29 = vld [vmem:[%s7080_s9 + $0x970] ss:$8 sps:$4 sm:$0xff]  }
 0x26e   : > { %4650 = vmatpush1.bf16.msra.mxu1 %v5862_v30  ;;  %v6059_v30 = vld [vmem:[%s7570_s0 + $0x4c] ss:$100 sps:$4 sm:$0xff]  }
 0x26f   : > { %4651 = vmatprep.subr.bf16.mxu1 %v5870_v31  ;;  %v5966_v31 = vld [vmem:[%s7080_s9 + $0x964] ss:$8 sps:$4 sm:$0xff]  }
 0x270   : > { %4609 = vmatpush1.bf16.msra.mxu0 %v5865_v32  ;;  %v5961_v32 = vld [vmem:[%s7080_s9 + $0x860] ss:$8 sps:$4 sm:$0xff]  }
 0x271   : > { %4610 = vmatprep.subr.bf16.mxu0 %v5873_v33  ;;  %v5969_v33 = vld [vmem:[%s7080_s9 + $0x854] ss:$8 sps:$4 sm:$0xff]  }
 0x272   : > { %4652 = vmatpush1.bf16.msra.mxu1 %v5868_v34  ;;  %v5964_v34 = vld [vmem:[%s7080_s9 + $0x960] ss:$8 sps:$4 sm:$0xff]  }
 0x273   : > { %4653 = vmatprep.subr.bf16.mxu1 %v5876_v35  ;;  %v5972_v35 = vld [vmem:[%s7080_s9 + $0x954] ss:$8 sps:$4 sm:$0xff]  }
 0x274   : > { %4611 = vmatpush1.bf16.msra.mxu0 %v5871_v36  ;;  %v5967_v36 = vld [vmem:[%s7080_s9 + $0x850] ss:$8 sps:$4 sm:$0xff]  }
 0x275   : > { %4612 = vmatprep.subr.bf16.mxu0 %v5879_v37  ;;  %v5975_v37 = vld [vmem:[%s7080_s9 + $0x844] ss:$8 sps:$4 sm:$0xff]  }
 0x276   : > { %4654 = vmatpush1.bf16.msra.mxu1 %v5874_v38  ;;  %v5970_v38 = vld [vmem:[%s7080_s9 + $0x950] ss:$8 sps:$4 sm:$0xff]  }
 0x277   : > { %4655 = vmatprep.subr.bf16.mxu1 %v5882_v39  ;;  %v5978_v39 = vld [vmem:[%s7080_s9 + $0x944] ss:$8 sps:$4 sm:$0xff]  }
 0x278   : > { %4613 = vmatpush1.bf16.msra.mxu0 %v5877_v40  ;;  %v5973_v40 = vld [vmem:[%s7080_s9 + $0x840] ss:$8 sps:$4 sm:$0xff]  }
 0x279   : > { %4614 = vmatprep.subr.bf16.mxu0 %v5885_v41  ;;  %v5981_v41 = vld [vmem:[%s7080_s9 + $0x834] ss:$8 sps:$4 sm:$0xff]  }
 0x27a   : > { %4656 = vmatpush1.bf16.msra.mxu1 %v5880_v42  ;;  %v5976_v42 = vld [vmem:[%s7080_s9 + $0x940] ss:$8 sps:$4 sm:$0xff]  }
 0x27b   : > { %4657 = vmatprep.subr.bf16.mxu1 %v5888_v43  ;;  %v5984_v43 = vld [vmem:[%s7080_s9 + $0x934] ss:$8 sps:$4 sm:$0xff]  }
 0x27c   : > { %4615 = vmatpush1.bf16.msra.mxu0 %v5883_v44  ;;  %v5979_v44 = vld [vmem:[%s7080_s9 + $0x830] ss:$8 sps:$4 sm:$0xff]  }
 0x27d   : > { %4616 = vmatprep.subr.bf16.mxu0 %v5891_v45  ;;  %v5987_v45 = vld [vmem:[%s7080_s9 + $0x824] ss:$8 sps:$4 sm:$0xff]  }
 0x27e   : > { %4658 = vmatpush1.bf16.msra.mxu1 %v5886_v46  ;;  %v5982_v46 = vld [vmem:[%s7080_s9 + $0x930] ss:$8 sps:$4 sm:$0xff]  }
 0x27f   : > { %4659 = vmatprep.subr.bf16.mxu1 %v5894_v47  ;;  %v5990_v47 = vld [vmem:[%s7080_s9 + $0x924] ss:$8 sps:$4 sm:$0xff]  }
 0x280   : > { %4617 = vmatpush1.bf16.msra.mxu0 %v5889_v48  ;;  %v5985_v48 = vld [vmem:[%s7080_s9 + $0x820] ss:$8 sps:$4 sm:$0xff]  }
 0x281   : > { %4618 = vmatprep.subr.bf16.mxu0 %v5897_v49  ;;  %v5993_v49 = vld [vmem:[%s7080_s9 + $0x814] ss:$8 sps:$4 sm:$0xff]  }
 0x282   : > { %4660 = vmatpush1.bf16.msra.mxu1 %v5892_v50  ;;  %v5988_v50 = vld [vmem:[%s7080_s9 + $0x920] ss:$8 sps:$4 sm:$0xff]  }
 0x283   : > { %4661 = vmatprep.subr.bf16.mxu1 %v5900_v51  ;;  %v5996_v51 = vld [vmem:[%s7080_s9 + $0x914] ss:$8 sps:$4 sm:$0xff]  }
 0x284   : > { %4619 = vmatpush1.bf16.msra.mxu0 %v5895_v52  ;;  %v5991_v52 = vld [vmem:[%s7080_s9 + $0x810] ss:$8 sps:$4 sm:$0xff]  }
 0x285   : > { %4620 = vmatprep.subr.bf16.mxu0 %v5903_v53  ;;  %v5999_v53 = vld [vmem:[%s7080_s9 + $0x804] ss:$8 sps:$4 sm:$0xff]  }
 0x286   : > { %4662 = vmatpush1.bf16.msra.mxu1 %v5898_v54  ;;  %v5994_v54 = vld [vmem:[%s7080_s9 + $0x910] ss:$8 sps:$4 sm:$0xff]  }
 0x287   : > { %4663 = vmatprep.subr.bf16.mxu1 %v5906_v55  ;;  %v6002_v55 = vld [vmem:[%s7080_s9 + $0x904] ss:$8 sps:$4 sm:$0xff]  }
 0x288   : > { %4621 = vmatpush2.bf16.msra.mxu0 %v5901_v56  ;;  %v5997_v56 = vld [vmem:[%s7080_s9 + $0x800] ss:$8 sps:$4 sm:$0xff]  }
 0x289   : > { %4622 = vmatprep.subr.bf16.mxu0 %v5909_v57  ;;  %v6005_v57 = vld [vmem:[%s7080_s9 + $0x8f4] ss:$8 sps:$4 sm:$0xff]  }
 0x28a   : > { %4664 = vmatpush2.bf16.msra.mxu1 %v5904_v58  ;;  %v6000_v58 = vld [vmem:[%s7080_s9 + $0x900] ss:$8 sps:$4 sm:$0xff]  }
 0x28b   : > { %4665 = vmatprep.subr.bf16.mxu1 %v5912_v59  ;;  %v6008_v59 = vld [vmem:[%s7080_s9 + $0x9f4] ss:$8 sps:$4 sm:$0xff]  }
 0x28c   : > { %4623 = vmatpush2.bf16.msra.mxu0 %v5907_v60  ;;  %v6003_v60 = vld [vmem:[%s7080_s9 + $0x8f0] ss:$8 sps:$4 sm:$0xff]  }
 0x28d   : > { %4624 = vmatprep.subr.bf16.mxu0 %v5915_v61  ;;  %v6011_v61 = vld [vmem:[%s7080_s9 + $0x8e4] ss:$8 sps:$4 sm:$0xff]  }
 0x28e   : > { %4666 = vmatpush2.bf16.msra.mxu1 %v5910_v62  ;;  %v6006_v62 = vld [vmem:[%s7080_s9 + $0x9f0] ss:$8 sps:$4 sm:$0xff]  }
 0x28f   : > { %4667 = vmatprep.subr.bf16.mxu1 %v5918_v63  ;;  %v6014_v63 = vld [vmem:[%s7080_s9 + $0x9e4] ss:$8 sps:$4 sm:$0xff]  }
 0x290   : > { %4625 = vmatpush2.bf16.msra.mxu0 %v5913_v0  ;;  %v6009_v0 = vld [vmem:[%s7080_s9 + $0x8e0] ss:$8 sps:$4 sm:$0xff]  }
 0x291   : > { %4626 = vmatprep.subr.bf16.mxu0 %v5921_v1  ;;  %v6017_v1 = vld [vmem:[%s7080_s9 + $0x8d4] ss:$8 sps:$4 sm:$0xff]  }
 0x292   : > { %4668 = vmatpush2.bf16.msra.mxu1 %v5916_v2  ;;  %v6012_v2 = vld [vmem:[%s7080_s9 + $0x9e0] ss:$8 sps:$4 sm:$0xff]  }
 0x293   : > { %4669 = vmatprep.subr.bf16.mxu1 %v5924_v3  ;;  %v6020_v3 = vld [vmem:[%s7080_s9 + $0x9d4] ss:$8 sps:$4 sm:$0xff]  }
 0x294   : > { %4627 = vmatpush2.bf16.msra.mxu0 %v5919_v4  ;;  %v6015_v4 = vld [vmem:[%s7080_s9 + $0x8d0] ss:$8 sps:$4 sm:$0xff]  }
 0x295   : > { %4628 = vmatprep.subr.bf16.mxu0 %v5927_v5  ;;  %v6023_v5 = vld [vmem:[%s7080_s9 + $0x8c4] ss:$8 sps:$4 sm:$0xff]  }
 0x296   : > { %4670 = vmatpush2.bf16.msra.mxu1 %v5922_v6  ;;  %v6018_v6 = vld [vmem:[%s7080_s9 + $0x9d0] ss:$8 sps:$4 sm:$0xff]  }
 0x297   : > { %4671 = vmatprep.subr.bf16.mxu1 %v5930_v7  ;;  %v6026_v7 = vld [vmem:[%s7080_s9 + $0x9c4] ss:$8 sps:$4 sm:$0xff]  }
 0x298   : > { %4629 = vmatpush2.bf16.msra.mxu0 %v5925_v8  ;;  %v6021_v8 = vld [vmem:[%s7080_s9 + $0x8c0] ss:$8 sps:$4 sm:$0xff]  }
 0x299   : > { %4630 = vmatprep.subr.bf16.mxu0 %v5933_v9  ;;  %v6029_v9 = vld [vmem:[%s7080_s9 + $0x8b4] ss:$8 sps:$4 sm:$0xff]  }
 0x29a   : > { %4672 = vmatpush2.bf16.msra.mxu1 %v5928_v10  ;;  %v6024_v10 = vld [vmem:[%s7080_s9 + $0x9c0] ss:$8 sps:$4 sm:$0xff]  }
 0x29b   : > { %4673 = vmatprep.subr.bf16.mxu1 %v5936_v11  ;;  %v6032_v11 = vld [vmem:[%s7080_s9 + $0x9b4] ss:$8 sps:$4 sm:$0xff]  }
 0x29c   : > { %4631 = vmatpush2.bf16.msra.mxu0 %v5931_v12  ;;  %v6027_v12 = vld [vmem:[%s7080_s9 + $0x8b0] ss:$8 sps:$4 sm:$0xff]  }
 0x29d   : > { %4632 = vmatprep.subr.bf16.mxu0 %v5939_v13  ;;  %v6035_v13 = vld [vmem:[%s7080_s9 + $0x8a4] ss:$8 sps:$4 sm:$0xff]  }
 0x29e   : > { %4674 = vmatpush2.bf16.msra.mxu1 %v5934_v14  ;;  %v6030_v14 = vld [vmem:[%s7080_s9 + $0x9b0] ss:$8 sps:$4 sm:$0xff]  }
 0x29f   : > { %4675 = vmatprep.subr.bf16.mxu1 %v5942_v15  ;;  %v6038_v15 = vld [vmem:[%s7080_s9 + $0x9a4] ss:$8 sps:$4 sm:$0xff]  }
 0x2a0   : > { %4633 = vmatpush2.bf16.msra.mxu0 %v5937_v16  ;;  %v6033_v16 = vld [vmem:[%s7080_s9 + $0x8a0] ss:$8 sps:$4 sm:$0xff]  }
 0x2a1   : > { %4634 = vmatprep.subr.bf16.mxu0 %v5945_v17  ;;  %v6041_v17 = vld [vmem:[%s7080_s9 + $0x894] ss:$8 sps:$4 sm:$0xff]  }
 0x2a2   : > { %4676 = vmatpush2.bf16.msra.mxu1 %v5940_v18  ;;  %v6036_v18 = vld [vmem:[%s7080_s9 + $0x9a0] ss:$8 sps:$4 sm:$0xff]  }
 0x2a3   : > { %4677 = vmatprep.subr.bf16.mxu1 %v5948_v20  ;;  %v6039_v20 = vld [vmem:[%s7080_s9 + $0x890] ss:$8 sps:$4 sm:$0xff]  }
 0x2a4   : > { %4635 = vmatpush2.bf16.msra.mxu0 %v5943_v19  ;;  %v6044_v19 = vld [vmem:[%s7080_s9 + $0x994] ss:$8 sps:$4 sm:$0xff]  }
 0x2a5   : > { %4690 = vmatprep.subr.bf16.mxu0 %v5954_v22  ;;  %v6042_v22 = vld [vmem:[%s7080_s9 + $0x990] ss:$8 sps:$4 sm:$0xff]  }
 0x2a6   : > { %4678 = vmatpush2.bf16.msra.mxu1 %v5946_v21  ;;  %v6047_v21 = vld [vmem:[%s7080_s9 + $0x884] ss:$8 sps:$4 sm:$0xff]  }
 0x2a7   : > { %4637 = vmatmul.mubr.bf16.vlgmr.msra.gmra.mxu0 %v5949_v23  ;;  %4733 = vmatprep.subr.bf16.mxu1 %v5960_v26  ;;  %v6050_v23 = vld [vmem:[%s7080_s9 + $0x984] ss:$8 sps:$4 sm:$0xff]   ;;  %v6048_v26 = vld [vmem:[%s7080_s9 + $0x980] ss:$8 sps:$4 sm:$0xff]  }
 0x2a8   : > { %4691 = vmatpush1.bf16.msra.mxu0 %v5952_v24  ;;  %4722 = vmatprep.mubr.bf16.mxu0 %v6053_v27  ;;  %v6045_v24 = vld [vmem:[%s7080_s9 + $0x880] ss:$8 sps:$4 sm:$0xff]  }
 0x2a9   : > { %4680 = vmatmul.mubr.bf16.vlgmr.msra.gmra.mxu1 %v5955_v25  ;;  %4692 = vmatprep.subr.bf16.mxu0 %v5963_v28  ;;  %v6056_v25 = vld [vmem:[%s7080_s9 + $0xa74] ss:$8 sps:$4 sm:$0xff]   ;;  %v6051_v27 = vld [vmem:[%s7570_s0 + $0x40] ss:$100 sps:$4 sm:$0xff]  }
 0x2aa   : > { %4734 = vmatpush1.bf16.msra.mxu1 %v5958_v29  ;;  %4765 = vmatprep.mubr.bf16.mxu1 %v6059_v30  ;;  %v6062_v28 = vld [vmem:[%s7080_s9 + $0xb74] ss:$8 sps:$4 sm:$0xff]   ;;  %v6054_v29 = vld [vmem:[%s7080_s9 + $0xa70] ss:$8 sps:$4 sm:$0xff]  }
 0x2ab   : > { %4735 = vmatprep.subr.bf16.mxu1 %v5966_v31  ;;  %v6155_v30 = vld [vmem:[%s7570_s0 + $0x54] ss:$100 sps:$4 sm:$0xff]   ;;  %v6057_v31 = vld [vmem:[%s7570_s0 + $0x48] ss:$100 sps:$4 sm:$0xff]  }
 0x2ac   : > { %4693 = vmatpush1.bf16.msra.mxu0 %v5961_v32  ;;  %v6065_v32 = vld [vmem:[%s7080_s9 + $0xa64] ss:$8 sps:$4 sm:$0xff]  }
 0x2ad   : > { %4694 = vmatprep.subr.bf16.mxu0 %v5969_v33  ;;  %v6060_v33 = vld [vmem:[%s7080_s9 + $0xb70] ss:$8 sps:$4 sm:$0xff]  }
 0x2ae   : > { %4736 = vmatpush1.bf16.msra.mxu1 %v5964_v34  ;;  %v6161_v34 = vld [vmem:[%s7570_s0 + $0x5c] ss:$100 sps:$4 sm:$0xff]  }
 0x2af   : > { %4737 = vmatprep.subr.bf16.mxu1 %v5972_v35  ;;  %v6068_v35 = vld [vmem:[%s7080_s9 + $0xb64] ss:$8 sps:$4 sm:$0xff]  }
 0x2b0   : > { %4695 = vmatpush1.bf16.msra.mxu0 %v5967_v36  ;;  %v6063_v36 = vld [vmem:[%s7080_s9 + $0xa60] ss:$8 sps:$4 sm:$0xff]  }
 0x2b1   : > { %4696 = vmatprep.subr.bf16.mxu0 %v5975_v37  ;;  %v6071_v37 = vld [vmem:[%s7080_s9 + $0xa54] ss:$8 sps:$4 sm:$0xff]  }
 0x2b2   : > { %4738 = vmatpush1.bf16.msra.mxu1 %v5970_v38  ;;  %v6066_v38 = vld [vmem:[%s7080_s9 + $0xb60] ss:$8 sps:$4 sm:$0xff]  }
 0x2b3   : > { %4739 = vmatprep.subr.bf16.mxu1 %v5978_v39  ;;  %v6074_v39 = vld [vmem:[%s7080_s9 + $0xb54] ss:$8 sps:$4 sm:$0xff]  }
 0x2b4   : > { %4697 = vmatpush1.bf16.msra.mxu0 %v5973_v40  ;;  %v6069_v40 = vld [vmem:[%s7080_s9 + $0xa50] ss:$8 sps:$4 sm:$0xff]  }
 0x2b5   : > { %4698 = vmatprep.subr.bf16.mxu0 %v5981_v41  ;;  %v6077_v41 = vld [vmem:[%s7080_s9 + $0xa44] ss:$8 sps:$4 sm:$0xff]  }
 0x2b6   : > { %4740 = vmatpush1.bf16.msra.mxu1 %v5976_v42  ;;  %v6072_v42 = vld [vmem:[%s7080_s9 + $0xb50] ss:$8 sps:$4 sm:$0xff]  }
 0x2b7   : > { %4741 = vmatprep.subr.bf16.mxu1 %v5984_v43  ;;  %v6080_v43 = vld [vmem:[%s7080_s9 + $0xb44] ss:$8 sps:$4 sm:$0xff]  }
 0x2b8   : > { %4699 = vmatpush1.bf16.msra.mxu0 %v5979_v44  ;;  %v6075_v44 = vld [vmem:[%s7080_s9 + $0xa40] ss:$8 sps:$4 sm:$0xff]  }
 0x2b9   : > { %4700 = vmatprep.subr.bf16.mxu0 %v5987_v45  ;;  %v6083_v45 = vld [vmem:[%s7080_s9 + $0xa34] ss:$8 sps:$4 sm:$0xff]  }
 0x2ba   : > { %4742 = vmatpush1.bf16.msra.mxu1 %v5982_v46  ;;  %v6078_v46 = vld [vmem:[%s7080_s9 + $0xb40] ss:$8 sps:$4 sm:$0xff]  }
 0x2bb   : > { %4743 = vmatprep.subr.bf16.mxu1 %v5990_v47  ;;  %v6086_v47 = vld [vmem:[%s7080_s9 + $0xb34] ss:$8 sps:$4 sm:$0xff]  }
 0x2bc   : > { %4701 = vmatpush1.bf16.msra.mxu0 %v5985_v48  ;;  %v6081_v48 = vld [vmem:[%s7080_s9 + $0xa30] ss:$8 sps:$4 sm:$0xff]  }
 0x2bd   : > { %4702 = vmatprep.subr.bf16.mxu0 %v5993_v49  ;;  %v6089_v49 = vld [vmem:[%s7080_s9 + $0xa24] ss:$8 sps:$4 sm:$0xff]  }
 0x2be   : > { %4744 = vmatpush1.bf16.msra.mxu1 %v5988_v50  ;;  %v6084_v50 = vld [vmem:[%s7080_s9 + $0xb30] ss:$8 sps:$4 sm:$0xff]  }
 0x2bf   : > { %4745 = vmatprep.subr.bf16.mxu1 %v5996_v51  ;;  %v6092_v51 = vld [vmem:[%s7080_s9 + $0xb24] ss:$8 sps:$4 sm:$0xff]  }
 0x2c0   : > { %4703 = vmatpush1.bf16.msra.mxu0 %v5991_v52  ;;  %v6087_v52 = vld [vmem:[%s7080_s9 + $0xa20] ss:$8 sps:$4 sm:$0xff]  }
 0x2c1   : > { %4704 = vmatprep.subr.bf16.mxu0 %v5999_v53  ;;  %v6095_v53 = vld [vmem:[%s7080_s9 + $0xa14] ss:$8 sps:$4 sm:$0xff]  }
 0x2c2   : > { %4746 = vmatpush1.bf16.msra.mxu1 %v5994_v54  ;;  %v6090_v54 = vld [vmem:[%s7080_s9 + $0xb20] ss:$8 sps:$4 sm:$0xff]  }
 0x2c3   : > { %4747 = vmatprep.subr.bf16.mxu1 %v6002_v55  ;;  %v6098_v55 = vld [vmem:[%s7080_s9 + $0xb14] ss:$8 sps:$4 sm:$0xff]  }
 0x2c4   : > { %4705 = vmatpush1.bf16.msra.mxu0 %v5997_v56  ;;  %v6093_v56 = vld [vmem:[%s7080_s9 + $0xa10] ss:$8 sps:$4 sm:$0xff]  }
 0x2c5   : > { %4706 = vmatprep.subr.bf16.mxu0 %v6005_v57  ;;  %v6101_v57 = vld [vmem:[%s7080_s9 + $0xa04] ss:$8 sps:$4 sm:$0xff]  }
 0x2c6   : > { %4748 = vmatpush1.bf16.msra.mxu1 %v6000_v58  ;;  %v6096_v58 = vld [vmem:[%s7080_s9 + $0xb10] ss:$8 sps:$4 sm:$0xff]  }
 0x2c7   : > { %4749 = vmatprep.subr.bf16.mxu1 %v6008_v59  ;;  %v6104_v59 = vld [vmem:[%s7080_s9 + $0xb04] ss:$8 sps:$4 sm:$0xff]  }
 0x2c8   : > { %4707 = vmatpush2.bf16.msra.mxu0 %v6003_v60  ;;  %v6099_v60 = vld [vmem:[%s7080_s9 + $0xa00] ss:$8 sps:$4 sm:$0xff]  }
 0x2c9   : > { %4708 = vmatprep.subr.bf16.mxu0 %v6011_v61  ;;  %v6107_v61 = vld [vmem:[%s7080_s9 + $0xaf4] ss:$8 sps:$4 sm:$0xff]  }
 0x2ca   : > { %4750 = vmatpush2.bf16.msra.mxu1 %v6006_v62  ;;  %v6102_v62 = vld [vmem:[%s7080_s9 + $0xb00] ss:$8 sps:$4 sm:$0xff]  }
 0x2cb   : > { %4751 = vmatprep.subr.bf16.mxu1 %v6014_v63  ;;  %v6110_v63 = vld [vmem:[%s7080_s9 + $0xbf4] ss:$8 sps:$4 sm:$0xff]  }
 0x2cc   : > { %4709 = vmatpush2.bf16.msra.mxu0 %v6009_v0  ;;  %v6105_v0 = vld [vmem:[%s7080_s9 + $0xaf0] ss:$8 sps:$4 sm:$0xff]  }
 0x2cd   : > { %4710 = vmatprep.subr.bf16.mxu0 %v6017_v1  ;;  %v6113_v1 = vld [vmem:[%s7080_s9 + $0xae4] ss:$8 sps:$4 sm:$0xff]  }
 0x2ce   : > { %4752 = vmatpush2.bf16.msra.mxu1 %v6012_v2  ;;  %v6108_v2 = vld [vmem:[%s7080_s9 + $0xbf0] ss:$8 sps:$4 sm:$0xff]  }
 0x2cf   : > { %4753 = vmatprep.subr.bf16.mxu1 %v6020_v3  ;;  %v6116_v3 = vld [vmem:[%s7080_s9 + $0xbe4] ss:$8 sps:$4 sm:$0xff]  }
 0x2d0   : > { %4711 = vmatpush2.bf16.msra.mxu0 %v6015_v4  ;;  %v6111_v4 = vld [vmem:[%s7080_s9 + $0xae0] ss:$8 sps:$4 sm:$0xff]  }
 0x2d1   : > { %4712 = vmatprep.subr.bf16.mxu0 %v6023_v5  ;;  %v6119_v5 = vld [vmem:[%s7080_s9 + $0xad4] ss:$8 sps:$4 sm:$0xff]  }
 0x2d2   : > { %4754 = vmatpush2.bf16.msra.mxu1 %v6018_v6  ;;  %v6114_v6 = vld [vmem:[%s7080_s9 + $0xbe0] ss:$8 sps:$4 sm:$0xff]  }
 0x2d3   : > { %4755 = vmatprep.subr.bf16.mxu1 %v6026_v7  ;;  %v6122_v7 = vld [vmem:[%s7080_s9 + $0xbd4] ss:$8 sps:$4 sm:$0xff]  }
 0x2d4   : > { %4713 = vmatpush2.bf16.msra.mxu0 %v6021_v8  ;;  %v6117_v8 = vld [vmem:[%s7080_s9 + $0xad0] ss:$8 sps:$4 sm:$0xff]  }
 0x2d5   : > { %4714 = vmatprep.subr.bf16.mxu0 %v6029_v9  ;;  %v6125_v9 = vld [vmem:[%s7080_s9 + $0xac4] ss:$8 sps:$4 sm:$0xff]  }
 0x2d6   : > { %4756 = vmatpush2.bf16.msra.mxu1 %v6024_v10  ;;  %v6120_v10 = vld [vmem:[%s7080_s9 + $0xbd0] ss:$8 sps:$4 sm:$0xff]  }
 0x2d7   : > { %4757 = vmatprep.subr.bf16.mxu1 %v6032_v11  ;;  %v6128_v11 = vld [vmem:[%s7080_s9 + $0xbc4] ss:$8 sps:$4 sm:$0xff]  }
 0x2d8   : > { %4715 = vmatpush2.bf16.msra.mxu0 %v6027_v12  ;;  %v6123_v12 = vld [vmem:[%s7080_s9 + $0xac0] ss:$8 sps:$4 sm:$0xff]  }
 0x2d9   : > { %4716 = vmatprep.subr.bf16.mxu0 %v6035_v13  ;;  %v6131_v13 = vld [vmem:[%s7080_s9 + $0xab4] ss:$8 sps:$4 sm:$0xff]  }
 0x2da   : > { %4758 = vmatpush2.bf16.msra.mxu1 %v6030_v14  ;;  %v6126_v14 = vld [vmem:[%s7080_s9 + $0xbc0] ss:$8 sps:$4 sm:$0xff]  }
 0x2db   : > { %4759 = vmatprep.subr.bf16.mxu1 %v6038_v15  ;;  %v6134_v15 = vld [vmem:[%s7080_s9 + $0xbb4] ss:$8 sps:$4 sm:$0xff]  }
 0x2dc   : > { %4717 = vmatpush2.bf16.msra.mxu0 %v6033_v16  ;;  %v6129_v16 = vld [vmem:[%s7080_s9 + $0xab0] ss:$8 sps:$4 sm:$0xff]  }
 0x2dd   : > { %4718 = vmatprep.subr.bf16.mxu0 %v6041_v17  ;;  %v6137_v17 = vld [vmem:[%s7080_s9 + $0xaa4] ss:$8 sps:$4 sm:$0xff]  }
 0x2de   : > { %4760 = vmatpush2.bf16.msra.mxu1 %v6036_v18  ;;  %v6132_v18 = vld [vmem:[%s7080_s9 + $0xbb0] ss:$8 sps:$4 sm:$0xff]  }
 0x2df   : > { %4761 = vmatprep.subr.bf16.mxu1 %v6044_v19  ;;  %v6140_v19 = vld [vmem:[%s7080_s9 + $0xba4] ss:$8 sps:$4 sm:$0xff]  }
 0x2e0   : > { %4719 = vmatpush2.bf16.msra.mxu0 %v6039_v20  ;;  %v6135_v20 = vld [vmem:[%s7080_s9 + $0xaa0] ss:$8 sps:$4 sm:$0xff]  }
 0x2e1   : > { %4720 = vmatprep.subr.bf16.mxu0 %v6047_v21  ;;  %v6143_v21 = vld [vmem:[%s7080_s9 + $0xa94] ss:$8 sps:$4 sm:$0xff]  }
 0x2e2   : > { %4762 = vmatpush2.bf16.msra.mxu1 %v6042_v22  ;;  %v6138_v22 = vld [vmem:[%s7080_s9 + $0xba0] ss:$8 sps:$4 sm:$0xff]  }
 0x2e3   : > { %4763 = vmatprep.subr.bf16.mxu1 %v6050_v23  ;;  %v6146_v23 = vld [vmem:[%s7080_s9 + $0xb94] ss:$8 sps:$4 sm:$0xff]  }
 0x2e4   : > { %4721 = vmatpush2.bf16.msra.mxu0 %v6045_v24  ;;  %v6141_v24 = vld [vmem:[%s7080_s9 + $0xa90] ss:$8 sps:$4 sm:$0xff]  }
 0x2e5   : > { %4776 = vmatprep.subr.bf16.mxu0 %v6056_v25  ;;  %v6149_v25 = vld [vmem:[%s7080_s9 + $0xa84] ss:$8 sps:$4 sm:$0xff]  }
 0x2e6   : > { %4764 = vmatpush2.bf16.msra.mxu1 %v6048_v26  ;;  %v6144_v26 = vld [vmem:[%s7080_s9 + $0xb90] ss:$8 sps:$4 sm:$0xff]  }
 0x2e7   : > { %4723 = vmatmul.mubr.bf16.vlgmr.msra.gmra.mxu0 %v6051_v27  ;;  %4819 = vmatprep.subr.bf16.mxu1 %v6062_v28  ;;  %v6152_v27 = vld [vmem:[%s7080_s9 + $0xb84] ss:$8 sps:$4 sm:$0xff]   ;;  %v6147_v28 = vld [vmem:[%s7080_s9 + $0xa80] ss:$8 sps:$4 sm:$0xff]  }
 0x2e8   : > { %4777 = vmatpush1.bf16.msra.mxu0 %v6054_v29  ;;  %4808 = vmatprep.mubr.bf16.mxu0 %v6155_v30  ;;  %v6158_v29 = vld [vmem:[%s7080_s9 + $0xc34] ss:$8 sps:$4 sm:$0xff]   ;;  %v6150_v30 = vld [vmem:[%s7080_s9 + $0xb80] ss:$8 sps:$4 sm:$0xff]  }
 0x2e9   : > { %4766 = vmatmul.mubr.bf16.vlgmr.msra.gmra.mxu1 %v6057_v31  ;;  %4778 = vmatprep.subr.bf16.mxu0 %v6065_v32  ;;  %v6153_v31 = vld [vmem:[%s7570_s0 + $0x50] ss:$100 sps:$4 sm:$0xff]  }
 0x2ea   : > { %4820 = vmatpush1.bf16.msra.mxu1 %v6060_v33  ;;  %4851 = vmatprep.mubr.bf16.mxu1 %v6161_v34  ;;  %v6156_v32 = vld [vmem:[%s7080_s9 + $0xc30] ss:$8 sps:$4 sm:$0xff]   ;;  %v6164_v34 = vld [vmem:[%s7080_s9 + $0xc24] ss:$8 sps:$4 sm:$0xff]  }
 0x2eb   : > { %4821 = vmatprep.subr.bf16.mxu1 %v6068_v35  ;;  %v6159_v33 = vld [vmem:[%s7570_s0 + $0x58] ss:$100 sps:$4 sm:$0xff]   ;;  %v6162_v35 = vld [vmem:[%s7080_s9 + $0xc20] ss:$8 sps:$4 sm:$0xff]  }
 0x2ec   : > { %4779 = vmatpush1.bf16.msra.mxu0 %v6063_v36  ;;  %v6212_v36 = vmov 0  }
 0x2ed   : > { %4780 = vmatprep.subr.bf16.mxu0 %v6071_v37  ;;  %v6167_v37 = vld [vmem:[%s7080_s9 + $0xc14] ss:$8 sps:$4 sm:$0xff]  }
 0x2ee   : > { %4822 = vmatpush1.bf16.msra.mxu1 %v6066_v38  ;;  %v6165_v38 = vld [vmem:[%s7080_s9 + $0xc10] ss:$8 sps:$4 sm:$0xff]  }
 0x2ef   : > { %4823 = vmatprep.subr.bf16.mxu1 %v6074_v39  ;;  %v6170_v39 = vld [vmem:[%s7080_s9 + $0xc04] ss:$8 sps:$4 sm:$0xff]  }
 0x2f0   : > { %4781 = vmatpush1.bf16.msra.mxu0 %v6069_v40  ;;  %v6168_v40 = vld [vmem:[%s7080_s9 + $0xc00] ss:$8 sps:$4 sm:$0xff]   ;;  %s5074_s9 = sshll.u32 %s6202_s14, 1 }
 0x2f1   : > { %4782 = vmatprep.subr.bf16.mxu0 %v6077_v41  ;;  %v6171_v41 = vld [vmem:[%s7570_s0 + $0x60] ss:$100 sps:$4 sm:$0xff]   ;;  %p1820_p11 = scmp.lt.s32.totalorder %s5074_s9, 7 }
 0x2f2   : > { %4824 = vmatpush1.bf16.msra.mxu1 %v6072_v42  ;;  %v4380_v42 = vpop.f32.mrf.mxu0 }
 0x2f3   : > { %4825 = vmatprep.subr.bf16.mxu1 %v6080_v43  ;;  %s7582_s9 = smov (!%p1820_p11, %s5074_s9), 7 }
 0x2f4   : > { %4783 = vmatpush1.bf16.msra.mxu0 %v6075_v44  ;;  %v4382_v43 = vpop.f32.mrf.mxu0  ;;  %v4423_v44 = vpop.f32.mrf.mxu1  ;;  %s1822_s6 = scalar_lea.vmem %s7572_s2, %s7582_s9 }
 0x2f5   : > { %4784 = vmatprep.subr.bf16.mxu0 %v6083_v45 }
 0x2f6   : > { %4826 = vmatpush1.bf16.msra.mxu1 %v6078_v46  ;;  %v4384_v45 = vpop.f32.mrf.mxu0  ;;  %v4425_v46 = vpop.f32.mrf.mxu1 }
 0x2f7   : > { %4827 = vmatprep.subr.bf16.mxu1 %v6086_v47 }
 0x2f8   : > { %4785 = vmatpush1.bf16.msra.mxu0 %v6081_v48  ;;  %v4386_v47 = vpop.f32.mrf.mxu0  ;;  %v4427_v48 = vpop.f32.mrf.mxu1 }
 0x2f9   : > { %4786 = vmatprep.subr.bf16.mxu0 %v6089_v49 }
 0x2fa   : > { %4828 = vmatpush1.bf16.msra.mxu1 %v6084_v50  ;;  %v4466_v49 = vpop.f32.mrf.mxu0  ;;  %v4429_v50 = vpop.f32.mrf.mxu1 }
 0x2fb   : > { %4829 = vmatprep.subr.bf16.mxu1 %v6092_v51 }
 0x2fc   : > { %4787 = vmatpush1.bf16.msra.mxu0 %v6087_v52  ;;  %v4468_v51 = vpop.f32.mrf.mxu0  ;;  %v4509_v52 = vpop.f32.mrf.mxu1 }
 0x2fd   : > { %4788 = vmatprep.subr.bf16.mxu0 %v6095_v53 }
 0x2fe   : > { %4830 = vmatpush1.bf16.msra.mxu1 %v6090_v54  ;;  %v4470_v53 = vpop.f32.mrf.mxu0  ;;  %v4511_v54 = vpop.f32.mrf.mxu1 }
 0x2ff   : > { %4831 = vmatprep.subr.bf16.mxu1 %v6098_v55 }
 0x300   : > { %4789 = vmatpush1.bf16.msra.mxu0 %v6093_v56  ;;  %v4472_v55 = vpop.f32.mrf.mxu0  ;;  %v4513_v56 = vpop.f32.mrf.mxu1 }
 0x301   : > { %4790 = vmatprep.subr.bf16.mxu0 %v6101_v57 }
 0x302   : > { %4832 = vmatpush1.bf16.msra.mxu1 %v6096_v58  ;;  %v4515_v58 = vpop.f32.mrf.mxu1 }
 0x303   : > { %4833 = vmatprep.subr.bf16.mxu1 %v6104_v59 }
 0x304   : > { %4791 = vmatpush1.bf16.msra.mxu0 %v6099_v60 }
 0x305   : > { %4792 = vmatprep.subr.bf16.mxu0 %v6107_v61  ;;  %v2247_v61 = vlaneseq }
 0x306   : > { %4834 = vmatpush1.bf16.msra.mxu1 %v6102_v62 }
 0x307   : > { %4835 = vmatprep.subr.bf16.mxu1 %v6110_v63 }
 0x308   : > { %4793 = vmatpush2.bf16.msra.mxu0 %v6105_v0  ;;  %v2248_v0 = vshrl.u32 %v2247_v61, 7 }
 0x309   : > { %4794 = vmatprep.subr.bf16.mxu0 %v6113_v1 }
 0x30a   : > { %4836 = vmatpush2.bf16.msra.mxu1 %v6108_v2 }
 0x30b   : > { %4837 = vmatprep.subr.bf16.mxu1 %v6116_v3  ;;  %v2249_v3 = vsub.s32 0, %v2248_v0 }
 0x30c   : > { %4795 = vmatpush2.bf16.msra.mxu0 %v6111_v4  ;;  %v2245_v4 = vld [vmem:[%s1822_s6] sm:$0x3] }
 0x30d   : > { %4796 = vmatprep.subr.bf16.mxu0 %v6119_v5 }
 0x30e   : > { %4838 = vmatpush2.bf16.msra.mxu1 %v6114_v6  ;;  %v2253_v6 = vsub.s32 1, %v2248_v0 }
 0x30f   : > { %4839 = vmatprep.subr.bf16.mxu1 %v6122_v7 }
 0x310   : > { %4797 = vmatpush2.bf16.msra.mxu0 %v6117_v8  ;;  %v2250_v8 = vrot.slane %v2245_v4, %v2249_v3 }
 0x311   : > { %4798 = vmatprep.subr.bf16.mxu0 %v6125_v9 }
 0x312   : > { %4840 = vmatpush2.bf16.msra.mxu1 %v6120_v10 }
 0x313   : > { %4841 = vmatprep.subr.bf16.mxu1 %v6128_v11  ;;  %v2254_v11 = vrot.slane %v2245_v4, %v2253_v6 }
 0x314   : > { %4799 = vmatpush2.bf16.msra.mxu0 %v6123_v12  ;;  %v4381_v12 = vadd.f32 %v4380_v42, %v2250_v8 }
 0x315   : > { %4800 = vmatprep.subr.bf16.mxu0 %v6131_v13 }
 0x316   : > { %4842 = vmatpush2.bf16.msra.mxu1 %v6126_v14 }
 0x317   : > { %4843 = vmatprep.subr.bf16.mxu1 %v6134_v15  ;;  %v4383_v15 = vadd.f32 %v4382_v43, %v2254_v11 }
 0x318   : > { %4801 = vmatpush2.bf16.msra.mxu0 %v6129_v16  ;;  %v4424_v16 = vadd.f32 %v4423_v44, %v4381_v12 }
 0x319   : > { %4802 = vmatprep.subr.bf16.mxu0 %v6137_v17  ;;  %v4385_v17 = vadd.f32 %v4384_v45, %v2250_v8 }
 0x31a   : > { %4844 = vmatpush2.bf16.msra.mxu1 %v6132_v18 }
 0x31b   : > { %4845 = vmatprep.subr.bf16.mxu1 %v6140_v19 }
 0x31c   : > { %4803 = vmatpush2.bf16.msra.mxu0 %v6135_v20  ;;  %v4426_v20 = vadd.f32 %v4425_v46, %v4383_v15 }
 0x31d   : > { %4804 = vmatprep.subr.bf16.mxu0 %v6143_v21  ;;  %v4387_v21 = vadd.f32 %v4386_v47, %v2254_v11 }
 0x31e   : > { %4846 = vmatpush2.bf16.msra.mxu1 %v6138_v22  ;;  %v4467_v22 = vadd.f32 %v4466_v49, %v4424_v16 }
 0x31f   : > { %4847 = vmatprep.subr.bf16.mxu1 %v6146_v23 }
 0x320   : > { %4805 = vmatpush2.bf16.msra.mxu0 %v6141_v24  ;;  %v4428_v24 = vadd.f32 %v4427_v48, %v4385_v17 }
 0x321   : > { %4806 = vmatprep.subr.bf16.mxu0 %v6149_v25  ;;  %v4469_v25 = vadd.f32 %v4468_v51, %v4426_v20 }
 0x322   : > { %4848 = vmatpush2.bf16.msra.mxu1 %v6144_v26 }
 0x323   : > { %4849 = vmatprep.subr.bf16.mxu1 %v6152_v27  ;;  %v4430_v27 = vadd.f32 %v4429_v50, %v4387_v21 }
 0x324   : > { %4807 = vmatpush2.bf16.msra.mxu0 %v6147_v28  ;;  %v4510_v28 = vadd.f32 %v4509_v52, %v4467_v22 }
 0x325   : > { %4870 = vmatprep.subr.bf16.mxu0 %v6158_v29  ;;  %v4471_v29 = vadd.f32 %v4470_v53, %v4428_v24 }
 0x326   : > { %4850 = vmatpush2.bf16.msra.mxu1 %v6150_v30 }
 0x327   : > { %4809 = vmatmul.mubr.bf16.vlgmr.msra.gmra.mxu0 %v6153_v31  ;;  %v4552_v57 = vpop.f32.mrf.mxu0 }
 0x328   : > { %4871 = vmatpush1.bf16.msra.mxu0 %v6156_v32  ;;  %4894 = vmatprep.mubr.bf16.mxu0 %v6212_v36  ;;  %v4512_v32 = vadd.f32 %v4511_v54, %v4469_v25 }
 0x329   : > { %4852 = vmatmul.mubr.bf16.vlgmr.msra.gmra.mxu1 %v6159_v33  ;;  %4872 = vmatprep.subr.bf16.mxu0 %v6164_v34  ;;  %v4554_v59 = vpop.f32.mrf.mxu0  ;;  %v4595_v60 = vpop.f32.mrf.mxu1  ;;  %v4473_v33 = vadd.f32 %v4472_v55, %v4430_v27  ;;  %v4553_v34 = vadd.f32 %v4552_v57, %v4510_v28 }
 0x32a   : > { %v4555_v36 = vadd.f32 %v4554_v59, %v4512_v32 }
 0x32b   : > { %v4556_v62 = vpop.f32.mrf.mxu0  ;;  %v4597_v63 = vpop.f32.mrf.mxu1 }
 0x32c   : > { %4873 = vmatpush1.bf16.msra.mxu0 %v6162_v35  ;;  %v4514_v35 = vadd.f32 %v4513_v56, %v4471_v29  ;;  %v4598_v42 = vadd.f32 %v4597_v63, %v4555_v36 }
 0x32d   : > { %4874 = vmatprep.subr.bf16.mxu0 %v6167_v37  ;;  %v4558_v1 = vpop.f32.mrf.mxu0  ;;  %v4599_v2 = vpop.f32.mrf.mxu1 }
 0x32f   : > { %v4601_v7 = vpop.f32.mrf.mxu1 }
 0x330   : > { %4875 = vmatpush1.bf16.msra.mxu0 %v6165_v38 }
 0x331   : > { %4876 = vmatprep.subr.bf16.mxu0 %v6170_v39  ;;  %v4516_v39 = vadd.f32 %v4515_v58, %v4473_v33 }
 0x333   : > { %v4559_v43 = vadd.f32 %v4558_v1, %v4516_v39 }
 0x334   : > { %4877 = vmatpush1.bf16.msra.mxu0 %v6168_v40  ;;  %v4596_v40 = vadd.f32 %v4595_v60, %v4553_v34 }
 0x335   : > { %v4602_v50 = vadd.f32 %v4601_v7, %v4559_v43 }
 0x337   : > { %5492 = vmatmul.mubr.msk.bf16.vlgmr.msra.gmra.mxu0 %vm4342_vm0, %v6171_v41  ;;  %v4557_v41 = vadd.f32 %v4556_v62, %v4514_v35 }
 0x339   : > { %v4600_v47 = vadd.f32 %v4599_v2, %v4557_v41 }
 0x367   : > { %v4638_v5 = vpop.f32.mrf.mxu0 }
 0x368   : > { %v4639_v44 = vadd.f32 %v4638_v5, %v4596_v40 }
 0x369   : > { %v4640_v9 = vpop.f32.mrf.mxu0  ;;  %v4681_v10 = vpop.f32.mrf.mxu1 }
 0x36a   : > { %v4641_v48 = vadd.f32 %v4640_v9, %v4598_v42  ;;  %v4682_v51 = vadd.f32 %v4681_v10, %v4639_v44 }
 0x36b   : > { %v4642_v13 = vpop.f32.mrf.mxu0  ;;  %v4683_v14 = vpop.f32.mrf.mxu1 }
 0x36c   : > { %v4643_v52 = vadd.f32 %v4642_v13, %v4600_v47  ;;  %v4684_v54 = vadd.f32 %v4683_v14, %v4641_v48 }
 0x36d   : > { %v4644_v18 = vpop.f32.mrf.mxu0  ;;  %v4685_v19 = vpop.f32.mrf.mxu1 }
 0x36e   : > { %v4645_v55 = vadd.f32 %v4644_v18, %v4602_v50  ;;  %v4686_v58 = vadd.f32 %v4685_v19, %v4643_v52 }
 0x36f   : > { %v4687_v26 = vpop.f32.mrf.mxu1 }
 0x370   : > { %v4688_v61 = vadd.f32 %v4687_v26, %v4645_v55 }
 0x3a7   : > { %v4724_v23 = vpop.f32.mrf.mxu0 }
 0x3a8   : > { %v4725_v56 = vadd.f32 %v4724_v23, %v4682_v51 }
 0x3a9   : > { %v4726_v30 = vpop.f32.mrf.mxu0  ;;  %v4767_v31 = vpop.f32.mrf.mxu1 }
 0x3aa   : > { %v4727_v60 = vadd.f32 %v4726_v30, %v4684_v54  ;;  %v4768_v62 = vadd.f32 %v4767_v31, %v4725_v56 }
 0x3ab   : > { %v4728_v37 = vpop.f32.mrf.mxu0  ;;  %v4769_v38 = vpop.f32.mrf.mxu1 }
 0x3ac   : > { %v4729_v63 = vadd.f32 %v4728_v37, %v4686_v58  ;;  %v4770_v3 = vadd.f32 %v4769_v38, %v4727_v60 }
 0x3ad   : > { %v4730_v45 = vpop.f32.mrf.mxu0  ;;  %v4771_v46 = vpop.f32.mrf.mxu1 }
 0x3ae   : > { %v4731_v2 = vadd.f32 %v4730_v45, %v4688_v61  ;;  %v4772_v5 = vadd.f32 %v4771_v46, %v4729_v63 }
 0x3af   : > { %v4773_v53 = vpop.f32.mrf.mxu1 }
 0x3b0   : > { %v4774_v9 = vadd.f32 %v4773_v53, %v4731_v2 }
 0x3e7   : > { %v4810_v49 = vpop.f32.mrf.mxu0 }
 0x3e8   : > { %v4811_v4 = vadd.f32 %v4810_v49, %v4768_v62 }
 0x3e9   : > { %v4812_v57 = vpop.f32.mrf.mxu0  ;;  %v4853_v59 = vpop.f32.mrf.mxu1 }
 0x3ea   : > { %v4813_v6 = vadd.f32 %v4812_v57, %v4770_v3  ;;  %v4854_v10 = vadd.f32 %v4853_v59, %v4811_v4 }
 0x3eb   : > { %v4814_v0 = vpop.f32.mrf.mxu0  ;;  %v4855_v1 = vpop.f32.mrf.mxu1 }
 0x3ec   : > { %v4815_v11 = vadd.f32 %v4814_v0, %v4772_v5  ;;  %v4856_v13 = vadd.f32 %v4855_v1, %v4813_v6 }
 0x3ed   : > { %v4816_v7 = vpop.f32.mrf.mxu0  ;;  %v4857_v8 = vpop.f32.mrf.mxu1 }
 0x3ee   : > { %v4817_v14 = vadd.f32 %v4816_v7, %v4774_v9  ;;  %v4858_v18 = vadd.f32 %v4857_v8, %v4815_v11 }
 0x3ef   : > { %v4859_v16 = vpop.f32.mrf.mxu1 }
 0x3f0   : > { %v4860_v21 = vadd.f32 %v4859_v16, %v4817_v14 }
 0x3f7   : > { %v4896_v12 = vpop.f32.mrf.mxu0 }
 0x3f8   : > { %v4897_v15 = vadd.f32 %v4896_v12, %v4854_v10 }
 0x3f9   : > { %v4898_v17 = vpop.f32.mrf.mxu0 }
 0x3fa   : > { %v4899_v19 = vadd.f32 %v4898_v17, %v4856_v13  ;;  %v4905_v22 = vmax.f32 %v4897_v15, 0.0 }
 0x3fb   : > { %v4900_v20 = vpop.f32.mrf.mxu0 }
 0x3fc   : > { %v4906_v23 = vmax.f32 %v4899_v19, 0.0  ;;  %v4901_v24 = vadd.f32 %v4900_v20, %v4858_v18 }
 0x3fd   : > { %v4902_v25 = vpop.f32.mrf.mxu0 }
 0x3fe   : > { %v5501_v26 = vpack.c.bf16 %v4906_v23, %v4905_v22  ;;  %v4903_v27 = vadd.f32 %v4902_v25, %v4860_v21  ;;  %v4907_v28 = vmax.f32 %v4901_v24, 0.0 }
 0x400   : > { %4921 = vst [vmem:[%s1810_s8] sm:$0xff] %v5501_v26  ;;  %v4908_v29 = vmax.f32 %v4903_v27, 0.0  ;;  %4929 = sbr.rel (!%p6268_p6) target bundleno = 1037 (0x40d), region = 74 }
 0x402   : > { %v5502_v30 = vpack.c.bf16 %v4908_v29, %v4907_v28 }
 0x404   : > { %4922 = vst [vmem:[%s1810_s8 + $0x8] sm:$0xff] %v5502_v30 }
 0x407   : > { %v4966_v31 = vld [vmem:[%s1810_s8] sm:$0xff] }
 0x408   : > { %4967 = vst [vmem:[%s4935_s11] sm:$0xff] %v4966_v31 }
 0x40b   : > { %v4968_v32 = vld [vmem:[%s1810_s8 + $0x8] sm:$0xff] }
 0x40c   : > { %4969 = vst [vmem:[%s4935_s11 + $0x20] sm:$0xff] %v4968_v32 }
 0x40d PF: > { %s13_s16 = sadd.s32 1, %s6210_s16   ;;  %s7575_s12 = smov %s6198_s13 }
 0x40e   : > { %p10_p12 = scmp.ge.s32.totalorder %s13_s16, 6   ;;  %s7576_s13 = smov %s6273_s22 }
 0x40f   : > { %s7577_s14 = smov %s6206_s15  ;;  %s7578_s15 = smov %s7580_s17 }
 0x410   :  { %12 = sbr.rel (!%p10_p12) target bundleno = 3 (0x3), region = 149 }

</bundles_post_ra>
